<compile_context>
chip_gen: v7x
topology: tpu7x:2x2x1
jax: 0.10.0
libtpu: 0.0.40
codegen_flags: <defaults>
</compile_context>

<pallas_src>
import functools
import math

import jax
import jax.numpy as jnp
from jax import lax
from jax.experimental import pallas as pl
from jax.experimental.pallas import tpu as pltpu


def _pooled_embedding_kernel(ids_ref, len_ref, emb_ref, out_ref, acc_ref, *,
                             s_chunk):
    """One (batch-tile, d-tile, v-tile) grid step.

    counts[b, j] = #{ s < lengths[b] : ids[b, s] == v_base + j }   (masked histogram, VPU)
    acc         += counts_bf16 @ emb_tile_bf16                      (MXU, f32 accumulate)
    out          = acc / max(lengths, 1)                            (at the last v-tile)
    """
    v_idx = pl.program_id(2)
    nv = pl.num_programs(2)

    tb, seq = ids_ref.shape
    tv, _ = emb_ref.shape
    v_base = v_idx * tv

    lengths = len_ref[...]                                        # (tb, 1) int32

    # ---- masked token histogram for this vocab tile (cheap VPU work that
    # co-issues with the MXU matmul; no cache needed) --------------------------
    pos = lax.broadcasted_iota(jnp.int32, (tb, seq), 1)
    masked_ids = jnp.where(pos < lengths, ids_ref[...], -1)       # -1 never matches
    v_iota = lax.broadcasted_iota(jnp.int32, (1, 1, tv), 2) + v_base

    counts = jnp.zeros((tb, tv), jnp.int32)
    # Static chunked loop with static slices keeps the (tb, s_chunk, tv) compare
    # intermediate bounded (s_chunk chosen in the wrapper against a vreg budget).
    # TODO(synk): for large S switch to lax.fori_loop(..., unroll=8).
    for c in range(seq // s_chunk):
        ids_c = masked_ids[:, c * s_chunk:(c + 1) * s_chunk]      # (tb, s_chunk)
        counts = counts + jnp.sum(
            (ids_c[:, :, None] == v_iota).astype(jnp.int32), axis=1)

    # ---- accumulate the pooled embedding on the MXU --------------------------
    @pl.when(v_idx == 0)
    def _():
        acc_ref[...] = jnp.zeros_like(acc_ref)

    # counts are exact in bf16 for S <= 256 (asserted in the wrapper).
    acc_ref[...] += jnp.dot(counts.astype(jnp.bfloat16), emb_ref[...],
                            preferred_element_type=jnp.float32)

    # ---- finalize: exact division by the number of valid tokens --------------
    @pl.when(v_idx == nv - 1)
    def _():
        denom = jnp.maximum(lengths.astype(jnp.float32), 1.0)     # (tb, 1)
        out_ref[...] = (acc_ref[...] / denom).astype(out_ref.dtype)


def _pick_tile(dim, target, align):
    """Largest tile <= target that divides dim and is align-aligned (or dim itself)."""
    if dim <= target:
        return dim
    t = (target // align) * align
    while t >= align:
        if dim % t == 0:
            return t
        t -= align
    return dim


def text_encoder_forward(ids, lengths, embedding_table, *,
                         tb=None, td=None, tv=None, s_chunk=8):
    """Concrete AbstractBaseTextEncoder.forward: masked-mean pooled embeddings."""
    B, S = ids.shape
    V, D = embedding_table.shape

    # Counts are contracted in bf16; integers are exact in bf16 only up to 256.
    assert S <= 256, "bf16 histogram contraction requires S <= 256"

    tb = _pick_tile(B, 128, 8) if tb is None else tb      # keep nb >= 2 on v7x if B allows
    td = _pick_tile(D, 512, 128) if td is None else td    # lane-dense, matches 256-wide MXU N
    tv = _pick_tile(V, 512, 8) if tv is None else tv

    # Bound the live (tb, s_chunk, tv) int32 compare intermediate to ~32 vregs.
    s_max = max(1, (128 * 1024) // (tb * tv * 4))
    s_chunk = math.gcd(S, max(1, min(s_chunk, s_max)))

    assert B % tb == 0 and D % td == 0 and V % tv == 0 and S % s_chunk == 0
    assert (tb % 8 == 0 or tb == B) and (td % 128 == 0 or td == D)
    assert tv % 8 == 0 or tv == V
    nb, nd, nv = B // tb, D // td, V // tv

    kernel = functools.partial(_pooled_embedding_kernel, s_chunk=s_chunk)

    cost = pl.CostEstimate(
        flops=2 * B * V * D,                                   # histogram @ table
        transcendentals=0,
        bytes_accessed=2 * V * D * nb + 4 * B * S + 4 * B + 4 * B * D,
    )

    return pl.pallas_call(
        kernel,
        out_shape=jax.ShapeDtypeStruct((B, D), jnp.float32),
        grid_spec=pltpu.PrefetchScalarGridSpec(
            num_scalar_prefetch=0,
            grid=(nb, nd, nv),                                 # v (reduction) innermost
            in_specs=[
                pl.BlockSpec((tb, S), lambda b, d, v: (b, 0)),   # token ids
                pl.BlockSpec((tb, 1), lambda b, d, v: (b, 0)),   # lengths
                # Embedding table streamed as (tv, td) bf16 tiles; when
                # nv == nd == 1 the block index is constant, so the whole table
                # is DMA'd once and stays resident (small-table fast path).
                # TODO(synk): sweep pipeline_mode=pl.Buffered(3) here on v5e.
                pl.BlockSpec((tv, td), lambda b, d, v: (v, d)),
            ],
            out_specs=pl.BlockSpec((tb, td), lambda b, d, v: (b, d)),
            scratch_shapes=[pltpu.VMEM((tb, td), jnp.float32)],  # f32 accumulator
        ),
        compiler_params=pltpu.CompilerParams(
            # Batch axis parallel (megacore); v is the reduction into acc_ref so it
            # must stay sequential. (d could also be parallel now that there is no
            # per-d histogram cache, but keep it arbitrary/conservative.)
            dimension_semantics=("parallel", "arbitrary", "arbitrary"),
            # 48 MiB fits v7x's 64 MiB physical VMEM; v5e/v6e have 128 MiB.
            vmem_limit_bytes=48 * 1024 * 1024,
        ),
        cost_estimate=cost,
    )(ids.astype(jnp.int32),
      lengths.reshape(B, 1).astype(jnp.int32),
      embedding_table.astype(jnp.bfloat16))   # bf16 table: native MXU path, half HBM traffic


def init_params(vocabulary_len, padding_idx, feature_size, key):
    """Deterministic nn.Embedding-style init; padding_idx row zeroed."""
    emb = jax.random.normal(key, (vocabulary_len, feature_size), jnp.float32)
    return emb.at[padding_idx].set(0.0)


def reference_forward(ids, lengths, emb):
    """Plain-JAX reference for correctness checking."""
    gathered = emb[ids]                                      # (B, S, D)
    pos = jnp.arange(ids.shape[1])[None, :]                  # (1, S)
    mask = (pos < lengths[:, None]).astype(jnp.float32)      # (B, S)
    summed = jnp.sum(gathered * mask[:, :, None], axis=1)    # (B, D)
    denom = jnp.maximum(lengths.astype(jnp.float32), 1.0)[:, None]
    return summed / denom


if __name__ == "__main__":
    vocabulary_len = 512
    padding_idx = 0
    feature_size = 256
    batch = 16
    seq = 16

    key = jax.random.PRNGKey(0)
    k_emb, k_ids, k_len = jax.random.split(key, 3)

    embedding_table = init_params(vocabulary_len, padding_idx, feature_size, k_emb)

    lengths = jax.random.randint(k_len, (batch,), 0, seq + 1, dtype=jnp.int32)
    ids = jax.random.randint(k_ids, (batch, seq), 1, vocabulary_len, dtype=jnp.int32)
    pos = jnp.arange(seq)[None, :]
    ids = jnp.where(pos < lengths[:, None], ids, padding_idx).astype(jnp.int32)

    # Reference using the same bf16-rounded table the kernel contracts against,
    # plus a looser sanity check against the pure-f32 module semantics.
    emb_bf16 = embedding_table.astype(jnp.bfloat16).astype(jnp.float32)
    ref = reference_forward(ids, lengths, emb_bf16)
    ref_f32 = reference_forward(ids, lengths, embedding_table)

    # 1) Default tiling: the 512x256 table fits in a single resident (V, D) tile,
    #    grid collapses to one step per batch tile (small-table fast path).
    out = jax.block_until_ready(text_encoder_forward(ids, lengths, embedding_table))
    assert out.shape == (batch, feature_size)
    assert jnp.allclose(out, ref, atol=1e-3, rtol=1e-3), float(jnp.max(jnp.abs(out - ref)))
    assert jnp.allclose(out, ref_f32, atol=5e-2, rtol=5e-2)

    # 2) Force a multi-tile grid to exercise the streamed-table / v-axis
    #    accumulator path (grid (2, 2, 4)).
    out_tiled = jax.block_until_ready(
        text_encoder_forward(ids, lengths, embedding_table, tb=8, td=128, tv=128))
    assert jnp.allclose(out_tiled, ref, atol=1e-3, rtol=1e-3), \
        float(jnp.max(jnp.abs(out_tiled - ref)))

    print("KERNEL_OK")
</pallas_src>

<mosaic_0001>
module attributes {stable_mosaic.version = 11 : i64} {
  func.func @_pooled_embedding_kernel(%arg0: i32, %arg1: i32, %arg2: i32, %arg3: memref<16x16xi32, #tpu.memory_space<vmem>>, %arg4: memref<16x1xi32, #tpu.memory_space<vmem>>, %arg5: memref<512x256xbf16, #tpu.memory_space<vmem>>, %arg6: memref<16x256xf32, #tpu.memory_space<vmem>>, %arg7: memref<16x256xf32, #tpu.memory_space<vmem>>) attributes {dimension_semantics = [#tpu.dimension_semantics<parallel>, #tpu.dimension_semantics<arbitrary>, #tpu.dimension_semantics<arbitrary>], iteration_bounds = array<i64: 1, 1, 1>, scalar_prefetch = 0 : i64, scratch_operands = 1 : i64, tpu.core_type = #tpu.core_type<tc>, window_params = [{transform_indices = @transform_0, window_bounds = array<i64: 16, 16>}, {transform_indices = @transform_1, window_bounds = array<i64: 16, 1>}, {transform_indices = @transform_2, window_bounds = array<i64: 512, 256>}, {transform_indices = @transform_3, window_bounds = array<i64: 16, 256>}]} {
    %c512_i32 = arith.constant 512 : i32
    %0 = arith.muli %arg2, %c512_i32 : i32
    %c0 = arith.constant 0 : index
    %c0_0 = arith.constant 0 : index
    %1 = vector.load %arg4[%c0, %c0_0] : memref<16x1xi32, #tpu.memory_space<vmem>>, vector<16x1xi32>
    %2 = tpu.iota {dimensions = array<i32: 1>} : vector<16x16xi32>
    %3 = vector.broadcast %1 : vector<16x1xi32> to vector<16x16xi32>
    %4 = arith.cmpi slt, %2, %3 : vector<16x16xi32>
    %c0_1 = arith.constant 0 : index
    %c0_2 = arith.constant 0 : index
    %5 = vector.load %arg3[%c0_1, %c0_2] : memref<16x16xi32, #tpu.memory_space<vmem>>, vector<16x16xi32>
    %c-1_i32 = arith.constant -1 : i32
    %6 = vector.broadcast %c-1_i32 : i32 to vector<16x16xi32>
    %7 = arith.select %4, %5, %6 : vector<16x16xi1>, vector<16x16xi32>
    %8 = tpu.iota {dimensions = array<i32: 2>} : vector<1x1x512xi32>
    %9 = vector.broadcast %0 : i32 to vector<1x1x512xi32>
    %10 = arith.addi %8, %9 : vector<1x1x512xi32>
    %c0_i32 = arith.constant 0 : i32
    %11 = vector.broadcast %c0_i32 : i32 to vector<16x512xi32>
    %12 = vector.extract_strided_slice %7 {offsets = [0, 0], sizes = [16, 4], strides = [1, 1]} : vector<16x16xi32> to vector<16x4xi32>
    %13 = vector.shape_cast %12 : vector<16x4xi32> to vector<16x4x1xi32>
    %14 = vector.broadcast %13 : vector<16x4x1xi32> to vector<16x4x512xi32>
    %15 = vector.broadcast %10 : vector<1x1x512xi32> to vector<16x4x512xi32>
    %16 = arith.cmpi eq, %14, %15 : vector<16x4x512xi32>
    %17 = arith.extui %16 : vector<16x4x512xi1> to vector<16x4x512xi32>
    %cst = arith.constant dense<0> : vector<16x512xi32>
    %18 = vector.multi_reduction <add>, %17, %cst [1] : vector<16x4x512xi32> to vector<16x512xi32>
    %19 = arith.addi %11, %18 : vector<16x512xi32>
    %20 = vector.extract_strided_slice %7 {offsets = [0, 4], sizes = [16, 4], strides = [1, 1]} : vector<16x16xi32> to vector<16x4xi32>
    %21 = vector.shape_cast %20 : vector<16x4xi32> to vector<16x4x1xi32>
    %22 = vector.broadcast %21 : vector<16x4x1xi32> to vector<16x4x512xi32>
    %23 = vector.broadcast %10 : vector<1x1x512xi32> to vector<16x4x512xi32>
    %24 = arith.cmpi eq, %22, %23 : vector<16x4x512xi32>
    %25 = arith.extui %24 : vector<16x4x512xi1> to vector<16x4x512xi32>
    %cst_3 = arith.constant dense<0> : vector<16x512xi32>
    %26 = vector.multi_reduction <add>, %25, %cst_3 [1] : vector<16x4x512xi32> to vector<16x512xi32>
    %27 = arith.addi %19, %26 : vector<16x512xi32>
    %28 = vector.extract_strided_slice %7 {offsets = [0, 8], sizes = [16, 4], strides = [1, 1]} : vector<16x16xi32> to vector<16x4xi32>
    %29 = vector.shape_cast %28 : vector<16x4xi32> to vector<16x4x1xi32>
    %30 = vector.broadcast %29 : vector<16x4x1xi32> to vector<16x4x512xi32>
    %31 = vector.broadcast %10 : vector<1x1x512xi32> to vector<16x4x512xi32>
    %32 = arith.cmpi eq, %30, %31 : vector<16x4x512xi32>
    %33 = arith.extui %32 : vector<16x4x512xi1> to vector<16x4x512xi32>
    %cst_4 = arith.constant dense<0> : vector<16x512xi32>
    %34 = vector.multi_reduction <add>, %33, %cst_4 [1] : vector<16x4x512xi32> to vector<16x512xi32>
    %35 = arith.addi %27, %34 : vector<16x512xi32>
    %36 = vector.extract_strided_slice %7 {offsets = [0, 12], sizes = [16, 4], strides = [1, 1]} : vector<16x16xi32> to vector<16x4xi32>
    %37 = vector.shape_cast %36 : vector<16x4xi32> to vector<16x4x1xi32>
    %38 = vector.broadcast %37 : vector<16x4x1xi32> to vector<16x4x512xi32>
    %39 = vector.broadcast %10 : vector<1x1x512xi32> to vector<16x4x512xi32>
    %40 = arith.cmpi eq, %38, %39 : vector<16x4x512xi32>
    %41 = arith.extui %40 : vector<16x4x512xi1> to vector<16x4x512xi32>
    %cst_5 = arith.constant dense<0> : vector<16x512xi32>
    %42 = vector.multi_reduction <add>, %41, %cst_5 [1] : vector<16x4x512xi32> to vector<16x512xi32>
    %43 = arith.addi %35, %42 : vector<16x512xi32>
    %c0_i32_6 = arith.constant 0 : i32
    %44 = arith.cmpi eq, %arg2, %c0_i32_6 : i32
    %45 = arith.extui %44 : i1 to i32
    %c0_i32_7 = arith.constant 0 : i32
    %46 = arith.cmpi ne, %45, %c0_i32_7 : i32
    scf.if %46 {
      %cst_17 = arith.constant 0.000000e+00 : f32
      %56 = vector.broadcast %cst_17 : f32 to vector<16x256xf32>
      %c0_18 = arith.constant 0 : index
      %c0_19 = arith.constant 0 : index
      %57 = vector.load %arg7[%c0_18, %c0_19] : memref<16x256xf32, #tpu.memory_space<vmem>>, vector<16x256xf32>
      tpu.vector_store %arg7[%c0_18, %c0_19], %56 {strides = array<i32>} : memref<16x256xf32, #tpu.memory_space<vmem>>, vector<16x256xf32>,
    } else {
    }
    %c0_8 = arith.constant 0 : index
    %c0_9 = arith.constant 0 : index
    %47 = vector.load %arg7[%c0_8, %c0_9] : memref<16x256xf32, #tpu.memory_space<vmem>>, vector<16x256xf32>
    %48 = arith.sitofp %43 : vector<16x512xi32> to vector<16x512xbf16>
    %c0_10 = arith.constant 0 : index
    %c0_11 = arith.constant 0 : index
    %49 = vector.load %arg5[%c0_10, %c0_11] : memref<512x256xbf16, #tpu.memory_space<vmem>>, vector<512x256xbf16>
    %cst_12 = arith.constant dense<0.000000e+00> : vector<16x256xf32>
    %50 = tpu.matmul %48, %49, %cst_12 {dimension_numbers = #tpu.dot_dimension_numbers<[1], [0], [0], [1], [0, 0, 1, 1], [], []>} : vector<16x512xbf16>, vector<512x256xbf16>, vector<16x256xf32> -> vector<16x256xf32>
    %51 = arith.addf %47, %50 : vector<16x256xf32>
    %c0_13 = arith.constant 0 : index
    %c0_14 = arith.constant 0 : index
    %52 = vector.load %arg7[%c0_13, %c0_14] : memref<16x256xf32, #tpu.memory_space<vmem>>, vector<16x256xf32>
    tpu.vector_store %arg7[%c0_13, %c0_14], %51 {strides = array<i32>} : memref<16x256xf32, #tpu.memory_space<vmem>>, vector<16x256xf32>,
    %c0_i32_15 = arith.constant 0 : i32
    %53 = arith.cmpi eq, %arg2, %c0_i32_15 : i32
    %54 = arith.extui %53 : i1 to i32
    %c0_i32_16 = arith.constant 0 : i32
    %55 = arith.cmpi ne, %54, %c0_i32_16 : i32
    scf.if %55 {
      %56 = arith.sitofp %1 : vector<16x1xi32> to vector<16x1xf32>
      %cst_17 = arith.constant 1.000000e+00 : f32
      %57 = vector.broadcast %cst_17 : f32 to vector<16x1xf32>
      %58 = arith.maximumf %56, %57 : vector<16x1xf32>
      %c0_18 = arith.constant 0 : index
      %c0_19 = arith.constant 0 : index
      %59 = vector.load %arg7[%c0_18, %c0_19] : memref<16x256xf32, #tpu.memory_space<vmem>>, vector<16x256xf32>
      %60 = vector.broadcast %58 : vector<16x1xf32> to vector<16x256xf32>
      %61 = arith.divf %59, %60 : vector<16x256xf32>
      %c0_20 = arith.constant 0 : index
      %c0_21 = arith.constant 0 : index
      %62 = vector.load %arg6[%c0_20, %c0_21] : memref<16x256xf32, #tpu.memory_space<vmem>>, vector<16x256xf32>
      tpu.vector_store %arg6[%c0_20, %c0_21], %61 {strides = array<i32>} : memref<16x256xf32, #tpu.memory_space<vmem>>, vector<16x256xf32>,
    } else {
    }
    return
  }
  func.func @transform_0(%arg0: i32, %arg1: i32, %arg2: i32) -> (i32, i32) {
    %c0_i32 = arith.constant 0 : i32
    %c0_i32_0 = arith.constant 0 : i32
    return %arg0, %c0_i32 : i32, i32
  }
  func.func @transform_1(%arg0: i32, %arg1: i32, %arg2: i32) -> (i32, i32) {
    %c0_i32 = arith.constant 0 : i32
    %c0_i32_0 = arith.constant 0 : i32
    return %arg0, %c0_i32 : i32, i32
  }
  func.func @transform_2(%arg0: i32, %arg1: i32, %arg2: i32) -> (i32, i32) {
    %c0_i32 = arith.constant 0 : i32
    return %arg2, %arg1 : i32, i32
  }
  func.func @transform_3(%arg0: i32, %arg1: i32, %arg2: i32) -> (i32, i32) {
    %c0_i32 = arith.constant 0 : i32
    return %arg0, %arg1 : i32, i32
  }
}

</mosaic_0001>

<bundles_post_ra>
// kernel: tpu_custom_call.1
= control target key start
LH: loop header
LB: loop body
LE: loop exit
PB: predicated region body
PF: predicated region fallthrough
CT: control target
= control target key end

     0   :  { %8 = vsyncpa [#allocation4], 0  ;;  %s5781_s0 = inlined_call_operand.vmem [shape: s32[16,16], index: 0, kind: input, shape index: {}]   ;;  %s5782_s1 = inlined_call_operand.vmem [shape: s32[16,1], index: 1, kind: input, shape index: {}]   ;;  %s5783_s2 = inlined_call_operand.hbm [shape: bf16[512,256], index: 2, kind: input, shape index: {}]   ;;  %s5784_s3 = inlined_call_operand.hbm [shape: f32[16,256], index: 3, kind: output, shape index: {}]  }
   0x1   :  { %9 = vsyncpa [#allocation5], 0  ;;  %s3945_s12 = smov [#allocation3]   ;;  %s3897_s16 = scalar_lea.hbm %s5783_s2, 8192 }
   0x2   :  { %s19_s13 = sshll.u32 %s3945_s12, 4  ;;  %p3898_p0 = scmp.ne.s32.totalorder %s5783_s2, %s3897_s16  ;;  %s20_s13 = int_to_ptr.vmem [resolvable:$true] %s19_s13 }
   0x3   :  { %p3901_p1 = scmp.lt.u32.totalorder %s3897_s16, %s5783_s2 }
   0x5   :  { %p3903_p2 = pnand %p3901_p1, %p3898_p0 }
   0x7   :  { %3906 = shalt.err (!%p3903_p2)
}
   0x8   :  { %s3907_s21 = scalar_lea.vmem %s20_s13, 8192  ;;  %p3912_p4 = scmp.lt.s32.totalorder %s20_s13, %s20_s13 }
   0x9   :  { %p3908_p3 = scmp.ne.s32.totalorder %s20_s13, %s3907_s21  ;;  %p3913_p5 = scmp.lt.s32.totalorder %s3907_s21, %s3907_s21 }
   0xb   :  { %p3914_p6 = por %p3913_p5, %p3912_p4 }
   0xd   :  { %p3915_p7 = pnand %p3914_p6, %p3908_p3 }
   0xf   :  { %3918 = shalt.err (!%p3915_p7)
}
  0x10   :  { %s3946_s22 = smov 128   ;;  %s3947_s23 = smov 8  }
  0x11   :  { %25 = dma.hbm_to_vmem [thread:$0]  %s5783_s2, 8192, %s20_s13, [#allocation4], %s3946_s22, %s3946_s22, %s3947_s23  }
  0x12   :  { %3941 = dma.done.wait [#allocation4], 8192  }
  0x13   :  { %3942 = vsyncadd [#allocation4], 4294959104  ;;  %v5785_v0 = vmov 0   ;;  %v3989_v1 = vld [vmem:[%s5782_s1] sm:$0xff]  ;;  %v3995_v2 = vld [vmem:[%s5782_s1 + $0x8] sm:$0xff]  ;;  %v32_v3 = vlaneseq  ;;  %vm294_vm2 = vcmask 1043456  }
  0x14   :  { %3795 = vset.pattern.permute.xlu0 %v5785_v0  ;;  %3796 = vset.pattern.permute.xlu1 %v5785_v0  ;;  %v42_v6 = vld [vmem:[%s5781_s0] sm:$0xff]  ;;  %v43_v12 = vld [vmem:[%s5781_s0 + $0x8] sm:$0xff]  ;;  %v3675_v36 = vcvt.s32.f32 %v3989_v1  ;;  %v3676_v37 = vcvt.s32.f32 %v3995_v2  ;;  %s3949_s0 = smov [#allocation6]  }
  0x15   :  { %35 = vperm.xlu0 %3795, %v3989_v1   ;;  %v55_v4 = vshrl.u32 %v32_v3, 7  ;;  %v3998_v5 = vand.u32 127, %v32_v3  ;;  %s3708_s5 = sshll.u32 %s3949_s0, 4  ;;  %s3709_s5 = int_to_ptr.vmem [resolvable:$true] %s3708_s5 }
  0x16   :  { %v4043_v41 = vmax.f32 %v3675_v36, 1.0  ;;  %v4045_v42 = vmax.f32 %v3676_v37, 1.0  ;;  %s3919_s6 = scalar_lea.vmem %s3709_s5, 512  ;;  %p3924_p9 = scmp.lt.s32.totalorder %s3709_s5, %s3709_s5 }
  0x17   :  { %v56_v7 = vsub.s32 0, %v55_v4  ;;  %v98_v9 = vsub.s32 6, %v55_v4  ;;  %v105_v10 = vsub.s32 7, %v55_v4  ;;  %v63_v14 = vsub.s32 1, %v55_v4  ;;  %p3920_p8 = scmp.ne.s32.totalorder %s3709_s5, %s3919_s6  ;;  %p3925_p10 = scmp.lt.s32.totalorder %s3919_s6, %s3919_s6 }
  0x18   :  { %v70_v24 = vsub.s32 2, %v55_v4  ;;  %v77_v27 = vsub.s32 3, %v55_v4  ;;  %v84_v30 = vsub.s32 4, %v55_v4  ;;  %v91_v33 = vsub.s32 5, %v55_v4 }
  0x19   :  { %38 = vperm.xlu0 %3795, %v3995_v2   ;;  %v4034_v38 = vadd.s32 128, %v3998_v5  ;;  %v4037_v39 = vadd.s32 256, %v3998_v5  ;;  %v4040_v40 = vadd.s32 384, %v3998_v5  ;;  %p3926_p11 = por %p3925_p10, %p3924_p9 }
  0x1b   :  { %p3927_p12 = pnand %p3926_p11, %p3920_p8 }
  0x94   :  { %v36_v8 = vpop.permute.xlu0 %35 }
  0x95   :  { %vm40_vm0 = vcmp.lt.s32.totalorder %v3998_v5, %v36_v8 }
  0x96   :  { %v44_v11 = vsel %vm40_vm0, %v42_v6, 4294967295 }
  0x97   :  { %v57_v13 = vrot.slane %v44_v11, %v56_v7  ;;  %v4007_v16 = vrot.slane %v44_v11, %v98_v9  ;;  %v4009_v17 = vrot.slane %v44_v11, %v105_v10  ;;  %v64_v19 = vrot.slane %v44_v11, %v63_v14 }
  0x98   :  { %v39_v15 = vpop.permute.xlu0 %38  ;;  %v71_v25 = vrot.slane %v44_v11, %v70_v24  ;;  %v78_v28 = vrot.slane %v44_v11, %v77_v27  ;;  %v85_v31 = vrot.slane %v44_v11, %v84_v30  ;;  %v92_v34 = vrot.slane %v44_v11, %v91_v33 }
  0x99   :  { %vm41_vm1 = vcmp.lt.s32.totalorder %v3998_v5, %v39_v15  ;;  %59 = vbcast.lane.b32.xlu1 %v57_v13, 256 }
  0x9a   :  { %v45_v18 = vsel %vm41_vm1, %v43_v12, 4294967295 }
  0x9b   :  { %v113_v20 = vrot.slane %v45_v18, %v56_v7  ;;  %v4012_v21 = vrot.slane %v45_v18, %v98_v9  ;;  %v4014_v22 = vrot.slane %v45_v18, %v105_v10  ;;  %v120_v23 = vrot.slane %v45_v18, %v63_v14 }
  0x9c   :  { %v127_v26 = vrot.slane %v45_v18, %v70_v24  ;;  %v134_v29 = vrot.slane %v45_v18, %v77_v27  ;;  %v141_v32 = vrot.slane %v45_v18, %v84_v30  ;;  %v4016_v35 = vrot.slane %v45_v18, %v91_v33 }
  0x9d   :  { %66 = vbcast.lane.b32.xlu1 %v64_v19, 256  ;;  %115 = vbcast.lane.b32.xlu0 %v113_v20, 256 }
  0xa1   :  { %122 = vbcast.lane.b32.xlu1 %v120_v23, 256  ;;  %745 = vbcast.lane.b32.xlu0 %v57_v13, 260 }
  0xa5   :  { %749 = vbcast.lane.b32.xlu1 %v64_v19, 260  ;;  %777 = vbcast.lane.b32.xlu0 %v113_v20, 260 }
  0xa9   :  { %781 = vbcast.lane.b32.xlu1 %v120_v23, 260  ;;  %73 = vbcast.lane.b32.xlu0 %v71_v25, 256 }
  0xad   :  { %129 = vbcast.lane.b32.xlu1 %v127_v26, 256  ;;  %753 = vbcast.lane.b32.xlu0 %v71_v25, 260 }
  0xb1   :  { %785 = vbcast.lane.b32.xlu1 %v127_v26, 260  ;;  %80 = vbcast.lane.b32.xlu0 %v78_v28, 256 }
  0xb5   :  { %136 = vbcast.lane.b32.xlu1 %v134_v29, 256  ;;  %757 = vbcast.lane.b32.xlu0 %v78_v28, 260 }
  0xb9   :  { %789 = vbcast.lane.b32.xlu1 %v134_v29, 260  ;;  %1449 = vbcast.lane.b32.xlu0 %v57_v13, 264 }
  0xbd   :  { %1453 = vbcast.lane.b32.xlu1 %v64_v19, 264  ;;  %1481 = vbcast.lane.b32.xlu0 %v113_v20, 264 }
  0xc1   :  { %1485 = vbcast.lane.b32.xlu1 %v120_v23, 264  ;;  %87 = vbcast.lane.b32.xlu0 %v85_v31, 256 }
  0xc5   :  { %143 = vbcast.lane.b32.xlu1 %v141_v32, 256  ;;  %761 = vbcast.lane.b32.xlu0 %v85_v31, 260 }
  0xc9   :  { %793 = vbcast.lane.b32.xlu1 %v141_v32, 260  ;;  %1457 = vbcast.lane.b32.xlu0 %v71_v25, 264 }
  0xcd   :  { %1489 = vbcast.lane.b32.xlu1 %v127_v26, 264  ;;  %94 = vbcast.lane.b32.xlu0 %v92_v34, 256 }
  0xd1   :  { %150 = vbcast.lane.b32.xlu1 %v4016_v35, 256  ;;  %765 = vbcast.lane.b32.xlu0 %v92_v34, 260 }
  0xd5   :  { %797 = vbcast.lane.b32.xlu1 %v4016_v35, 260  ;;  %1461 = vbcast.lane.b32.xlu0 %v78_v28, 264 }
  0xd9   :  { %1493 = vbcast.lane.b32.xlu1 %v134_v29, 264  ;;  %2153 = vbcast.lane.b32.xlu0 %v57_v13, 268 }
  0xdd   :  { %2157 = vbcast.lane.b32.xlu1 %v64_v19, 268  ;;  %2185 = vbcast.lane.b32.xlu0 %v113_v20, 268 }
  0xe1   :  { %2189 = vbcast.lane.b32.xlu1 %v120_v23, 268  ;;  %101 = vbcast.lane.b32.xlu0 %v4007_v16, 256 }
  0xe5   :  { %157 = vbcast.lane.b32.xlu1 %v4012_v21, 256  ;;  %769 = vbcast.lane.b32.xlu0 %v4007_v16, 260 }
  0xe9   :  { %801 = vbcast.lane.b32.xlu1 %v4012_v21, 260  ;;  %1465 = vbcast.lane.b32.xlu0 %v85_v31, 264 }
  0xed   :  { %1497 = vbcast.lane.b32.xlu1 %v141_v32, 264  ;;  %2161 = vbcast.lane.b32.xlu0 %v71_v25, 268 }
  0xf1   :  { %2193 = vbcast.lane.b32.xlu1 %v127_v26, 268  ;;  %108 = vbcast.lane.b32.xlu0 %v4009_v17, 256 }
  0xf5   :  { %164 = vbcast.lane.b32.xlu1 %v4014_v22, 256  ;;  %773 = vbcast.lane.b32.xlu0 %v4009_v17, 260 }
  0xf9   :  { %805 = vbcast.lane.b32.xlu1 %v4014_v22, 260  ;;  %1469 = vbcast.lane.b32.xlu0 %v92_v34, 264 }
  0xfd   :  { %1501 = vbcast.lane.b32.xlu1 %v4016_v35, 264  ;;  %2165 = vbcast.lane.b32.xlu0 %v78_v28, 268 }
 0x101   :  { %2197 = vbcast.lane.b32.xlu1 %v134_v29, 268  ;;  %1473 = vbcast.lane.b32.xlu0 %v4007_v16, 264 }
 0x105   :  { %1505 = vbcast.lane.b32.xlu1 %v4012_v21, 264  ;;  %2169 = vbcast.lane.b32.xlu0 %v85_v31, 268 }
 0x109   :  { %2201 = vbcast.lane.b32.xlu1 %v141_v32, 268  ;;  %1477 = vbcast.lane.b32.xlu0 %v4009_v17, 264 }
 0x10b   :  { %v60_v43 = vpop.permute.xlu1 %59 }
 0x10c   :  { %vm166_vm3 = vcmp.eq.s32.totalorder %v60_v43, %v3998_v5  ;;  %vm167_vm4 = vcmp.eq.s32.totalorder %v60_v43, %v4034_v38  ;;  %vm168_vm5 = vcmp.eq.s32.totalorder %v60_v43, %v4037_v39  ;;  %vm169_vm6 = vcmp.eq.s32.totalorder %v60_v43, %v4040_v40 }
 0x10d   :  { %v230_v44 = vsel %vm166_vm3, 1, %v5785_v0  ;;  %v231_v45 = vsel %vm167_vm4, 1, %v5785_v0  ;;  %v232_v46 = vsel %vm168_vm5, 1, %v5785_v0  ;;  %v233_v47 = vsel %vm169_vm6, 1, %v5785_v0  ;;  %1509 = vbcast.lane.b32.xlu1 %v4014_v22, 264  ;;  %2173 = vbcast.lane.b32.xlu0 %v92_v34, 268 }
 0x10e   :  { %v295_v48 = vsel %vm294_vm2, %v230_v44, 0  ;;  %v302_v49 = vsel %vm294_vm2, %v231_v45, 0  ;;  %v309_v50 = vsel %vm294_vm2, %v232_v46, 0  ;;  %v316_v51 = vsel %vm294_vm2, %v233_v47, 0 }
 0x10f   :  { %v296_v52 = vrot.slane %v295_v48, 4  ;;  %v303_v53 = vrot.slane %v302_v49, 4  ;;  %v310_v54 = vrot.slane %v309_v50, 4  ;;  %v317_v55 = vrot.slane %v316_v51, 4  ;;  %v67_v56 = vpop.permute.xlu1 %66  ;;  %v116_v30 = vpop.permute.xlu0 %115 }
 0x110   :  { %vm170_vm7 = vcmp.eq.s32.totalorder %v67_v56, %v3998_v5  ;;  %vm171_vm8 = vcmp.eq.s32.totalorder %v67_v56, %v4034_v38  ;;  %vm172_vm9 = vcmp.eq.s32.totalorder %v67_v56, %v4037_v39  ;;  %vm173_vm10 = vcmp.eq.s32.totalorder %v67_v56, %v4040_v40 }
 0x111   :  { %v297_v57 = vadd.s32 %v296_v52, %v295_v48  ;;  %v304_v58 = vadd.s32 %v303_v53, %v302_v49  ;;  %v311_v59 = vadd.s32 %v310_v54, %v309_v50  ;;  %v318_v60 = vadd.s32 %v317_v55, %v316_v51  ;;  %2205 = vbcast.lane.b32.xlu1 %v4016_v35, 268 }
 0x112   :  { %v234_v61 = vsel %vm170_vm7, 1, %v5785_v0  ;;  %v235_v62 = vsel %vm171_vm8, 1, %v5785_v0  ;;  %v236_v63 = vsel %vm172_vm9, 1, %v5785_v0  ;;  %v237_v1 = vsel %vm173_vm10, 1, %v5785_v0  ;;  %2177 = vbcast.lane.b32.xlu0 %v4007_v16, 268 }
 0x113   :  { %v298_v2 = vrot.slane %v297_v57, 2  ;;  %v305_v3 = vrot.slane %v304_v58, 2  ;;  %v312_v4 = vrot.slane %v311_v59, 2  ;;  %v319_v6 = vrot.slane %v318_v60, 2  ;;  %v123_v56 = vpop.permute.xlu1 %122 }
 0x114   :  { %v323_v7 = vsel %vm294_vm2, %v234_v61, 0  ;;  %v330_v8 = vsel %vm294_vm2, %v235_v62, 0  ;;  %v337_v9 = vsel %vm294_vm2, %v236_v63, 0  ;;  %v344_v10 = vsel %vm294_vm2, %v237_v1, 0 }
 0x115   :  { %v299_v11 = vadd.s32 %v298_v2, %v297_v57  ;;  %v306_v12 = vadd.s32 %v305_v3, %v304_v58  ;;  %v313_v13 = vadd.s32 %v312_v4, %v311_v59  ;;  %v320_v14 = vadd.s32 %v319_v6, %v318_v60  ;;  %2209 = vbcast.lane.b32.xlu1 %v4012_v21, 268 }
 0x116   :  { %v324_v15 = vrot.slane %v323_v7, 4  ;;  %v331_v16 = vrot.slane %v330_v8, 4  ;;  %v338_v18 = vrot.slane %v337_v9, 4  ;;  %v345_v19 = vrot.slane %v344_v10, 4  ;;  %2181 = vbcast.lane.b32.xlu0 %v4009_v17, 268 }
 0x117   :  { %v300_v20 = vrot.slane %v299_v11, 1  ;;  %v307_v23 = vrot.slane %v306_v12, 1  ;;  %v314_v24 = vrot.slane %v313_v13, 1  ;;  %v321_v25 = vrot.slane %v320_v14, 1 }
 0x118   :  { %v325_v26 = vadd.s32 %v324_v15, %v323_v7  ;;  %v332_v27 = vadd.s32 %v331_v16, %v330_v8  ;;  %v339_v28 = vadd.s32 %v338_v18, %v337_v9  ;;  %v346_v29 = vadd.s32 %v345_v19, %v344_v10 }
 0x119   :  { %v4076_v31 = vadd.s32 %v300_v20, %v299_v11  ;;  %v4078_v32 = vadd.s32 %v307_v23, %v306_v12  ;;  %v4080_v21 = vadd.s32 %v314_v24, %v313_v13  ;;  %v4082_v33 = vadd.s32 %v321_v25, %v320_v14  ;;  %2213 = vbcast.lane.b32.xlu1 %v4014_v22, 268 }
 0x11a   :  { %v326_v17 = vrot.slane %v325_v26, 2  ;;  %v333_v34 = vrot.slane %v332_v27, 2  ;;  %v340_v35 = vrot.slane %v339_v28, 2  ;;  %v347_v36 = vrot.slane %v346_v29, 2  ;;  %3685 = vperm.xlu0 %3795, %v4043_v41  }
 0x11b   :  { %vm198_vm11 = vcmp.eq.s32.totalorder %v116_v30, %v3998_v5  ;;  %vm199_vm12 = vcmp.eq.s32.totalorder %v116_v30, %v4034_v38  ;;  %vm200_vm13 = vcmp.eq.s32.totalorder %v116_v30, %v4037_v39  ;;  %vm201_vm14 = vcmp.eq.s32.totalorder %v116_v30, %v4040_v40 }
 0x11c   :  { %v327_v37 = vadd.s32 %v326_v17, %v325_v26  ;;  %v334_v43 = vadd.s32 %v333_v34, %v332_v27  ;;  %v341_v44 = vadd.s32 %v340_v35, %v339_v28  ;;  %v348_v45 = vadd.s32 %v347_v36, %v346_v29 }
 0x11d   :  { %v262_v22 = vsel %vm198_vm11, 1, %v5785_v0  ;;  %v263_v46 = vsel %vm199_vm12, 1, %v5785_v0  ;;  %v264_v47 = vsel %vm200_vm13, 1, %v5785_v0  ;;  %v265_v41 = vsel %vm201_vm14, 1, %v5785_v0  ;;  %3690 = vperm.xlu1 %3796, %v4045_v42  }
 0x11e   :  { %v328_v48 = vrot.slane %v327_v37, 1  ;;  %v335_v49 = vrot.slane %v334_v43, 1  ;;  %v342_v50 = vrot.slane %v341_v44, 1  ;;  %v349_v51 = vrot.slane %v348_v45, 1 }
 0x11f   :  { %v519_v52 = vsel %vm294_vm2, %v262_v22, 0  ;;  %v526_v53 = vsel %vm294_vm2, %v263_v46, 0  ;;  %v533_v54 = vsel %vm294_vm2, %v264_v47, 0  ;;  %v540_v55 = vsel %vm294_vm2, %v265_v41, 0 }
 0x120   :  { %v4099_v57 = vadd.s32 %v328_v48, %v327_v37  ;;  %v4101_v58 = vadd.s32 %v335_v49, %v334_v43  ;;  %v4103_v59 = vadd.s32 %v342_v50, %v341_v44  ;;  %v4105_v42 = vadd.s32 %v349_v51, %v348_v45  ;;  %v746_v44 = vpop.permute.xlu0 %745 }
 0x121   :  { %v520_v60 = vrot.slane %v519_v52, 4  ;;  %v527_v61 = vrot.slane %v526_v53, 4  ;;  %v534_v62 = vrot.slane %v533_v54, 4  ;;  %v541_v63 = vrot.slane %v540_v55, 4 }
 0x122   :  { %vm202_vm15 = vcmp.eq.s32.totalorder %v123_v56, %v3998_v5  ;;  %vm203_vm0 = vcmp.eq.s32.totalorder %v123_v56, %v4034_v38  ;;  %vm204_vm1 = vcmp.eq.s32.totalorder %v123_v56, %v4037_v39  ;;  %vm205_vm3 = vcmp.eq.s32.totalorder %v123_v56, %v4040_v40 }
 0x123   :  { %v521_v1 = vadd.s32 %v520_v60, %v519_v52  ;;  %v528_v2 = vadd.s32 %v527_v61, %v526_v53  ;;  %v535_v3 = vadd.s32 %v534_v62, %v533_v54  ;;  %v542_v4 = vadd.s32 %v541_v63, %v540_v55 }
 0x124   :  { %v266_v6 = vsel %vm202_vm15, 1, %v5785_v0  ;;  %v267_v7 = vsel %vm203_vm0, 1, %v5785_v0  ;;  %v268_v8 = vsel %vm204_vm1, 1, %v5785_v0  ;;  %v269_v9 = vsel %vm205_vm3, 1, %v5785_v0 }
 0x125   :  { %v522_v10 = vrot.slane %v521_v1, 2  ;;  %v529_v11 = vrot.slane %v528_v2, 2  ;;  %v536_v12 = vrot.slane %v535_v3, 2  ;;  %v543_v13 = vrot.slane %v542_v4, 2 }
 0x126   :  { %v547_v14 = vsel %vm294_vm2, %v266_v6, 0  ;;  %v554_v15 = vsel %vm294_vm2, %v267_v7, 0  ;;  %v561_v16 = vsel %vm294_vm2, %v268_v8, 0  ;;  %v568_v18 = vsel %vm294_vm2, %v269_v9, 0  ;;  %v750_v8 = vpop.permute.xlu1 %749 }
 0x127   :  { %v523_v19 = vadd.s32 %v522_v10, %v521_v1  ;;  %v530_v20 = vadd.s32 %v529_v11, %v528_v2  ;;  %v537_v23 = vadd.s32 %v536_v12, %v535_v3  ;;  %v544_v24 = vadd.s32 %v543_v13, %v542_v4 }
 0x128   :  { %v548_v25 = vrot.slane %v547_v14, 4  ;;  %v555_v26 = vrot.slane %v554_v15, 4  ;;  %v562_v27 = vrot.slane %v561_v16, 4  ;;  %v569_v28 = vrot.slane %v568_v18, 4 }
 0x129   :  { %v524_v29 = vrot.slane %v523_v19, 1  ;;  %v531_v30 = vrot.slane %v530_v20, 1  ;;  %v538_v17 = vrot.slane %v537_v23, 1  ;;  %v545_v34 = vrot.slane %v544_v24, 1 }
 0x12a   :  { %v549_v35 = vadd.s32 %v548_v25, %v547_v14  ;;  %v556_v36 = vadd.s32 %v555_v26, %v554_v15  ;;  %v563_v37 = vadd.s32 %v562_v27, %v561_v16  ;;  %v570_v43 = vadd.s32 %v569_v28, %v568_v18 }
 0x12b   :  { %v4119_v45 = vadd.s32 %v524_v29, %v523_v19  ;;  %v4121_v22 = vadd.s32 %v531_v30, %v530_v20  ;;  %v4123_v46 = vadd.s32 %v538_v17, %v537_v23  ;;  %v4125_v47 = vadd.s32 %v545_v34, %v544_v24 }
 0x12c   :  { %v550_v41 = vrot.slane %v549_v35, 2  ;;  %v557_v48 = vrot.slane %v556_v36, 2  ;;  %v564_v49 = vrot.slane %v563_v37, 2  ;;  %v571_v50 = vrot.slane %v570_v43, 2 }
 0x12d   :  { %vm807_vm4 = vcmp.eq.s32.totalorder %v746_v44, %v3998_v5  ;;  %vm808_vm5 = vcmp.eq.s32.totalorder %v746_v44, %v4034_v38  ;;  %vm809_vm6 = vcmp.eq.s32.totalorder %v746_v44, %v4037_v39  ;;  %vm810_vm7 = vcmp.eq.s32.totalorder %v746_v44, %v4040_v40 }
 0x12e   :  { %v551_v51 = vadd.s32 %v550_v41, %v549_v35  ;;  %v558_v52 = vadd.s32 %v557_v48, %v556_v36  ;;  %v565_v53 = vadd.s32 %v564_v49, %v563_v37  ;;  %v572_v54 = vadd.s32 %v571_v50, %v570_v43 }
 0x12f   :  { %v871_v55 = vsel %vm807_vm4, 1, %v5785_v0  ;;  %v872_v56 = vsel %vm808_vm5, 1, %v5785_v0  ;;  %v873_v60 = vsel %vm809_vm6, 1, %v5785_v0  ;;  %v874_v61 = vsel %vm810_vm7, 1, %v5785_v0 }
 0x130   :  { %v552_v62 = vrot.slane %v551_v51, 1  ;;  %v559_v63 = vrot.slane %v558_v52, 1  ;;  %v566_v1 = vrot.slane %v565_v53, 1  ;;  %v573_v2 = vrot.slane %v572_v54, 1 }
 0x131   :  { %v935_v3 = vsel %vm294_vm2, %v871_v55, 0  ;;  %v942_v4 = vsel %vm294_vm2, %v872_v56, 0  ;;  %v949_v6 = vsel %vm294_vm2, %v873_v60, 0  ;;  %v956_v7 = vsel %vm294_vm2, %v874_v61, 0 }
 0x132   :  { %v4139_v9 = vadd.s32 %v552_v62, %v551_v51  ;;  %v4141_v10 = vadd.s32 %v559_v63, %v558_v52  ;;  %v4143_v11 = vadd.s32 %v566_v1, %v565_v53  ;;  %v4145_v12 = vadd.s32 %v573_v2, %v572_v54 }
 0x133   :  { %v936_v13 = vrot.slane %v935_v3, 4  ;;  %v943_v14 = vrot.slane %v942_v4, 4  ;;  %v950_v15 = vrot.slane %v949_v6, 4  ;;  %v957_v16 = vrot.slane %v956_v7, 4 }
 0x134   :  { %vm811_vm8 = vcmp.eq.s32.totalorder %v750_v8, %v3998_v5  ;;  %vm812_vm9 = vcmp.eq.s32.totalorder %v750_v8, %v4034_v38  ;;  %vm813_vm10 = vcmp.eq.s32.totalorder %v750_v8, %v4037_v39  ;;  %vm814_vm11 = vcmp.eq.s32.totalorder %v750_v8, %v4040_v40 }
 0x135   :  { %v937_v18 = vadd.s32 %v936_v13, %v935_v3  ;;  %v944_v19 = vadd.s32 %v943_v14, %v942_v4  ;;  %v951_v20 = vadd.s32 %v950_v15, %v949_v6  ;;  %v958_v23 = vadd.s32 %v957_v16, %v956_v7  ;;  %v778_v14 = vpop.permute.xlu0 %777 }
 0x136   :  { %v875_v24 = vsel %vm811_vm8, 1, %v5785_v0  ;;  %v876_v25 = vsel %vm812_vm9, 1, %v5785_v0  ;;  %v877_v26 = vsel %vm813_vm10, 1, %v5785_v0  ;;  %v878_v27 = vsel %vm814_vm11, 1, %v5785_v0 }
 0x137   :  { %v938_v28 = vrot.slane %v937_v18, 2  ;;  %v945_v29 = vrot.slane %v944_v19, 2  ;;  %v952_v30 = vrot.slane %v951_v20, 2  ;;  %v959_v17 = vrot.slane %v958_v23, 2 }
 0x138   :  { %v963_v34 = vsel %vm294_vm2, %v875_v24, 0  ;;  %v970_v35 = vsel %vm294_vm2, %v876_v25, 0  ;;  %v977_v36 = vsel %vm294_vm2, %v877_v26, 0  ;;  %v984_v37 = vsel %vm294_vm2, %v878_v27, 0 }
 0x139   :  { %v939_v43 = vadd.s32 %v938_v28, %v937_v18  ;;  %v946_v44 = vadd.s32 %v945_v29, %v944_v19  ;;  %v953_v41 = vadd.s32 %v952_v30, %v951_v20  ;;  %v960_v48 = vadd.s32 %v959_v17, %v958_v23 }
 0x13a   :  { %v964_v49 = vrot.slane %v963_v34, 4  ;;  %v971_v50 = vrot.slane %v970_v35, 4  ;;  %v978_v51 = vrot.slane %v977_v36, 4  ;;  %v985_v52 = vrot.slane %v984_v37, 4 }
 0x13b   :  { %v940_v53 = vrot.slane %v939_v43, 1  ;;  %v947_v54 = vrot.slane %v946_v44, 1  ;;  %v954_v55 = vrot.slane %v953_v41, 1  ;;  %v961_v56 = vrot.slane %v960_v48, 1 }
 0x13c   :  { %v965_v60 = vadd.s32 %v964_v49, %v963_v34  ;;  %v972_v61 = vadd.s32 %v971_v50, %v970_v35  ;;  %v979_v62 = vadd.s32 %v978_v51, %v977_v36  ;;  %v986_v63 = vadd.s32 %v985_v52, %v984_v37 }
 0x13d   :  { %v941_v1 = vadd.s32 %v940_v53, %v939_v43  ;;  %v948_v2 = vadd.s32 %v947_v54, %v946_v44  ;;  %v955_v3 = vadd.s32 %v954_v55, %v953_v41  ;;  %v962_v4 = vadd.s32 %v961_v56, %v960_v48  ;;  %v782_v41 = vpop.permute.xlu1 %781 }
 0x13e   :  { %v966_v6 = vrot.slane %v965_v60, 2  ;;  %v973_v7 = vrot.slane %v972_v61, 2  ;;  %v980_v8 = vrot.slane %v979_v62, 2  ;;  %v987_v13 = vrot.slane %v986_v63, 2 }
 0x13f   :  { %v4160_v15 = vadd.s32 %v941_v1, %v4076_v31  ;;  %v4163_v16 = vadd.s32 %v948_v2, %v4078_v32  ;;  %v4166_v18 = vadd.s32 %v955_v3, %v4080_v21  ;;  %v4169_v19 = vadd.s32 %v962_v4, %v4082_v33 }
 0x140   :  { %v967_v20 = vadd.s32 %v966_v6, %v965_v60  ;;  %v974_v23 = vadd.s32 %v973_v7, %v972_v61  ;;  %v981_v24 = vadd.s32 %v980_v8, %v979_v62  ;;  %v988_v25 = vadd.s32 %v987_v13, %v986_v63 }
 0x141   :  { %vm839_vm12 = vcmp.eq.s32.totalorder %v778_v14, %v3998_v5  ;;  %vm840_vm13 = vcmp.eq.s32.totalorder %v778_v14, %v4034_v38  ;;  %vm841_vm14 = vcmp.eq.s32.totalorder %v778_v14, %v4037_v39  ;;  %vm842_vm15 = vcmp.eq.s32.totalorder %v778_v14, %v4040_v40 }
 0x142   :  { %v968_v31 = vrot.slane %v967_v20, 1  ;;  %v975_v32 = vrot.slane %v974_v23, 1  ;;  %v982_v26 = vrot.slane %v981_v24, 1  ;;  %v989_v21 = vrot.slane %v988_v25, 1 }
 0x143   :  { %v903_v27 = vsel %vm839_vm12, 1, %v5785_v0  ;;  %v904_v33 = vsel %vm840_vm13, 1, %v5785_v0  ;;  %v905_v28 = vsel %vm841_vm14, 1, %v5785_v0  ;;  %v906_v29 = vsel %vm842_vm15, 1, %v5785_v0 }
 0x144   :  { %v969_v30 = vadd.s32 %v968_v31, %v967_v20  ;;  %v976_v17 = vadd.s32 %v975_v32, %v974_v23  ;;  %v983_v34 = vadd.s32 %v982_v26, %v981_v24  ;;  %v990_v35 = vadd.s32 %v989_v21, %v988_v25 }
 0x145   :  { %v1159_v36 = vsel %vm294_vm2, %v903_v27, 0  ;;  %v1166_v37 = vsel %vm294_vm2, %v904_v33, 0  ;;  %v1173_v43 = vsel %vm294_vm2, %v905_v28, 0  ;;  %v1180_v44 = vsel %vm294_vm2, %v906_v29, 0 }
 0x146   :  { %v4184_v48 = vadd.s32 %v969_v30, %v4099_v57  ;;  %v4187_v49 = vadd.s32 %v976_v17, %v4101_v58  ;;  %v4190_v50 = vadd.s32 %v983_v34, %v4103_v59  ;;  %v4193_v51 = vadd.s32 %v990_v35, %v4105_v42 }
 0x147   :  { %v1160_v52 = vrot.slane %v1159_v36, 4  ;;  %v1167_v53 = vrot.slane %v1166_v37, 4  ;;  %v1174_v54 = vrot.slane %v1173_v43, 4  ;;  %v1181_v55 = vrot.slane %v1180_v44, 4 }
 0x148   :  { %vm843_vm0 = vcmp.eq.s32.totalorder %v782_v41, %v3998_v5  ;;  %vm844_vm1 = vcmp.eq.s32.totalorder %v782_v41, %v4034_v38  ;;  %vm845_vm3 = vcmp.eq.s32.totalorder %v782_v41, %v4037_v39  ;;  %vm846_vm4 = vcmp.eq.s32.totalorder %v782_v41, %v4040_v40 }
 0x149   :  { %v1161_v57 = vadd.s32 %v1160_v52, %v1159_v36  ;;  %v1168_v58 = vadd.s32 %v1167_v53, %v1166_v37  ;;  %v1175_v56 = vadd.s32 %v1174_v54, %v1173_v43  ;;  %v1182_v59 = vadd.s32 %v1181_v55, %v1180_v44  ;;  %v74_v53 = vpop.permute.xlu0 %73 }
 0x14a   :  { %v907_v60 = vsel %vm843_vm0, 1, %v5785_v0  ;;  %v908_v42 = vsel %vm844_vm1, 1, %v5785_v0  ;;  %v909_v61 = vsel %vm845_vm3, 1, %v5785_v0  ;;  %v910_v62 = vsel %vm846_vm4, 1, %v5785_v0 }
 0x14b   :  { %v1162_v63 = vrot.slane %v1161_v57, 2  ;;  %v1169_v1 = vrot.slane %v1168_v58, 2  ;;  %v1176_v2 = vrot.slane %v1175_v56, 2  ;;  %v1183_v3 = vrot.slane %v1182_v59, 2 }
 0x14c   :  { %v1187_v4 = vsel %vm294_vm2, %v907_v60, 0  ;;  %v1194_v6 = vsel %vm294_vm2, %v908_v42, 0  ;;  %v1201_v7 = vsel %vm294_vm2, %v909_v61, 0  ;;  %v1208_v8 = vsel %vm294_vm2, %v910_v62, 0 }
 0x14d   :  { %v1163_v13 = vadd.s32 %v1162_v63, %v1161_v57  ;;  %v1170_v14 = vadd.s32 %v1169_v1, %v1168_v58  ;;  %v1177_v20 = vadd.s32 %v1176_v2, %v1175_v56  ;;  %v1184_v23 = vadd.s32 %v1183_v3, %v1182_v59 }
 0x14e   :  { %v1188_v24 = vrot.slane %v1187_v4, 4  ;;  %v1195_v25 = vrot.slane %v1194_v6, 4  ;;  %v1202_v31 = vrot.slane %v1201_v7, 4  ;;  %v1209_v32 = vrot.slane %v1208_v8, 4 }
 0x14f   :  { %v1164_v26 = vrot.slane %v1163_v13, 1  ;;  %v1171_v21 = vrot.slane %v1170_v14, 1  ;;  %v1178_v27 = vrot.slane %v1177_v20, 1  ;;  %v1185_v33 = vrot.slane %v1184_v23, 1 }
 0x150   :  { %v1189_v28 = vadd.s32 %v1188_v24, %v1187_v4  ;;  %v1196_v29 = vadd.s32 %v1195_v25, %v1194_v6  ;;  %v1203_v30 = vadd.s32 %v1202_v31, %v1201_v7  ;;  %v1210_v17 = vadd.s32 %v1209_v32, %v1208_v8 }
 0x151   :  { %v1165_v34 = vadd.s32 %v1164_v26, %v1163_v13  ;;  %v1172_v35 = vadd.s32 %v1171_v21, %v1170_v14  ;;  %v1179_v36 = vadd.s32 %v1178_v27, %v1177_v20  ;;  %v1186_v37 = vadd.s32 %v1185_v33, %v1184_v23  ;;  %v130_v20 = vpop.permute.xlu1 %129 }
 0x152   :  { %v1190_v43 = vrot.slane %v1189_v28, 2  ;;  %v1197_v44 = vrot.slane %v1196_v29, 2  ;;  %v1204_v41 = vrot.slane %v1203_v30, 2  ;;  %v1211_v52 = vrot.slane %v1210_v17, 2 }
 0x153   :  { %v4208_v54 = vadd.s32 %v1165_v34, %v4119_v45  ;;  %v4211_v55 = vadd.s32 %v1172_v35, %v4121_v22  ;;  %v4214_v57 = vadd.s32 %v1179_v36, %v4123_v46  ;;  %v4217_v58 = vadd.s32 %v1186_v37, %v4125_v47 }
 0x154   :  { %v1191_v56 = vadd.s32 %v1190_v43, %v1189_v28  ;;  %v1198_v59 = vadd.s32 %v1197_v44, %v1196_v29  ;;  %v1205_v60 = vadd.s32 %v1204_v41, %v1203_v30  ;;  %v1212_v42 = vadd.s32 %v1211_v52, %v1210_v17 }
 0x155   :  { %vm174_vm5 = vcmp.eq.s32.totalorder %v74_v53, %v3998_v5  ;;  %vm175_vm6 = vcmp.eq.s32.totalorder %v74_v53, %v4034_v38  ;;  %vm176_vm7 = vcmp.eq.s32.totalorder %v74_v53, %v4037_v39  ;;  %vm177_vm8 = vcmp.eq.s32.totalorder %v74_v53, %v4040_v40 }
 0x156   :  { %v1192_v45 = vrot.slane %v1191_v56, 1  ;;  %v1199_v22 = vrot.slane %v1198_v59, 1  ;;  %v1206_v61 = vrot.slane %v1205_v60, 1  ;;  %v1213_v46 = vrot.slane %v1212_v42, 1 }
 0x157   :  { %v238_v62 = vsel %vm174_vm5, 1, %v5785_v0  ;;  %v239_v47 = vsel %vm175_vm6, 1, %v5785_v0  ;;  %v240_v63 = vsel %vm176_vm7, 1, %v5785_v0  ;;  %v241_v1 = vsel %vm177_vm8, 1, %v5785_v0 }
 0x158   :  { %v1193_v2 = vadd.s32 %v1192_v45, %v1191_v56  ;;  %v1200_v3 = vadd.s32 %v1199_v22, %v1198_v59  ;;  %v1207_v4 = vadd.s32 %v1206_v61, %v1205_v60  ;;  %v1214_v6 = vadd.s32 %v1213_v46, %v1212_v42 }
 0x159   :  { %v351_v7 = vsel %vm294_vm2, %v238_v62, 0  ;;  %v358_v8 = vsel %vm294_vm2, %v239_v47, 0  ;;  %v365_v13 = vsel %vm294_vm2, %v240_v63, 0  ;;  %v372_v14 = vsel %vm294_vm2, %v241_v1, 0  ;;  %v754_v63 = vpop.permute.xlu0 %753 }
 0x15a   :  { %v4232_v23 = vadd.s32 %v1193_v2, %v4139_v9  ;;  %v4235_v24 = vadd.s32 %v1200_v3, %v4141_v10  ;;  %v4238_v25 = vadd.s32 %v1207_v4, %v4143_v11  ;;  %v4241_v31 = vadd.s32 %v1214_v6, %v4145_v12 }
 0x15b   :  { %v352_v32 = vrot.slane %v351_v7, 4  ;;  %v359_v26 = vrot.slane %v358_v8, 4  ;;  %v366_v21 = vrot.slane %v365_v13, 4  ;;  %v373_v27 = vrot.slane %v372_v14, 4 }
 0x15c   :  { %5812 = vst [vmem:[#allocation9_spill] sm:$0xff] %v4241_v31  ;;  %vm206_vm9 = vcmp.eq.s32.totalorder %v130_v20, %v3998_v5  ;;  %vm207_vm10 = vcmp.eq.s32.totalorder %v130_v20, %v4034_v38  ;;  %vm208_vm11 = vcmp.eq.s32.totalorder %v130_v20, %v4037_v39  ;;  %vm209_vm12 = vcmp.eq.s32.totalorder %v130_v20, %v4040_v40 }
 0x15d   :  { %v353_v9 = vadd.s32 %v352_v32, %v351_v7  ;;  %v360_v10 = vadd.s32 %v359_v26, %v358_v8  ;;  %v367_v33 = vadd.s32 %v366_v21, %v365_v13  ;;  %v374_v11 = vadd.s32 %v373_v27, %v372_v14 }
 0x15e   :  { %v270_v28 = vsel %vm206_vm9, 1, %v5785_v0  ;;  %v271_v12 = vsel %vm207_vm10, 1, %v5785_v0  ;;  %v272_v29 = vsel %vm208_vm11, 1, %v5785_v0  ;;  %v273_v30 = vsel %vm209_vm12, 1, %v5785_v0 }
 0x15f   :  { %v354_v17 = vrot.slane %v353_v9, 2  ;;  %v361_v34 = vrot.slane %v360_v10, 2  ;;  %v368_v35 = vrot.slane %v367_v33, 2  ;;  %v375_v36 = vrot.slane %v374_v11, 2 }
 0x160   :  { %v575_v37 = vsel %vm294_vm2, %v270_v28, 0  ;;  %v582_v43 = vsel %vm294_vm2, %v271_v12, 0  ;;  %v589_v44 = vsel %vm294_vm2, %v272_v29, 0  ;;  %v596_v41 = vsel %vm294_vm2, %v273_v30, 0 }
 0x161   :  { %v355_v52 = vadd.s32 %v354_v17, %v353_v9  ;;  %v362_v53 = vadd.s32 %v361_v34, %v360_v10  ;;  %v369_v56 = vadd.s32 %v368_v35, %v367_v33  ;;  %v376_v59 = vadd.s32 %v375_v36, %v374_v11  ;;  %v786_v35 = vpop.permute.xlu1 %785 }
 0x162   :  { %v576_v60 = vrot.slane %v575_v37, 4  ;;  %v583_v42 = vrot.slane %v582_v43, 4  ;;  %v590_v45 = vrot.slane %v589_v44, 4  ;;  %v597_v22 = vrot.slane %v596_v41, 4 }
 0x163   :  { %v356_v1 = vrot.slane %v355_v52, 1  ;;  %v363_v2 = vrot.slane %v362_v53, 1  ;;  %v370_v3 = vrot.slane %v369_v56, 1  ;;  %v377_v4 = vrot.slane %v376_v59, 1 }
 0x164   :  { %v577_v61 = vadd.s32 %v576_v60, %v575_v37  ;;  %v584_v46 = vadd.s32 %v583_v42, %v582_v43  ;;  %v591_v62 = vadd.s32 %v590_v45, %v589_v44  ;;  %v598_v47 = vadd.s32 %v597_v22, %v596_v41 }
 0x165   :  { %vm815_vm13 = vcmp.eq.s32.totalorder %v754_v63, %v3998_v5  ;;  %vm816_vm14 = vcmp.eq.s32.totalorder %v754_v63, %v4034_v38  ;;  %vm817_vm15 = vcmp.eq.s32.totalorder %v754_v63, %v4037_v39  ;;  %vm818_vm0 = vcmp.eq.s32.totalorder %v754_v63, %v4040_v40 }
 0x166   :  { %v578_v6 = vrot.slane %v577_v61, 2  ;;  %v585_v7 = vrot.slane %v584_v46, 2  ;;  %v592_v8 = vrot.slane %v591_v62, 2  ;;  %v599_v13 = vrot.slane %v598_v47, 2 }
 0x167   :  { %v879_v21 = vsel %vm815_vm13, 1, %v5785_v0  ;;  %v880_v27 = vsel %vm816_vm14, 1, %v5785_v0  ;;  %v881_v9 = vsel %vm817_vm15, 1, %v5785_v0  ;;  %v882_v10 = vsel %vm818_vm0, 1, %v5785_v0 }
 0x168   :  { %v579_v14 = vadd.s32 %v578_v6, %v577_v61  ;;  %v586_v20 = vadd.s32 %v585_v7, %v584_v46  ;;  %v593_v32 = vadd.s32 %v592_v8, %v591_v62  ;;  %v600_v26 = vadd.s32 %v599_v13, %v598_v47 }
 0x169   :  { %v4263_v33 = vadd.s32 %v356_v1, %v355_v52  ;;  %v4265_v11 = vadd.s32 %v363_v2, %v362_v53  ;;  %v4267_v28 = vadd.s32 %v370_v3, %v369_v56  ;;  %v4269_v12 = vadd.s32 %v377_v4, %v376_v59 }
 0x16a   :  { %v991_v29 = vsel %vm294_vm2, %v879_v21, 0  ;;  %v998_v30 = vsel %vm294_vm2, %v880_v27, 0  ;;  %v1005_v17 = vsel %vm294_vm2, %v881_v9, 0  ;;  %v1012_v34 = vsel %vm294_vm2, %v882_v10, 0 }
 0x16b   :  { %v580_v36 = vrot.slane %v579_v14, 1  ;;  %v587_v37 = vrot.slane %v586_v20, 1  ;;  %v594_v43 = vrot.slane %v593_v32, 1  ;;  %v601_v44 = vrot.slane %v600_v26, 1 }
 0x16c   :  { %v992_v41 = vrot.slane %v991_v29, 4  ;;  %v999_v52 = vrot.slane %v998_v30, 4  ;;  %v1006_v53 = vrot.slane %v1005_v17, 4  ;;  %v1013_v56 = vrot.slane %v1012_v34, 4 }
 0x16d   :  { %vm847_vm1 = vcmp.eq.s32.totalorder %v786_v35, %v3998_v5  ;;  %vm848_vm3 = vcmp.eq.s32.totalorder %v786_v35, %v4034_v38  ;;  %vm849_vm4 = vcmp.eq.s32.totalorder %v786_v35, %v4037_v39  ;;  %vm850_vm5 = vcmp.eq.s32.totalorder %v786_v35, %v4040_v40 }
 0x16e   :  { %v993_v59 = vadd.s32 %v992_v41, %v991_v29  ;;  %v1000_v60 = vadd.s32 %v999_v52, %v998_v30  ;;  %v1007_v42 = vadd.s32 %v1006_v53, %v1005_v17  ;;  %v1014_v45 = vadd.s32 %v1013_v56, %v1012_v34 }
 0x16f   :  { %v911_v22 = vsel %vm847_vm1, 1, %v5785_v0  ;;  %v912_v61 = vsel %vm848_vm3, 1, %v5785_v0  ;;  %v913_v46 = vsel %vm849_vm4, 1, %v5785_v0  ;;  %v914_v62 = vsel %vm850_vm5, 1, %v5785_v0 }
 0x170   :  { %v994_v47 = vrot.slane %v993_v59, 2  ;;  %v1001_v63 = vrot.slane %v1000_v60, 2  ;;  %v1008_v1 = vrot.slane %v1007_v42, 2  ;;  %v1015_v2 = vrot.slane %v1014_v45, 2 }
 0x171   :  { %v1215_v3 = vsel %vm294_vm2, %v911_v22, 0  ;;  %v1222_v4 = vsel %vm294_vm2, %v912_v61, 0  ;;  %v1229_v6 = vsel %vm294_vm2, %v913_v46, 0  ;;  %v1236_v7 = vsel %vm294_vm2, %v914_v62, 0 }
 0x172   :  { %v995_v8 = vadd.s32 %v994_v47, %v993_v59  ;;  %v1002_v13 = vadd.s32 %v1001_v63, %v1000_v60  ;;  %v1009_v21 = vadd.s32 %v1008_v1, %v1007_v42  ;;  %v1016_v27 = vadd.s32 %v1015_v2, %v1014_v45  ;;  %v81_v63 = vpop.permute.xlu0 %80 }
 0x173   :  { %v1216_v9 = vrot.slane %v1215_v3, 4  ;;  %v1223_v10 = vrot.slane %v1222_v4, 4  ;;  %v1230_v29 = vrot.slane %v1229_v6, 4  ;;  %v1237_v30 = vrot.slane %v1236_v7, 4 }
 0x174   :  { %v996_v17 = vrot.slane %v995_v8, 1  ;;  %v1003_v34 = vrot.slane %v1002_v13, 1  ;;  %v1010_v35 = vrot.slane %v1009_v21, 1  ;;  %v1017_v41 = vrot.slane %v1016_v27, 1 }
 0x175   :  { %v1217_v52 = vadd.s32 %v1216_v9, %v1215_v3  ;;  %v1224_v53 = vadd.s32 %v1223_v10, %v1222_v4  ;;  %v1231_v56 = vadd.s32 %v1230_v29, %v1229_v6  ;;  %v1238_v22 = vadd.s32 %v1237_v30, %v1236_v7 }
 0x176   :  { %v4287_v61 = vadd.s32 %v580_v36, %v579_v14  ;;  %v4289_v46 = vadd.s32 %v587_v37, %v586_v20  ;;  %v4291_v59 = vadd.s32 %v594_v43, %v593_v32  ;;  %v4293_v60 = vadd.s32 %v601_v44, %v600_v26 }
 0x177   :  { %v1218_v42 = vrot.slane %v1217_v52, 2  ;;  %v1225_v45 = vrot.slane %v1224_v53, 2  ;;  %v1232_v62 = vrot.slane %v1231_v56, 2  ;;  %v1239_v47 = vrot.slane %v1238_v22, 2 }
 0x178   :  { %v997_v1 = vadd.s32 %v996_v17, %v995_v8  ;;  %v1004_v2 = vadd.s32 %v1003_v34, %v1002_v13  ;;  %v1011_v0 = vadd.s32 %v1010_v35, %v1009_v21  ;;  %v1018_v3 = vadd.s32 %v1017_v41, %v1016_v27  ;;  %v137_v35 = vpop.permute.xlu1 %136 }
 0x179   :  { %v1219_v4 = vadd.s32 %v1218_v42, %v1217_v52  ;;  %v1226_v6 = vadd.s32 %v1225_v45, %v1224_v53  ;;  %v1233_v7 = vadd.s32 %v1232_v62, %v1231_v56  ;;  %v1240_v14 = vadd.s32 %v1239_v47, %v1238_v22 }
 0x17a   :  { %vm178_vm6 = vcmp.eq.s32.totalorder %v81_v63, %v3998_v5  ;;  %vm179_vm7 = vcmp.eq.s32.totalorder %v81_v63, %v4034_v38  ;;  %vm180_vm8 = vcmp.eq.s32.totalorder %v81_v63, %v4037_v39  ;;  %vm181_vm9 = vcmp.eq.s32.totalorder %v81_v63, %v4040_v40 }
 0x17b   :  { %v1220_v20 = vrot.slane %v1219_v4, 1  ;;  %v1227_v32 = vrot.slane %v1226_v6, 1  ;;  %v1234_v26 = vrot.slane %v1233_v7, 1  ;;  %v1241_v36 = vrot.slane %v1240_v14, 1 }
 0x17c   :  { %v5813_v37 = vmov 0   ;;  %v4304_v21 = vadd.s32 %v997_v1, %v4263_v33  ;;  %v4307_v27 = vadd.s32 %v1004_v2, %v4265_v11  ;;  %v4310_v9 = vadd.s32 %v1011_v0, %v4267_v28 }
 0x17d   :  { %v242_v43 = vsel %vm178_vm6, 1, %v5813_v37  ;;  %v243_v44 = vsel %vm179_vm7, 1, %v5813_v37  ;;  %v244_v8 = vsel %vm180_vm8, 1, %v5813_v37  ;;  %v245_v13 = vsel %vm181_vm9, 1, %v5813_v37 }
 0x17e   :  { %5814 = vst [vmem:[#allocation10_spill] sm:$0xff] %v4304_v21  ;;  %5815 = vst [vmem:[#allocation11_spill] sm:$0xff] %v4307_v27  ;;  %v4313_v10 = vadd.s32 %v1018_v3, %v4269_v12  ;;  %v379_v29 = vsel %vm294_vm2, %v242_v43, 0  ;;  %v386_v30 = vsel %vm294_vm2, %v243_v44, 0  ;;  %v393_v17 = vsel %vm294_vm2, %v244_v8, 0 }
 0x17f   :  { %5816 = vst [vmem:[#allocation12_spill] sm:$0xff] %v4310_v9  ;;  %v400_v34 = vsel %vm294_vm2, %v245_v13, 0  ;;  %v1221_v33 = vadd.s32 %v1220_v20, %v1219_v4  ;;  %v1228_v41 = vadd.s32 %v1227_v32, %v1226_v6  ;;  %v1235_v52 = vadd.s32 %v1234_v26, %v1233_v7 }
 0x180   :  { %5817 = vst [vmem:[#allocation13_spill] sm:$0xff] %v4313_v10  ;;  %v1242_v11 = vadd.s32 %v1241_v36, %v1240_v14  ;;  %v380_v53 = vrot.slane %v379_v29, 4  ;;  %v387_v56 = vrot.slane %v386_v30, 4  ;;  %v394_v0 = vrot.slane %v393_v17, 4 }
 0x181   :  { %v401_v28 = vrot.slane %v400_v34, 4  ;;  %vm210_vm10 = vcmp.eq.s32.totalorder %v137_v35, %v3998_v5  ;;  %vm211_vm11 = vcmp.eq.s32.totalorder %v137_v35, %v4034_v38  ;;  %vm212_vm12 = vcmp.eq.s32.totalorder %v137_v35, %v4037_v39 }
 0x182   :  { %vm213_vm13 = vcmp.eq.s32.totalorder %v137_v35, %v4040_v40  ;;  %v381_v12 = vadd.s32 %v380_v53, %v379_v29  ;;  %v388_v22 = vadd.s32 %v387_v56, %v386_v30  ;;  %v395_v42 = vadd.s32 %v394_v0, %v393_v17 }
 0x183   :  { %v402_v45 = vadd.s32 %v401_v28, %v400_v34  ;;  %v274_v62 = vsel %vm210_vm10, 1, %v5813_v37  ;;  %v275_v47 = vsel %vm211_vm11, 1, %v5813_v37  ;;  %v276_v63 = vsel %vm212_vm12, 1, %v5813_v37 }
 0x184   :  { %v277_v1 = vsel %vm213_vm13, 1, %v5813_v37  ;;  %v382_v2 = vrot.slane %v381_v12, 2  ;;  %v389_v3 = vrot.slane %v388_v22, 2  ;;  %v396_v4 = vrot.slane %v395_v42, 2 }
 0x185   :  { %v403_v6 = vrot.slane %v402_v45, 2  ;;  %v603_v7 = vsel %vm294_vm2, %v274_v62, 0  ;;  %v610_v14 = vsel %vm294_vm2, %v275_v47, 0  ;;  %v617_v20 = vsel %vm294_vm2, %v276_v63, 0 }
 0x186   :  { %v624_v32 = vsel %vm294_vm2, %v277_v1, 0  ;;  %v383_v26 = vadd.s32 %v382_v2, %v381_v12  ;;  %v390_v36 = vadd.s32 %v389_v3, %v388_v22  ;;  %v397_v43 = vadd.s32 %v396_v4, %v395_v42  ;;  %v758_v22 = vpop.permute.xlu0 %757 }
 0x187   :  { %v404_v44 = vadd.s32 %v403_v6, %v402_v45  ;;  %v604_v8 = vrot.slane %v603_v7, 4  ;;  %v611_v13 = vrot.slane %v610_v14, 4  ;;  %v618_v29 = vrot.slane %v617_v20, 4 }
 0x188   :  { %v625_v30 = vrot.slane %v624_v32, 4  ;;  %v4332_v17 = vadd.s32 %v1221_v33, %v4287_v61  ;;  %v4335_v34 = vadd.s32 %v1228_v41, %v4289_v46  ;;  %v4338_v35 = vadd.s32 %v1235_v52, %v4291_v59 }
 0x189   :  { %v4341_v53 = vadd.s32 %v1242_v11, %v4293_v60  ;;  %v605_v56 = vadd.s32 %v604_v8, %v603_v7  ;;  %v612_v0 = vadd.s32 %v611_v13, %v610_v14  ;;  %v619_v28 = vadd.s32 %v618_v29, %v617_v20  ;;  %v790_v29 = vpop.permute.xlu1 %789 }
 0x18a   :  { %5818 = vst [vmem:[#allocation14_spill] sm:$0xff] %v4332_v17  ;;  %5819 = vst [vmem:[#allocation15_spill] sm:$0xff] %v4335_v34  ;;  %v626_v12 = vadd.s32 %v625_v30, %v624_v32  ;;  %v384_v42 = vrot.slane %v383_v26, 1  ;;  %v391_v45 = vrot.slane %v390_v36, 1  ;;  %v398_v62 = vrot.slane %v397_v43, 1 }
 0x18b   :  { %5820 = vst [vmem:[#allocation16_spill] sm:$0xff] %v4338_v35  ;;  %5821 = vst [vmem:[#allocation17_spill] sm:$0xff] %v4341_v53  ;;  %v405_v47 = vrot.slane %v404_v44, 1  ;;  %v606_v61 = vrot.slane %v605_v56, 2  ;;  %v613_v33 = vrot.slane %v612_v0, 2  ;;  %v620_v63 = vrot.slane %v619_v28, 2 }
 0x18c   :  { %v627_v46 = vrot.slane %v626_v12, 2  ;;  %vm819_vm14 = vcmp.eq.s32.totalorder %v758_v22, %v3998_v5  ;;  %vm820_vm15 = vcmp.eq.s32.totalorder %v758_v22, %v4034_v38  ;;  %vm821_vm0 = vcmp.eq.s32.totalorder %v758_v22, %v4037_v39 }
 0x18d   :  { %vm822_vm1 = vcmp.eq.s32.totalorder %v758_v22, %v4040_v40  ;;  %v607_v59 = vadd.s32 %v606_v61, %v605_v56  ;;  %v614_v60 = vadd.s32 %v613_v33, %v612_v0  ;;  %v621_v41 = vadd.s32 %v620_v63, %v619_v28 }
 0x18e   :  { %v628_v52 = vadd.s32 %v627_v46, %v626_v12  ;;  %v883_v11 = vsel %vm819_vm14, 1, %v5813_v37  ;;  %v884_v1 = vsel %vm820_vm15, 1, %v5813_v37  ;;  %v885_v2 = vsel %vm821_vm0, 1, %v5813_v37 }
 0x18f   :  { %v886_v3 = vsel %vm822_vm1, 1, %v5813_v37  ;;  %v4351_v4 = vadd.s32 %v384_v42, %v383_v26  ;;  %v4353_v6 = vadd.s32 %v391_v45, %v390_v36  ;;  %v4355_v7 = vadd.s32 %v398_v62, %v397_v43 }
 0x190   :  { %v4357_v14 = vadd.s32 %v405_v47, %v404_v44  ;;  %v1019_v20 = vsel %vm294_vm2, %v883_v11, 0  ;;  %v1026_v32 = vsel %vm294_vm2, %v884_v1, 0  ;;  %v1033_v8 = vsel %vm294_vm2, %v885_v2, 0 }
 0x191   :  { %v1040_v13 = vsel %vm294_vm2, %v886_v3, 0  ;;  %v608_v30 = vrot.slane %v607_v59, 1  ;;  %v615_v56 = vrot.slane %v614_v60, 1  ;;  %v622_v0 = vrot.slane %v621_v41, 1 }
 0x192   :  { %v629_v26 = vrot.slane %v628_v52, 1  ;;  %v1020_v28 = vrot.slane %v1019_v20, 4  ;;  %v1027_v36 = vrot.slane %v1026_v32, 4  ;;  %v1034_v12 = vrot.slane %v1033_v8, 4 }
 0x193   :  { %v1041_v43 = vrot.slane %v1040_v13, 4  ;;  %vm851_vm3 = vcmp.eq.s32.totalorder %v790_v29, %v3998_v5  ;;  %vm852_vm4 = vcmp.eq.s32.totalorder %v790_v29, %v4034_v38  ;;  %vm853_vm5 = vcmp.eq.s32.totalorder %v790_v29, %v4037_v39 }
 0x194   :  { %vm854_vm6 = vcmp.eq.s32.totalorder %v790_v29, %v4040_v40  ;;  %v1021_v44 = vadd.s32 %v1020_v28, %v1019_v20  ;;  %v1028_v22 = vadd.s32 %v1027_v36, %v1026_v32  ;;  %v1035_v42 = vadd.s32 %v1034_v12, %v1033_v8 }
 0x195   :  { %v1042_v45 = vadd.s32 %v1041_v43, %v1040_v13  ;;  %v915_v62 = vsel %vm851_vm3, 1, %v5813_v37  ;;  %v916_v47 = vsel %vm852_vm4, 1, %v5813_v37  ;;  %v917_v61 = vsel %vm853_vm5, 1, %v5813_v37 }
 0x196   :  { %v918_v33 = vsel %vm854_vm6, 1, %v5813_v37  ;;  %v1022_v63 = vrot.slane %v1021_v44, 2  ;;  %v1029_v46 = vrot.slane %v1028_v22, 2  ;;  %v1036_v11 = vrot.slane %v1035_v42, 2 }
 0x197   :  { %v1043_v1 = vrot.slane %v1042_v45, 2  ;;  %v1243_v2 = vsel %vm294_vm2, %v915_v62, 0  ;;  %v1250_v3 = vsel %vm294_vm2, %v916_v47, 0  ;;  %v1257_v20 = vsel %vm294_vm2, %v917_v61, 0 }
 0x198   :  { %v1264_v32 = vsel %vm294_vm2, %v918_v33, 0  ;;  %v1023_v8 = vadd.s32 %v1022_v63, %v1021_v44  ;;  %v1030_v13 = vadd.s32 %v1029_v46, %v1028_v22  ;;  %v1037_v29 = vadd.s32 %v1036_v11, %v1035_v42  ;;  %v1450_v46 = vpop.permute.xlu0 %1449 }
 0x199   :  { %v1044_v28 = vadd.s32 %v1043_v1, %v1042_v45  ;;  %v1244_v36 = vrot.slane %v1243_v2, 4  ;;  %v1251_v12 = vrot.slane %v1250_v3, 4  ;;  %v1258_v43 = vrot.slane %v1257_v20, 4 }
 0x19a   :  { %v1265_v53 = vrot.slane %v1264_v32, 4  ;;  %v1024_v35 = vrot.slane %v1023_v8, 1  ;;  %v1031_v34 = vrot.slane %v1030_v13, 1  ;;  %v1038_v17 = vrot.slane %v1037_v29, 1 }
 0x19b   :  { %v1045_v10 = vrot.slane %v1044_v28, 1  ;;  %v1245_v9 = vadd.s32 %v1244_v36, %v1243_v2  ;;  %v1252_v62 = vadd.s32 %v1251_v12, %v1250_v3  ;;  %v1259_v27 = vadd.s32 %v1258_v43, %v1257_v20 }
 0x19c   :  { %v1266_v47 = vadd.s32 %v1265_v53, %v1264_v32  ;;  %v4375_v21 = vadd.s32 %v608_v30, %v607_v59  ;;  %v4377_v61 = vadd.s32 %v615_v56, %v614_v60  ;;  %v4379_v44 = vadd.s32 %v622_v0, %v621_v41 }
 0x19d   :  { %v4381_v22 = vadd.s32 %v629_v26, %v628_v52  ;;  %v1246_v42 = vrot.slane %v1245_v9, 2  ;;  %v1253_v45 = vrot.slane %v1252_v62, 2  ;;  %v1260_v33 = vrot.slane %v1259_v27, 2 }
 0x19e   :  { %v1267_v63 = vrot.slane %v1266_v47, 2  ;;  %v1025_v11 = vadd.s32 %v1024_v35, %v1023_v8  ;;  %v1032_v1 = vadd.s32 %v1031_v34, %v1030_v13  ;;  %v1039_v31 = vadd.s32 %v1038_v17, %v1037_v29  ;;  %v1454_v29 = vpop.permute.xlu1 %1453 }
 0x19f   :  { %v1046_v2 = vadd.s32 %v1045_v10, %v1044_v28  ;;  %v1247_v3 = vadd.s32 %v1246_v42, %v1245_v9  ;;  %v1254_v20 = vadd.s32 %v1253_v45, %v1252_v62  ;;  %v1261_v53 = vadd.s32 %v1260_v33, %v1259_v27 }
 0x1a0   :  { %v1268_v59 = vadd.s32 %v1267_v63, %v1266_v47  ;;  %vm1511_vm7 = vcmp.eq.s32.totalorder %v1450_v46, %v3998_v5  ;;  %vm1512_vm8 = vcmp.eq.s32.totalorder %v1450_v46, %v4034_v38  ;;  %vm1513_vm9 = vcmp.eq.s32.totalorder %v1450_v46, %v4037_v39 }
 0x1a1   :  { %vm1514_vm10 = vcmp.eq.s32.totalorder %v1450_v46, %v4040_v40  ;;  %v1248_v60 = vrot.slane %v1247_v3, 1  ;;  %v1255_v41 = vrot.slane %v1254_v20, 1  ;;  %v1262_v52 = vrot.slane %v1261_v53, 1 }
 0x1a2   :  { %v1269_v30 = vrot.slane %v1268_v59, 1  ;;  %v1575_v34 = vsel %vm1511_vm7, 1, %v5813_v37  ;;  %v1576_v10 = vsel %vm1512_vm8, 1, %v5813_v37  ;;  %v1577_v9 = vsel %vm1513_vm9, 1, %v5813_v37 }
 0x1a3   :  { %v1578_v27 = vsel %vm1514_vm10, 1, %v5813_v37  ;;  %v4392_v17 = vadd.s32 %v1025_v11, %v4351_v4  ;;  %v4395_v35 = vadd.s32 %v1032_v1, %v4353_v6  ;;  %v4398_v56 = vadd.s32 %v1039_v31, %v4355_v7 }
 0x1a4   :  { %v4401_v0 = vadd.s32 %v1046_v2, %v4357_v14  ;;  %v1639_v26 = vsel %vm294_vm2, %v1575_v34, 0  ;;  %v1646_v32 = vsel %vm294_vm2, %v1576_v10, 0  ;;  %v1653_v8 = vsel %vm294_vm2, %v1577_v9, 0 }
 0x1a5   :  { %v1660_v13 = vsel %vm294_vm2, %v1578_v27, 0  ;;  %v1249_v4 = vadd.s32 %v1248_v60, %v1247_v3  ;;  %v1256_v28 = vadd.s32 %v1255_v41, %v1254_v20  ;;  %v1263_v36 = vadd.s32 %v1262_v52, %v1261_v53 }
 0x1a6   :  { %v1270_v6 = vadd.s32 %v1269_v30, %v1268_v59  ;;  %v1640_v12 = vrot.slane %v1639_v26, 4  ;;  %v1647_v43 = vrot.slane %v1646_v32, 4  ;;  %v1654_v31 = vrot.slane %v1653_v8, 4 }
 0x1a7   :  { %v1661_v7 = vrot.slane %v1660_v13, 4  ;;  %vm1515_vm11 = vcmp.eq.s32.totalorder %v1454_v29, %v3998_v5  ;;  %vm1516_vm12 = vcmp.eq.s32.totalorder %v1454_v29, %v4034_v38  ;;  %vm1517_vm13 = vcmp.eq.s32.totalorder %v1454_v29, %v4037_v39 }
 0x1a8   :  { %vm1518_vm14 = vcmp.eq.s32.totalorder %v1454_v29, %v4040_v40  ;;  %v1641_v14 = vadd.s32 %v1640_v12, %v1639_v26  ;;  %v1648_v62 = vadd.s32 %v1647_v43, %v1646_v32  ;;  %v1655_v47 = vadd.s32 %v1654_v31, %v1653_v8 }
 0x1a9   :  { %v1662_v42 = vadd.s32 %v1661_v7, %v1660_v13  ;;  %v1579_v45 = vsel %vm1515_vm11, 1, %v5813_v37  ;;  %v1580_v33 = vsel %vm1516_vm12, 1, %v5813_v37  ;;  %v1581_v63 = vsel %vm1517_vm13, 1, %v5813_v37 }
 0x1aa   :  { %v1582_v46 = vsel %vm1518_vm14, 1, %v5813_v37  ;;  %v1642_v11 = vrot.slane %v1641_v14, 2  ;;  %v1649_v1 = vrot.slane %v1648_v62, 2  ;;  %v1656_v2 = vrot.slane %v1655_v47, 2 }
 0x1ab   :  { %v1663_v3 = vrot.slane %v1662_v42, 2  ;;  %v1667_v20 = vsel %vm294_vm2, %v1579_v45, 0  ;;  %v1674_v53 = vsel %vm294_vm2, %v1580_v33, 0  ;;  %v1681_v59 = vsel %vm294_vm2, %v1581_v63, 0 }
 0x1ac   :  { %v1688_v60 = vsel %vm294_vm2, %v1582_v46, 0  ;;  %v1643_v41 = vadd.s32 %v1642_v11, %v1641_v14  ;;  %v1650_v52 = vadd.s32 %v1649_v1, %v1648_v62  ;;  %v1657_v30 = vadd.s32 %v1656_v2, %v1655_v47  ;;  %v1482_v11 = vpop.permute.xlu0 %1481 }
 0x1ad   :  { %v1664_v34 = vadd.s32 %v1663_v3, %v1662_v42  ;;  %v1668_v10 = vrot.slane %v1667_v20, 4  ;;  %v1675_v9 = vrot.slane %v1674_v53, 4  ;;  %v1682_v27 = vrot.slane %v1681_v59, 4 }
 0x1ae   :  { %v1689_v26 = vrot.slane %v1688_v60, 4  ;;  %v1644_v32 = vrot.slane %v1643_v41, 1  ;;  %v1651_v8 = vrot.slane %v1650_v52, 1  ;;  %v1658_v13 = vrot.slane %v1657_v30, 1 }
 0x1af   :  { %v1665_v29 = vrot.slane %v1664_v34, 1  ;;  %v1669_v12 = vadd.s32 %v1668_v10, %v1667_v20  ;;  %v1676_v43 = vadd.s32 %v1675_v9, %v1674_v53  ;;  %v1683_v31 = vadd.s32 %v1682_v27, %v1681_v59 }
 0x1b0   :  { %v1690_v7 = vadd.s32 %v1689_v26, %v1688_v60  ;;  %v4420_v45 = vadd.s32 %v1249_v4, %v4375_v21  ;;  %v4423_v14 = vadd.s32 %v1256_v28, %v4377_v61  ;;  %v4426_v62 = vadd.s32 %v1263_v36, %v4379_v44 }
 0x1b1   :  { %v4429_v47 = vadd.s32 %v1270_v6, %v4381_v22  ;;  %v1670_v42 = vrot.slane %v1669_v12, 2  ;;  %v1677_v33 = vrot.slane %v1676_v43, 2  ;;  %v1684_v63 = vrot.slane %v1683_v31, 2 }
 0x1b2   :  { %v1691_v46 = vrot.slane %v1690_v7, 2  ;;  %v1645_v1 = vadd.s32 %v1644_v32, %v1643_v41  ;;  %v1652_v2 = vadd.s32 %v1651_v8, %v1650_v52  ;;  %v1659_v3 = vadd.s32 %v1658_v13, %v1657_v30  ;;  %v1486_v8 = vpop.permute.xlu1 %1485 }
 0x1b3   :  { %v1666_v20 = vadd.s32 %v1665_v29, %v1664_v34  ;;  %v1671_v21 = vadd.s32 %v1670_v42, %v1669_v12  ;;  %v1678_v4 = vadd.s32 %v1677_v33, %v1676_v43  ;;  %v1685_v53 = vadd.s32 %v1684_v63, %v1683_v31 }
 0x1b4   :  { %v1692_v61 = vadd.s32 %v1691_v46, %v1690_v7  ;;  %vm1543_vm15 = vcmp.eq.s32.totalorder %v1482_v11, %v3998_v5  ;;  %vm1544_vm0 = vcmp.eq.s32.totalorder %v1482_v11, %v4034_v38  ;;  %vm1545_vm1 = vcmp.eq.s32.totalorder %v1482_v11, %v4037_v39 }
 0x1b5   :  { %vm1546_vm3 = vcmp.eq.s32.totalorder %v1482_v11, %v4040_v40  ;;  %v1672_v44 = vrot.slane %v1671_v21, 1  ;;  %v1679_v22 = vrot.slane %v1678_v4, 1  ;;  %v1686_v28 = vrot.slane %v1685_v53, 1 }
 0x1b6   :  { %v1693_v36 = vrot.slane %v1692_v61, 1  ;;  %v1607_v6 = vsel %vm1543_vm15, 1, %v5813_v37  ;;  %v1608_v59 = vsel %vm1544_vm0, 1, %v5813_v37  ;;  %v1609_v60 = vsel %vm1545_vm1, 1, %v5813_v37 }
 0x1b7   :  { %v1610_v41 = vsel %vm1546_vm3, 1, %v5813_v37  ;;  %v4440_v52 = vadd.s32 %v1645_v1, %v4160_v15  ;;  %v4443_v30 = vadd.s32 %v1652_v2, %v4163_v16  ;;  %v4446_v34 = vadd.s32 %v1659_v3, %v4166_v18 }
 0x1b8   :  { %v4449_v10 = vadd.s32 %v1666_v20, %v4169_v19  ;;  %v1863_v9 = vsel %vm294_vm2, %v1607_v6, 0  ;;  %v1870_v27 = vsel %vm294_vm2, %v1608_v59, 0  ;;  %v1877_v26 = vsel %vm294_vm2, %v1609_v60, 0 }
 0x1b9   :  { %v1884_v32 = vsel %vm294_vm2, %v1610_v41, 0  ;;  %v1673_v15 = vadd.s32 %v1672_v44, %v1671_v21  ;;  %v1680_v13 = vadd.s32 %v1679_v22, %v1678_v4  ;;  %v1687_v29 = vadd.s32 %v1686_v28, %v1685_v53 }
 0x1ba   :  { %v1694_v16 = vadd.s32 %v1693_v36, %v1692_v61  ;;  %v1864_v12 = vrot.slane %v1863_v9, 4  ;;  %v1871_v43 = vrot.slane %v1870_v27, 4  ;;  %v1878_v18 = vrot.slane %v1877_v26, 4 }
 0x1bb   :  { %v1885_v31 = vrot.slane %v1884_v32, 4  ;;  %vm1547_vm4 = vcmp.eq.s32.totalorder %v1486_v8, %v3998_v5  ;;  %vm1548_vm5 = vcmp.eq.s32.totalorder %v1486_v8, %v4034_v38  ;;  %vm1549_vm6 = vcmp.eq.s32.totalorder %v1486_v8, %v4037_v39 }
 0x1bc   :  { %vm1550_vm7 = vcmp.eq.s32.totalorder %v1486_v8, %v4040_v40  ;;  %v1865_v19 = vadd.s32 %v1864_v12, %v1863_v9  ;;  %v1872_v7 = vadd.s32 %v1871_v43, %v1870_v27  ;;  %v1879_v42 = vadd.s32 %v1878_v18, %v1877_v26 }
 0x1bd   :  { %v1886_v33 = vadd.s32 %v1885_v31, %v1884_v32  ;;  %v1611_v63 = vsel %vm1547_vm4, 1, %v5813_v37  ;;  %v1612_v46 = vsel %vm1548_vm5, 1, %v5813_v37  ;;  %v1613_v11 = vsel %vm1549_vm6, 1, %v5813_v37 }
 0x1be   :  { %v1614_v1 = vsel %vm1550_vm7, 1, %v5813_v37  ;;  %v1866_v2 = vrot.slane %v1865_v19, 2  ;;  %v1873_v3 = vrot.slane %v1872_v7, 2  ;;  %v1880_v20 = vrot.slane %v1879_v42, 2 }
 0x1bf   :  { %v1887_v21 = vrot.slane %v1886_v33, 2  ;;  %v1891_v4 = vsel %vm294_vm2, %v1611_v63, 0  ;;  %v1898_v53 = vsel %vm294_vm2, %v1612_v46, 0  ;;  %v1905_v61 = vsel %vm294_vm2, %v1613_v11, 0 }
 0x1c0   :  { %v1912_v44 = vsel %vm294_vm2, %v1614_v1, 0  ;;  %v1867_v22 = vadd.s32 %v1866_v2, %v1865_v19  ;;  %v1874_v28 = vadd.s32 %v1873_v3, %v1872_v7  ;;  %v1881_v36 = vadd.s32 %v1880_v20, %v1879_v42  ;;  %v88_v2 = vpop.permute.xlu0 %87 }
 0x1c1   :  { %v1888_v6 = vadd.s32 %v1887_v21, %v1886_v33  ;;  %v1892_v59 = vrot.slane %v1891_v4, 4  ;;  %v1899_v60 = vrot.slane %v1898_v53, 4  ;;  %v1906_v41 = vrot.slane %v1905_v61, 4 }
 0x1c2   :  { %v1913_v9 = vrot.slane %v1912_v44, 4  ;;  %v1868_v27 = vrot.slane %v1867_v22, 1  ;;  %v1875_v26 = vrot.slane %v1874_v28, 1  ;;  %v1882_v32 = vrot.slane %v1881_v36, 1 }
 0x1c3   :  { %v1889_v8 = vrot.slane %v1888_v6, 1  ;;  %v1893_v12 = vadd.s32 %v1892_v59, %v1891_v4  ;;  %v1900_v43 = vadd.s32 %v1899_v60, %v1898_v53  ;;  %v1907_v18 = vadd.s32 %v1906_v41, %v1905_v61 }
 0x1c4   :  { %v1914_v31 = vadd.s32 %v1913_v9, %v1912_v44  ;;  %v4468_v63 = vadd.s32 %v1673_v15, %v4184_v48  ;;  %v4471_v19 = vadd.s32 %v1680_v13, %v4187_v49  ;;  %v4474_v7 = vadd.s32 %v1687_v29, %v4190_v50 }
 0x1c5   :  { %v4477_v42 = vadd.s32 %v1694_v16, %v4193_v51  ;;  %v1894_v33 = vrot.slane %v1893_v12, 2  ;;  %v1901_v46 = vrot.slane %v1900_v43, 2  ;;  %v1908_v11 = vrot.slane %v1907_v18, 2 }
 0x1c6   :  { %v1915_v1 = vrot.slane %v1914_v31, 2  ;;  %v1869_v3 = vadd.s32 %v1868_v27, %v1867_v22  ;;  %v1876_v20 = vadd.s32 %v1875_v26, %v1874_v28  ;;  %v1883_v21 = vadd.s32 %v1882_v32, %v1881_v36  ;;  %v144_v26 = vpop.permute.xlu1 %143 }
 0x1c7   :  { %5822 = vst [vmem:[#allocation18_spill] sm:$0xff] %v4477_v42  ;;  %v1890_v4 = vadd.s32 %v1889_v8, %v1888_v6  ;;  %v1895_v48 = vadd.s32 %v1894_v33, %v1893_v12  ;;  %v1902_v15 = vadd.s32 %v1901_v46, %v1900_v43  ;;  %v1909_v53 = vadd.s32 %v1908_v11, %v1907_v18 }
 0x1c8   :  { %v1916_v49 = vadd.s32 %v1915_v1, %v1914_v31  ;;  %vm182_vm8 = vcmp.eq.s32.totalorder %v88_v2, %v3998_v5  ;;  %vm183_vm9 = vcmp.eq.s32.totalorder %v88_v2, %v4034_v38  ;;  %vm184_vm10 = vcmp.eq.s32.totalorder %v88_v2, %v4037_v39 }
 0x1c9   :  { %vm185_vm11 = vcmp.eq.s32.totalorder %v88_v2, %v4040_v40  ;;  %v1896_v50 = vrot.slane %v1895_v48, 1  ;;  %v1903_v51 = vrot.slane %v1902_v15, 1  ;;  %v1910_v13 = vrot.slane %v1909_v53, 1 }
 0x1ca   :  { %v1917_v29 = vrot.slane %v1916_v49, 1  ;;  %v246_v16 = vsel %vm182_vm8, 1, %v5813_v37  ;;  %v247_v61 = vsel %vm183_vm9, 1, %v5813_v37  ;;  %v248_v44 = vsel %vm184_vm10, 1, %v5813_v37 }
 0x1cb   :  { %v249_v22 = vsel %vm185_vm11, 1, %v5813_v37  ;;  %v4488_v28 = vadd.s32 %v1869_v3, %v4208_v54  ;;  %v4491_v36 = vadd.s32 %v1876_v20, %v4211_v55  ;;  %v4494_v6 = vadd.s32 %v1883_v21, %v4214_v57 }
 0x1cc   :  { %v4497_v59 = vadd.s32 %v1890_v4, %v4217_v58  ;;  %v407_v60 = vsel %vm294_vm2, %v246_v16, 0  ;;  %v414_v41 = vsel %vm294_vm2, %v247_v61, 0  ;;  %v421_v9 = vsel %vm294_vm2, %v248_v44, 0 }
 0x1cd   :  { %5823 = vst [vmem:[#allocation19_spill] sm:$0xff] %v4488_v28  ;;  %5824 = vst [vmem:[#allocation20_spill] sm:$0xff] %v4491_v36  ;;  %v428_v27 = vsel %vm294_vm2, %v249_v22, 0  ;;  %v1897_v54 = vadd.s32 %v1896_v50, %v1895_v48  ;;  %v1904_v32 = vadd.s32 %v1903_v51, %v1902_v15  ;;  %v1911_v8 = vadd.s32 %v1910_v13, %v1909_v53 }
 0x1ce   :  { %5825 = vst [vmem:[#allocation21_spill] sm:$0xff] %v4494_v6  ;;  %5826 = vst [vmem:[#allocation22_spill] sm:$0xff] %v4497_v59  ;;  %v1918_v55 = vadd.s32 %v1917_v29, %v1916_v49  ;;  %v408_v12 = vrot.slane %v407_v60, 4  ;;  %v415_v43 = vrot.slane %v414_v41, 4  ;;  %v422_v57 = vrot.slane %v421_v9, 4 }
 0x1cf   :  { %v429_v18 = vrot.slane %v428_v27, 4  ;;  %vm214_vm12 = vcmp.eq.s32.totalorder %v144_v26, %v3998_v5  ;;  %vm215_vm13 = vcmp.eq.s32.totalorder %v144_v26, %v4034_v38  ;;  %vm216_vm14 = vcmp.eq.s32.totalorder %v144_v26, %v4037_v39 }
 0x1d0   :  { %vm217_vm15 = vcmp.eq.s32.totalorder %v144_v26, %v4040_v40  ;;  %v409_v58 = vadd.s32 %v408_v12, %v407_v60  ;;  %v416_v31 = vadd.s32 %v415_v43, %v414_v41  ;;  %v423_v33 = vadd.s32 %v422_v57, %v421_v9  ;;  %v5830_v26 = vld [vmem:[#allocation9_spill] sm:$0xff] }
 0x1d1   :  { %v430_v46 = vadd.s32 %v429_v18, %v428_v27  ;;  %v278_v11 = vsel %vm214_vm12, 1, %v5813_v37  ;;  %v279_v1 = vsel %vm215_vm13, 1, %v5813_v37  ;;  %v280_v2 = vsel %vm216_vm14, 1, %v5813_v37 }
 0x1d2   :  { %v281_v3 = vsel %vm217_vm15, 1, %v5813_v37  ;;  %v410_v20 = vrot.slane %v409_v58, 2  ;;  %v417_v21 = vrot.slane %v416_v31, 2  ;;  %v424_v4 = vrot.slane %v423_v33, 2 }
 0x1d3   :  { %v431_v48 = vrot.slane %v430_v46, 2  ;;  %v631_v15 = vsel %vm294_vm2, %v278_v11, 0  ;;  %v638_v53 = vsel %vm294_vm2, %v279_v1, 0  ;;  %v645_v49 = vsel %vm294_vm2, %v280_v2, 0 }
 0x1d4   :  { %v652_v50 = vsel %vm294_vm2, %v281_v3, 0  ;;  %v411_v51 = vadd.s32 %v410_v20, %v409_v58  ;;  %v418_v13 = vadd.s32 %v417_v21, %v416_v31  ;;  %v425_v29 = vadd.s32 %v424_v4, %v423_v33  ;;  %v762_v31 = vpop.permute.xlu0 %761 }
 0x1d5   :  { %v432_v16 = vadd.s32 %v431_v48, %v430_v46  ;;  %v632_v61 = vrot.slane %v631_v15, 4  ;;  %v639_v44 = vrot.slane %v638_v53, 4  ;;  %v646_v22 = vrot.slane %v645_v49, 4 }
 0x1d6   :  { %v653_v60 = vrot.slane %v652_v50, 4  ;;  %v4516_v41 = vadd.s32 %v1897_v54, %v4232_v23  ;;  %v4519_v9 = vadd.s32 %v1904_v32, %v4235_v24  ;;  %v4522_v27 = vadd.s32 %v1911_v8, %v4238_v25 }
 0x1d7   :  { %v4525_v12 = vadd.s32 %v1918_v55, %v5830_v26  ;;  %v633_v43 = vadd.s32 %v632_v61, %v631_v15  ;;  %v640_v57 = vadd.s32 %v639_v44, %v638_v53  ;;  %v647_v18 = vadd.s32 %v646_v22, %v645_v49 }
 0x1d8   :  { %5827 = vst [vmem:[#allocation23_spill] sm:$0xff] %v4516_v41  ;;  %5828 = vst [vmem:[#allocation24_spill] sm:$0xff] %v4519_v9  ;;  %v654_v58 = vadd.s32 %v653_v60, %v652_v50  ;;  %v412_v33 = vrot.slane %v411_v51, 1  ;;  %v419_v46 = vrot.slane %v418_v13, 1  ;;  %v426_v11 = vrot.slane %v425_v29, 1  ;;  %v794_v60 = vpop.permute.xlu1 %793 }
 0x1d9   :  { %5829 = vst [vmem:[#allocation25_spill] sm:$0xff] %v4522_v27  ;;  %5831 = vst [vmem:[#allocation9_spill] sm:$0xff] %v4525_v12  ;;  %v433_v1 = vrot.slane %v432_v16, 1  ;;  %v634_v23 = vrot.slane %v633_v43, 2  ;;  %v641_v54 = vrot.slane %v640_v57, 2  ;;  %v648_v2 = vrot.slane %v647_v18, 2 }
 0x1da   :  { %v655_v24 = vrot.slane %v654_v58, 2  ;;  %vm823_vm0 = vcmp.eq.s32.totalorder %v762_v31, %v3998_v5  ;;  %vm824_vm1 = vcmp.eq.s32.totalorder %v762_v31, %v4034_v38  ;;  %vm825_vm3 = vcmp.eq.s32.totalorder %v762_v31, %v4037_v39 }
 0x1db   :  { %vm826_vm4 = vcmp.eq.s32.totalorder %v762_v31, %v4040_v40  ;;  %v635_v25 = vadd.s32 %v634_v23, %v633_v43  ;;  %v642_v32 = vadd.s32 %v641_v54, %v640_v57  ;;  %v649_v8 = vadd.s32 %v648_v2, %v647_v18 }
 0x1dc   :  { %v656_v55 = vadd.s32 %v655_v24, %v654_v58  ;;  %v887_v3 = vsel %vm823_vm0, 1, %v5813_v37  ;;  %v888_v20 = vsel %vm824_vm1, 1, %v5813_v37  ;;  %v889_v21 = vsel %vm825_vm3, 1, %v5813_v37 }
 0x1dd   :  { %v890_v4 = vsel %vm826_vm4, 1, %v5813_v37  ;;  %v4535_v48 = vadd.s32 %v412_v33, %v411_v51  ;;  %v4537_v15 = vadd.s32 %v419_v46, %v418_v13  ;;  %v4539_v53 = vadd.s32 %v426_v11, %v425_v29 }
 0x1de   :  { %v4541_v49 = vadd.s32 %v433_v1, %v432_v16  ;;  %v1047_v50 = vsel %vm294_vm2, %v887_v3, 0  ;;  %v1054_v61 = vsel %vm294_vm2, %v888_v20, 0  ;;  %v1061_v44 = vsel %vm294_vm2, %v889_v21, 0 }
 0x1df   :  { %v1068_v22 = vsel %vm294_vm2, %v890_v4, 0  ;;  %v636_v26 = vrot.slane %v635_v25, 1  ;;  %v643_v43 = vrot.slane %v642_v32, 1  ;;  %v650_v57 = vrot.slane %v649_v8, 1 }
 0x1e0   :  { %v657_v51 = vrot.slane %v656_v55, 1  ;;  %v1048_v18 = vrot.slane %v1047_v50, 4  ;;  %v1055_v13 = vrot.slane %v1054_v61, 4  ;;  %v1062_v58 = vrot.slane %v1061_v44, 4 }
 0x1e1   :  { %v1069_v29 = vrot.slane %v1068_v22, 4  ;;  %vm855_vm5 = vcmp.eq.s32.totalorder %v794_v60, %v3998_v5  ;;  %vm856_vm6 = vcmp.eq.s32.totalorder %v794_v60, %v4034_v38  ;;  %vm857_vm7 = vcmp.eq.s32.totalorder %v794_v60, %v4037_v39 }
 0x1e2   :  { %vm858_vm8 = vcmp.eq.s32.totalorder %v794_v60, %v4040_v40  ;;  %v1049_v16 = vadd.s32 %v1048_v18, %v1047_v50  ;;  %v1056_v31 = vadd.s32 %v1055_v13, %v1054_v61  ;;  %v1063_v33 = vadd.s32 %v1062_v58, %v1061_v44 }
 0x1e3   :  { %v1070_v46 = vadd.s32 %v1069_v29, %v1068_v22  ;;  %v919_v11 = vsel %vm855_vm5, 1, %v5813_v37  ;;  %v920_v1 = vsel %vm856_vm6, 1, %v5813_v37  ;;  %v921_v23 = vsel %vm857_vm7, 1, %v5813_v37 }
 0x1e4   :  { %v922_v54 = vsel %vm858_vm8, 1, %v5813_v37  ;;  %v1050_v2 = vrot.slane %v1049_v16, 2  ;;  %v1057_v24 = vrot.slane %v1056_v31, 2  ;;  %v1064_v3 = vrot.slane %v1063_v33, 2 }
 0x1e5   :  { %v1071_v20 = vrot.slane %v1070_v46, 2  ;;  %v1271_v21 = vsel %vm294_vm2, %v919_v11, 0  ;;  %v1278_v4 = vsel %vm294_vm2, %v920_v1, 0  ;;  %v1285_v50 = vsel %vm294_vm2, %v921_v23, 0 }
 0x1e6   :  { %v1292_v61 = vsel %vm294_vm2, %v922_v54, 0  ;;  %v1051_v44 = vadd.s32 %v1050_v2, %v1049_v16  ;;  %v1058_v22 = vadd.s32 %v1057_v24, %v1056_v31  ;;  %v1065_v60 = vadd.s32 %v1064_v3, %v1063_v33  ;;  %v1458_v24 = vpop.permute.xlu0 %1457 }
 0x1e7   :  { %v1072_v18 = vadd.s32 %v1071_v20, %v1070_v46  ;;  %v1272_v13 = vrot.slane %v1271_v21, 4  ;;  %v1279_v58 = vrot.slane %v1278_v4, 4  ;;  %v1286_v29 = vrot.slane %v1285_v50, 4 }
 0x1e8   :  { %v1293_v12 = vrot.slane %v1292_v61, 4  ;;  %v1052_v27 = vrot.slane %v1051_v44, 1  ;;  %v1059_v9 = vrot.slane %v1058_v22, 1  ;;  %v1066_v41 = vrot.slane %v1065_v60, 1 }
 0x1e9   :  { %v1073_v59 = vrot.slane %v1072_v18, 1  ;;  %v1273_v6 = vadd.s32 %v1272_v13, %v1271_v21  ;;  %v1280_v11 = vadd.s32 %v1279_v58, %v1278_v4  ;;  %v1287_v36 = vadd.s32 %v1286_v29, %v1285_v50 }
 0x1ea   :  { %v1294_v1 = vadd.s32 %v1293_v12, %v1292_v61  ;;  %v4559_v28 = vadd.s32 %v636_v26, %v635_v25  ;;  %v4561_v23 = vadd.s32 %v643_v43, %v642_v32  ;;  %v4563_v16 = vadd.s32 %v650_v57, %v649_v8 }
 0x1eb   :  { %v4565_v31 = vadd.s32 %v657_v51, %v656_v55  ;;  %v1274_v33 = vrot.slane %v1273_v6, 2  ;;  %v1281_v46 = vrot.slane %v1280_v11, 2  ;;  %v1288_v54 = vrot.slane %v1287_v36, 2 }
 0x1ec   :  { %v1295_v2 = vrot.slane %v1294_v1, 2  ;;  %v1053_v3 = vadd.s32 %v1052_v27, %v1051_v44  ;;  %v1060_v20 = vadd.s32 %v1059_v9, %v1058_v22  ;;  %v1067_v42 = vadd.s32 %v1066_v41, %v1065_v60  ;;  %v1490_v60 = vpop.permute.xlu1 %1489 }
 0x1ed   :  { %v1074_v21 = vadd.s32 %v1073_v59, %v1072_v18  ;;  %v1275_v4 = vadd.s32 %v1274_v33, %v1273_v6  ;;  %v1282_v50 = vadd.s32 %v1281_v46, %v1280_v11  ;;  %v1289_v12 = vadd.s32 %v1288_v54, %v1287_v36 }
 0x1ee   :  { %v1296_v25 = vadd.s32 %v1295_v2, %v1294_v1  ;;  %vm1519_vm9 = vcmp.eq.s32.totalorder %v1458_v24, %v3998_v5  ;;  %vm1520_vm10 = vcmp.eq.s32.totalorder %v1458_v24, %v4034_v38  ;;  %vm1521_vm11 = vcmp.eq.s32.totalorder %v1458_v24, %v4037_v39 }
 0x1ef   :  { %vm1522_vm12 = vcmp.eq.s32.totalorder %v1458_v24, %v4040_v40  ;;  %v1276_v32 = vrot.slane %v1275_v4, 1  ;;  %v1283_v8 = vrot.slane %v1282_v50, 1  ;;  %v1290_v55 = vrot.slane %v1289_v12, 1 }
 0x1f0   :  { %v1297_v26 = vrot.slane %v1296_v25, 1  ;;  %v1583_v9 = vsel %vm1519_vm9, 1, %v5813_v37  ;;  %v1584_v59 = vsel %vm1520_vm10, 1, %v5813_v37  ;;  %v1585_v6 = vsel %vm1521_vm11, 1, %v5813_v37 }
 0x1f1   :  { %v1586_v36 = vsel %vm1522_vm12, 1, %v5813_v37  ;;  %v4576_v41 = vadd.s32 %v1053_v3, %v4535_v48  ;;  %v4579_v27 = vadd.s32 %v1060_v20, %v4537_v15  ;;  %v4582_v43 = vadd.s32 %v1067_v42, %v4539_v53 }
 0x1f2   :  { %v4585_v57 = vadd.s32 %v1074_v21, %v4541_v49  ;;  %v1695_v51 = vsel %vm294_vm2, %v1583_v9, 0  ;;  %v1702_v61 = vsel %vm294_vm2, %v1584_v59, 0  ;;  %v1709_v44 = vsel %vm294_vm2, %v1585_v6, 0 }
 0x1f3   :  { %5832 = vst [vmem:[#allocation26_spill] sm:$0xff] %v4576_v41  ;;  %5833 = vst [vmem:[#allocation27_spill] sm:$0xff] %v4579_v27  ;;  %v1716_v22 = vsel %vm294_vm2, %v1586_v36, 0  ;;  %v1277_v48 = vadd.s32 %v1276_v32, %v1275_v4  ;;  %v1284_v18 = vadd.s32 %v1283_v8, %v1282_v50  ;;  %v1291_v13 = vadd.s32 %v1290_v55, %v1289_v12 }
 0x1f4   :  { %5834 = vst [vmem:[#allocation28_spill] sm:$0xff] %v4582_v43  ;;  %5835 = vst [vmem:[#allocation29_spill] sm:$0xff] %v4585_v57  ;;  %v1298_v15 = vadd.s32 %v1297_v26, %v1296_v25  ;;  %v1696_v58 = vrot.slane %v1695_v51, 4  ;;  %v1703_v29 = vrot.slane %v1702_v61, 4  ;;  %v1710_v42 = vrot.slane %v1709_v44, 4 }
 0x1f5   :  { %v1717_v53 = vrot.slane %v1716_v22, 4  ;;  %vm1551_vm13 = vcmp.eq.s32.totalorder %v1490_v60, %v3998_v5  ;;  %vm1552_vm14 = vcmp.eq.s32.totalorder %v1490_v60, %v4034_v38  ;;  %vm1553_vm15 = vcmp.eq.s32.totalorder %v1490_v60, %v4037_v39 }
 0x1f6   :  { %vm1554_vm0 = vcmp.eq.s32.totalorder %v1490_v60, %v4040_v40  ;;  %v1697_v49 = vadd.s32 %v1696_v58, %v1695_v51  ;;  %v1704_v11 = vadd.s32 %v1703_v29, %v1702_v61  ;;  %v1711_v1 = vadd.s32 %v1710_v42, %v1709_v44 }
 0x1f7   :  { %v1718_v33 = vadd.s32 %v1717_v53, %v1716_v22  ;;  %v1615_v46 = vsel %vm1551_vm13, 1, %v5813_v37  ;;  %v1616_v54 = vsel %vm1552_vm14, 1, %v5813_v37  ;;  %v1617_v2 = vsel %vm1553_vm15, 1, %v5813_v37 }
 0x1f8   :  { %v1618_v24 = vsel %vm1554_vm0, 1, %v5813_v37  ;;  %v1698_v3 = vrot.slane %v1697_v49, 2  ;;  %v1705_v20 = vrot.slane %v1704_v11, 2  ;;  %v1712_v21 = vrot.slane %v1711_v1, 2 }
 0x1f9   :  { %v1719_v4 = vrot.slane %v1718_v33, 2  ;;  %v1919_v50 = vsel %vm294_vm2, %v1615_v46, 0  ;;  %v1926_v12 = vsel %vm294_vm2, %v1616_v54, 0  ;;  %v1933_v25 = vsel %vm294_vm2, %v1617_v2, 0 }
 0x1fa   :  { %v1940_v32 = vsel %vm294_vm2, %v1618_v24, 0  ;;  %v1699_v8 = vadd.s32 %v1698_v3, %v1697_v49  ;;  %v1706_v55 = vadd.s32 %v1705_v20, %v1704_v11  ;;  %v1713_v26 = vadd.s32 %v1712_v21, %v1711_v1  ;;  %v95_v3 = vpop.permute.xlu0 %94 }
 0x1fb   :  { %v1720_v9 = vadd.s32 %v1719_v4, %v1718_v33  ;;  %v1920_v59 = vrot.slane %v1919_v50, 4  ;;  %v1927_v6 = vrot.slane %v1926_v12, 4  ;;  %v1934_v36 = vrot.slane %v1933_v25, 4 }
 0x1fc   :  { %v1941_v51 = vrot.slane %v1940_v32, 4  ;;  %v1700_v61 = vrot.slane %v1699_v8, 1  ;;  %v1707_v44 = vrot.slane %v1706_v55, 1  ;;  %v1714_v22 = vrot.slane %v1713_v26, 1 }
 0x1fd   :  { %v1721_v60 = vrot.slane %v1720_v9, 1  ;;  %v1921_v58 = vadd.s32 %v1920_v59, %v1919_v50  ;;  %v1928_v29 = vadd.s32 %v1927_v6, %v1926_v12  ;;  %v1935_v42 = vadd.s32 %v1934_v36, %v1933_v25  ;;  %v5844_v6 = vld [vmem:[#allocation12_spill] sm:$0xff] }
 0x1fe   :  { %v1942_v53 = vadd.s32 %v1941_v51, %v1940_v32  ;;  %v4604_v46 = vadd.s32 %v1277_v48, %v4559_v28  ;;  %v4607_v49 = vadd.s32 %v1284_v18, %v4561_v23  ;;  %v4610_v11 = vadd.s32 %v1291_v13, %v4563_v16  ;;  %v5846_v51 = vld [vmem:[#allocation13_spill] sm:$0xff] }
 0x1ff   :  { %v4613_v1 = vadd.s32 %v1298_v15, %v4565_v31  ;;  %v1922_v33 = vrot.slane %v1921_v58, 2  ;;  %v1929_v54 = vrot.slane %v1928_v29, 2  ;;  %v1936_v2 = vrot.slane %v1935_v42, 2 }
 0x200   :  { %5836 = vst [vmem:[#allocation30_spill] sm:$0xff] %v4604_v46  ;;  %5837 = vst [vmem:[#allocation31_spill] sm:$0xff] %v4607_v49  ;;  %v1943_v24 = vrot.slane %v1942_v53, 2  ;;  %v1701_v20 = vadd.s32 %v1700_v61, %v1699_v8  ;;  %v1708_v21 = vadd.s32 %v1707_v44, %v1706_v55  ;;  %v1715_v4 = vadd.s32 %v1714_v22, %v1713_v26  ;;  %v5840_v55 = vld [vmem:[#allocation10_spill] sm:$0xff] }
 0x201   :  { %5838 = vst [vmem:[#allocation32_spill] sm:$0xff] %v4610_v11  ;;  %5839 = vst [vmem:[#allocation33_spill] sm:$0xff] %v4613_v1  ;;  %v1722_v50 = vadd.s32 %v1721_v60, %v1720_v9  ;;  %v1923_v28 = vadd.s32 %v1922_v33, %v1921_v58  ;;  %v1930_v48 = vadd.s32 %v1929_v54, %v1928_v29  ;;  %v5842_v9 = vld [vmem:[#allocation11_spill] sm:$0xff]  ;;  %v151_v29 = vpop.permute.xlu1 %150 }
 0x202   :  { %v1937_v12 = vadd.s32 %v1936_v2, %v1935_v42  ;;  %v1944_v23 = vadd.s32 %v1943_v24, %v1942_v53  ;;  %vm186_vm1 = vcmp.eq.s32.totalorder %v95_v3, %v3998_v5  ;;  %vm187_vm3 = vcmp.eq.s32.totalorder %v95_v3, %v4034_v38 }
 0x203   :  { %vm188_vm4 = vcmp.eq.s32.totalorder %v95_v3, %v4037_v39  ;;  %vm189_vm5 = vcmp.eq.s32.totalorder %v95_v3, %v4040_v40  ;;  %v1924_v16 = vrot.slane %v1923_v28, 1  ;;  %v1931_v31 = vrot.slane %v1930_v48, 1 }
 0x204   :  { %v1938_v18 = vrot.slane %v1937_v12, 1  ;;  %v1945_v13 = vrot.slane %v1944_v23, 1  ;;  %v250_v15 = vsel %vm186_vm1, 1, %v5813_v37  ;;  %v251_v25 = vsel %vm187_vm3, 1, %v5813_v37 }
 0x205   :  { %v252_v32 = vsel %vm188_vm4, 1, %v5813_v37  ;;  %v253_v8 = vsel %vm189_vm5, 1, %v5813_v37  ;;  %v4624_v26 = vadd.s32 %v1701_v20, %v5840_v55  ;;  %v4627_v59 = vadd.s32 %v1708_v21, %v5842_v9 }
 0x206   :  { %v4630_v36 = vadd.s32 %v1715_v4, %v5844_v6  ;;  %v4633_v61 = vadd.s32 %v1722_v50, %v5846_v51  ;;  %v435_v44 = vsel %vm294_vm2, %v250_v15, 0  ;;  %v442_v22 = vsel %vm294_vm2, %v251_v25, 0 }
 0x207   :  { %5841 = vst [vmem:[#allocation10_spill] sm:$0xff] %v4624_v26  ;;  %5843 = vst [vmem:[#allocation11_spill] sm:$0xff] %v4627_v59  ;;  %v449_v60 = vsel %vm294_vm2, %v252_v32, 0  ;;  %v456_v58 = vsel %vm294_vm2, %v253_v8, 0  ;;  %v1925_v42 = vadd.s32 %v1924_v16, %v1923_v28  ;;  %v1932_v53 = vadd.s32 %v1931_v31, %v1930_v48 }
 0x208   :  { %5845 = vst [vmem:[#allocation12_spill] sm:$0xff] %v4630_v36  ;;  %5847 = vst [vmem:[#allocation13_spill] sm:$0xff] %v4633_v61  ;;  %v1939_v33 = vadd.s32 %v1938_v18, %v1937_v12  ;;  %v1946_v54 = vadd.s32 %v1945_v13, %v1944_v23  ;;  %v436_v2 = vrot.slane %v435_v44, 4  ;;  %v443_v24 = vrot.slane %v442_v22, 4 }
 0x209   :  { %v450_v3 = vrot.slane %v449_v60, 4  ;;  %v457_v20 = vrot.slane %v456_v58, 4  ;;  %vm218_vm6 = vcmp.eq.s32.totalorder %v151_v29, %v3998_v5  ;;  %vm219_vm7 = vcmp.eq.s32.totalorder %v151_v29, %v4034_v38 }
 0x20a   :  { %vm220_vm8 = vcmp.eq.s32.totalorder %v151_v29, %v4037_v39  ;;  %vm221_vm9 = vcmp.eq.s32.totalorder %v151_v29, %v4040_v40  ;;  %v437_v21 = vadd.s32 %v436_v2, %v435_v44  ;;  %v444_v4 = vadd.s32 %v443_v24, %v442_v22  ;;  %v5848_v2 = vld [vmem:[#allocation14_spill] sm:$0xff] }
 0x20b   :  { %v451_v50 = vadd.s32 %v450_v3, %v449_v60  ;;  %v458_v15 = vadd.s32 %v457_v20, %v456_v58  ;;  %v282_v28 = vsel %vm218_vm6, 1, %v5813_v37  ;;  %v283_v48 = vsel %vm219_vm7, 1, %v5813_v37  ;;  %v5850_v3 = vld [vmem:[#allocation15_spill] sm:$0xff] }
 0x20c   :  { %v284_v12 = vsel %vm220_vm8, 1, %v5813_v37  ;;  %v285_v23 = vsel %vm221_vm9, 1, %v5813_v37  ;;  %v438_v16 = vrot.slane %v437_v21, 2  ;;  %v445_v31 = vrot.slane %v444_v4, 2 }
 0x20d   :  { %v452_v18 = vrot.slane %v451_v50, 2  ;;  %v459_v13 = vrot.slane %v458_v15, 2  ;;  %v659_v25 = vsel %vm294_vm2, %v282_v28, 0  ;;  %v666_v32 = vsel %vm294_vm2, %v283_v48, 0  ;;  %v5852_v28 = vld [vmem:[#allocation16_spill] sm:$0xff] }
 0x20e   :  { %v673_v8 = vsel %vm294_vm2, %v284_v12, 0  ;;  %v680_v55 = vsel %vm294_vm2, %v285_v23, 0  ;;  %v439_v9 = vadd.s32 %v438_v16, %v437_v21  ;;  %v446_v6 = vadd.s32 %v445_v31, %v444_v4  ;;  %v5854_v12 = vld [vmem:[#allocation17_spill] sm:$0xff]  ;;  %v766_v23 = vpop.permute.xlu0 %765 }
 0x20f   :  { %v453_v51 = vadd.s32 %v452_v18, %v451_v50  ;;  %v460_v44 = vadd.s32 %v459_v13, %v458_v15  ;;  %v660_v22 = vrot.slane %v659_v25, 4  ;;  %v667_v60 = vrot.slane %v666_v32, 4 }
 0x210   :  { %v674_v58 = vrot.slane %v673_v8, 4  ;;  %v681_v29 = vrot.slane %v680_v55, 4  ;;  %v4652_v24 = vadd.s32 %v1925_v42, %v5848_v2  ;;  %v4655_v20 = vadd.s32 %v1932_v53, %v5850_v3 }
 0x211   :  { %v4658_v48 = vadd.s32 %v1939_v33, %v5852_v28  ;;  %v4661_v1 = vadd.s32 %v1946_v54, %v5854_v12  ;;  %v661_v21 = vadd.s32 %v660_v22, %v659_v25  ;;  %v668_v4 = vadd.s32 %v667_v60, %v666_v32 }
 0x212   :  { %5849 = vst [vmem:[#allocation14_spill] sm:$0xff] %v4652_v24  ;;  %5851 = vst [vmem:[#allocation15_spill] sm:$0xff] %v4655_v20  ;;  %v675_v50 = vadd.s32 %v674_v58, %v673_v8  ;;  %v682_v15 = vadd.s32 %v681_v29, %v680_v55  ;;  %v440_v16 = vrot.slane %v439_v9, 1  ;;  %v447_v31 = vrot.slane %v446_v6, 1 }
 0x213   :  { %5853 = vst [vmem:[#allocation16_spill] sm:$0xff] %v4658_v48  ;;  %5855 = vst [vmem:[#allocation17_spill] sm:$0xff] %v4661_v1  ;;  %v454_v18 = vrot.slane %v453_v51, 1  ;;  %v461_v13 = vrot.slane %v460_v44, 1  ;;  %v662_v42 = vrot.slane %v661_v21, 2  ;;  %v669_v2 = vrot.slane %v668_v4, 2 }
 0x214   :  { %v676_v24 = vrot.slane %v675_v50, 2  ;;  %v683_v53 = vrot.slane %v682_v15, 2  ;;  %vm827_vm10 = vcmp.eq.s32.totalorder %v766_v23, %v3998_v5  ;;  %vm828_vm11 = vcmp.eq.s32.totalorder %v766_v23, %v4034_v38 }
 0x215   :  { %vm829_vm12 = vcmp.eq.s32.totalorder %v766_v23, %v4037_v39  ;;  %vm830_vm13 = vcmp.eq.s32.totalorder %v766_v23, %v4040_v40  ;;  %v663_v33 = vadd.s32 %v662_v42, %v661_v21  ;;  %v670_v54 = vadd.s32 %v669_v2, %v668_v4 }
 0x216   :  { %v677_v25 = vadd.s32 %v676_v24, %v675_v50  ;;  %v684_v32 = vadd.s32 %v683_v53, %v682_v15  ;;  %v891_v8 = vsel %vm827_vm10, 1, %v5813_v37  ;;  %v892_v55 = vsel %vm828_vm11, 1, %v5813_v37  ;;  %v798_v50 = vpop.permute.xlu1 %797 }
 0x217   :  { %v893_v22 = vsel %vm829_vm12, 1, %v5813_v37  ;;  %v894_v60 = vsel %vm830_vm13, 1, %v5813_v37  ;;  %v4671_v58 = vadd.s32 %v440_v16, %v439_v9  ;;  %v4673_v29 = vadd.s32 %v447_v31, %v446_v6 }
 0x218   :  { %v4675_v3 = vadd.s32 %v454_v18, %v453_v51  ;;  %v4677_v28 = vadd.s32 %v461_v13, %v460_v44  ;;  %v1075_v12 = vsel %vm294_vm2, %v891_v8, 0  ;;  %v1082_v24 = vsel %vm294_vm2, %v892_v55, 0 }
 0x219   :  { %v1089_v21 = vsel %vm294_vm2, %v893_v22, 0  ;;  %v1096_v4 = vsel %vm294_vm2, %v894_v60, 0  ;;  %v664_v15 = vrot.slane %v663_v33, 1  ;;  %v671_v23 = vrot.slane %v670_v54, 1 }
 0x21a   :  { %v678_v42 = vrot.slane %v677_v25, 1  ;;  %v685_v9 = vrot.slane %v684_v32, 1  ;;  %v1076_v16 = vrot.slane %v1075_v12, 4  ;;  %v1083_v6 = vrot.slane %v1082_v24, 4 }
 0x21b   :  { %v1090_v31 = vrot.slane %v1089_v21, 4  ;;  %v1097_v51 = vrot.slane %v1096_v4, 4  ;;  %vm859_vm14 = vcmp.eq.s32.totalorder %v798_v50, %v3998_v5  ;;  %vm860_vm15 = vcmp.eq.s32.totalorder %v798_v50, %v4034_v38 }
 0x21c   :  { %vm861_vm0 = vcmp.eq.s32.totalorder %v798_v50, %v4037_v39  ;;  %vm862_vm1 = vcmp.eq.s32.totalorder %v798_v50, %v4040_v40  ;;  %v1077_v44 = vadd.s32 %v1076_v16, %v1075_v12  ;;  %v1084_v18 = vadd.s32 %v1083_v6, %v1082_v24 }
 0x21d   :  { %v1091_v13 = vadd.s32 %v1090_v31, %v1089_v21  ;;  %v1098_v2 = vadd.s32 %v1097_v51, %v1096_v4  ;;  %v923_v53 = vsel %vm859_vm14, 1, %v5813_v37  ;;  %v924_v8 = vsel %vm860_vm15, 1, %v5813_v37 }
 0x21e   :  { %v925_v55 = vsel %vm861_vm0, 1, %v5813_v37  ;;  %v926_v22 = vsel %vm862_vm1, 1, %v5813_v37  ;;  %v1078_v60 = vrot.slane %v1077_v44, 2  ;;  %v1085_v1 = vrot.slane %v1084_v18, 2 }
 0x21f   :  { %v1092_v48 = vrot.slane %v1091_v13, 2  ;;  %v1099_v20 = vrot.slane %v1098_v2, 2  ;;  %v1299_v11 = vsel %vm294_vm2, %v923_v53, 0  ;;  %v1306_v50 = vsel %vm294_vm2, %v924_v8, 0 }
 0x220   :  { %v1313_v12 = vsel %vm294_vm2, %v925_v55, 0  ;;  %v1320_v24 = vsel %vm294_vm2, %v926_v22, 0  ;;  %v1079_v21 = vadd.s32 %v1078_v60, %v1077_v44  ;;  %v1086_v4 = vadd.s32 %v1085_v1, %v1084_v18 }
 0x221   :  { %v1093_v16 = vadd.s32 %v1092_v48, %v1091_v13  ;;  %v1100_v6 = vadd.s32 %v1099_v20, %v1098_v2  ;;  %v1300_v31 = vrot.slane %v1299_v11, 4  ;;  %v1307_v51 = vrot.slane %v1306_v50, 4  ;;  %v1462_v2 = vpop.permute.xlu0 %1461 }
 0x222   :  { %v1314_v49 = vrot.slane %v1313_v12, 4  ;;  %v1321_v61 = vrot.slane %v1320_v24, 4  ;;  %v1080_v36 = vrot.slane %v1079_v21, 1  ;;  %v1087_v59 = vrot.slane %v1086_v4, 1 }
 0x223   :  { %v1094_v26 = vrot.slane %v1093_v16, 1  ;;  %v1101_v46 = vrot.slane %v1100_v6, 1  ;;  %v1301_v57 = vadd.s32 %v1300_v31, %v1299_v11  ;;  %v1308_v53 = vadd.s32 %v1307_v51, %v1306_v50 }
 0x224   :  { %v1315_v43 = vadd.s32 %v1314_v49, %v1313_v12  ;;  %v1322_v8 = vadd.s32 %v1321_v61, %v1320_v24  ;;  %v4695_v27 = vadd.s32 %v664_v15, %v663_v33  ;;  %v4697_v55 = vadd.s32 %v671_v23, %v670_v54 }
 0x225   :  { %v4699_v44 = vadd.s32 %v678_v42, %v677_v25  ;;  %v4701_v1 = vadd.s32 %v685_v9, %v684_v32  ;;  %v1302_v20 = vrot.slane %v1301_v57, 2  ;;  %v1309_v48 = vrot.slane %v1308_v53, 2 }
 0x226   :  { %v1316_v18 = vrot.slane %v1315_v43, 2  ;;  %v1323_v13 = vrot.slane %v1322_v8, 2  ;;  %v1081_v22 = vadd.s32 %v1080_v36, %v1079_v21  ;;  %v1088_v60 = vadd.s32 %v1087_v59, %v1086_v4  ;;  %v1494_v4 = vpop.permute.xlu1 %1493 }
 0x227   :  { %v1095_v41 = vadd.s32 %v1094_v26, %v1093_v16  ;;  %v1102_v11 = vadd.s32 %v1101_v46, %v1100_v6  ;;  %v1303_v50 = vadd.s32 %v1302_v20, %v1301_v57  ;;  %v1310_v49 = vadd.s32 %v1309_v48, %v1308_v53 }
 0x228   :  { %v1317_v61 = vadd.s32 %v1316_v18, %v1315_v43  ;;  %v1324_v33 = vadd.s32 %v1323_v13, %v1322_v8  ;;  %vm1523_vm3 = vcmp.eq.s32.totalorder %v1462_v2, %v3998_v5  ;;  %vm1524_vm4 = vcmp.eq.s32.totalorder %v1462_v2, %v4034_v38 }
 0x229   :  { %vm1525_vm5 = vcmp.eq.s32.totalorder %v1462_v2, %v4037_v39  ;;  %vm1526_vm6 = vcmp.eq.s32.totalorder %v1462_v2, %v4040_v40  ;;  %v1304_v54 = vrot.slane %v1303_v50, 1  ;;  %v1311_v25 = vrot.slane %v1310_v49, 1 }
 0x22a   :  { %v1318_v32 = vrot.slane %v1317_v61, 1  ;;  %v1325_v15 = vrot.slane %v1324_v33, 1  ;;  %v1587_v59 = vsel %vm1523_vm3, 1, %v5813_v37  ;;  %v1588_v46 = vsel %vm1524_vm4, 1, %v5813_v37 }
 0x22b   :  { %v1589_v57 = vsel %vm1525_vm5, 1, %v5813_v37  ;;  %v1590_v43 = vsel %vm1526_vm6, 1, %v5813_v37  ;;  %v4712_v26 = vadd.s32 %v1081_v22, %v4671_v58  ;;  %v4715_v36 = vadd.s32 %v1088_v60, %v4673_v29 }
 0x22c   :  { %v4718_v23 = vadd.s32 %v1095_v41, %v4675_v3  ;;  %v4721_v42 = vadd.s32 %v1102_v11, %v4677_v28  ;;  %v1723_v9 = vsel %vm294_vm2, %v1587_v59, 0  ;;  %v1730_v12 = vsel %vm294_vm2, %v1588_v46, 0 }
 0x22d   :  { %5856 = vst [vmem:[#allocation34_spill] sm:$0xff] %v4715_v36  ;;  %v1737_v24 = vsel %vm294_vm2, %v1589_v57, 0  ;;  %v1744_v21 = vsel %vm294_vm2, %v1590_v43, 0  ;;  %v1305_v58 = vadd.s32 %v1304_v54, %v1303_v50  ;;  %v1312_v16 = vadd.s32 %v1311_v25, %v1310_v49  ;;  %v5901_v36 = vld [vmem:[#allocation12_spill] sm:$0xff] }
 0x22e   :  { %5857 = vst [vmem:[#allocation35_spill] sm:$0xff] %v4721_v42  ;;  %v1319_v6 = vadd.s32 %v1318_v32, %v1317_v61  ;;  %v1326_v29 = vadd.s32 %v1325_v15, %v1324_v33  ;;  %v1724_v31 = vrot.slane %v1723_v9, 4  ;;  %v1731_v51 = vrot.slane %v1730_v12, 4 }
 0x22f   :  { %v1738_v41 = vrot.slane %v1737_v24, 4  ;;  %v1745_v3 = vrot.slane %v1744_v21, 4  ;;  %vm1555_vm7 = vcmp.eq.s32.totalorder %v1494_v4, %v3998_v5  ;;  %vm1556_vm8 = vcmp.eq.s32.totalorder %v1494_v4, %v4034_v38 }
 0x230   :  { %vm1557_vm9 = vcmp.eq.s32.totalorder %v1494_v4, %v4037_v39  ;;  %vm1558_vm10 = vcmp.eq.s32.totalorder %v1494_v4, %v4040_v40  ;;  %v1725_v28 = vadd.s32 %v1724_v31, %v1723_v9  ;;  %v1732_v53 = vadd.s32 %v1731_v51, %v1730_v12 }
 0x231   :  { %v1739_v8 = vadd.s32 %v1738_v41, %v1737_v24  ;;  %v1746_v20 = vadd.s32 %v1745_v3, %v1744_v21  ;;  %v1619_v48 = vsel %vm1555_vm7, 1, %v5813_v37  ;;  %v1620_v18 = vsel %vm1556_vm8, 1, %v5813_v37 }
 0x232   :  { %v1621_v13 = vsel %vm1557_vm9, 1, %v5813_v37  ;;  %v1622_v2 = vsel %vm1558_vm10, 1, %v5813_v37  ;;  %v1726_v22 = vrot.slane %v1725_v28, 2  ;;  %v1733_v60 = vrot.slane %v1732_v53, 2 }
 0x233   :  { %v1740_v11 = vrot.slane %v1739_v8, 2  ;;  %v1747_v50 = vrot.slane %v1746_v20, 2  ;;  %v1947_v49 = vsel %vm294_vm2, %v1619_v48, 0  ;;  %v1954_v61 = vsel %vm294_vm2, %v1620_v18, 0 }
 0x234   :  { %v1961_v33 = vsel %vm294_vm2, %v1621_v13, 0  ;;  %v1968_v54 = vsel %vm294_vm2, %v1622_v2, 0  ;;  %v1727_v25 = vadd.s32 %v1726_v22, %v1725_v28  ;;  %v1734_v32 = vadd.s32 %v1733_v60, %v1732_v53  ;;  %v2154_v22 = vpop.permute.xlu0 %2153 }
 0x235   :  { %v1741_v15 = vadd.s32 %v1740_v11, %v1739_v8  ;;  %v1748_v59 = vadd.s32 %v1747_v50, %v1746_v20  ;;  %v1948_v46 = vrot.slane %v1947_v49, 4  ;;  %v1955_v57 = vrot.slane %v1954_v61, 4 }
 0x236   :  { %v1962_v43 = vrot.slane %v1961_v33, 4  ;;  %v1969_v9 = vrot.slane %v1968_v54, 4  ;;  %v1728_v12 = vrot.slane %v1727_v25, 1  ;;  %v1735_v24 = vrot.slane %v1734_v32, 1 }
 0x237   :  { %v1742_v21 = vrot.slane %v1741_v15, 1  ;;  %v1749_v4 = vrot.slane %v1748_v59, 1  ;;  %v1949_v31 = vadd.s32 %v1948_v46, %v1947_v49  ;;  %v1956_v51 = vadd.s32 %v1955_v57, %v1954_v61 }
 0x238   :  { %v1963_v41 = vadd.s32 %v1962_v43, %v1961_v33  ;;  %v1970_v3 = vadd.s32 %v1969_v9, %v1968_v54  ;;  %v4740_v48 = vadd.s32 %v1305_v58, %v4695_v27  ;;  %v4743_v28 = vadd.s32 %v1312_v16, %v4697_v55 }
 0x239   :  { %v4746_v53 = vadd.s32 %v1319_v6, %v4699_v44  ;;  %v4749_v8 = vadd.s32 %v1326_v29, %v4701_v1  ;;  %v1950_v20 = vrot.slane %v1949_v31, 2  ;;  %v1957_v18 = vrot.slane %v1956_v51, 2 }
 0x23a   :  { %5858 = vst [vmem:[#allocation36_spill] sm:$0xff] %v4743_v28  ;;  %v1964_v13 = vrot.slane %v1963_v41, 2  ;;  %v1971_v2 = vrot.slane %v1970_v3, 2  ;;  %v1729_v60 = vadd.s32 %v1728_v12, %v1727_v25  ;;  %v1736_v11 = vadd.s32 %v1735_v24, %v1734_v32  ;;  %v2158_v24 = vpop.permute.xlu1 %2157 }
 0x23b   :  { %5859 = vst [vmem:[#allocation37_spill] sm:$0xff] %v4749_v8  ;;  %v1743_v50 = vadd.s32 %v1742_v21, %v1741_v15  ;;  %v1750_v49 = vadd.s32 %v1749_v4, %v1748_v59  ;;  %v1951_v27 = vadd.s32 %v1950_v20, %v1949_v31  ;;  %v1958_v58 = vadd.s32 %v1957_v18, %v1956_v51 }
 0x23c   :  { %v1965_v61 = vadd.s32 %v1964_v13, %v1963_v41  ;;  %v1972_v55 = vadd.s32 %v1971_v2, %v1970_v3  ;;  %vm2215_vm11 = vcmp.eq.s32.totalorder %v2154_v22, %v3998_v5  ;;  %vm2216_vm12 = vcmp.eq.s32.totalorder %v2154_v22, %v4034_v38 }
 0x23d   :  { %vm2217_vm13 = vcmp.eq.s32.totalorder %v2154_v22, %v4037_v39  ;;  %vm2218_vm14 = vcmp.eq.s32.totalorder %v2154_v22, %v4040_v40  ;;  %v1952_v44 = vrot.slane %v1951_v27, 1  ;;  %v1959_v1 = vrot.slane %v1958_v58, 1 }
 0x23e   :  { %v1966_v16 = vrot.slane %v1965_v61, 1  ;;  %v1973_v6 = vrot.slane %v1972_v55, 1  ;;  %v2279_v29 = vsel %vm2215_vm11, 1, %v5813_v37  ;;  %v2280_v33 = vsel %vm2216_vm12, 1, %v5813_v37 }
 0x23f   :  { %v2281_v54 = vsel %vm2217_vm13, 1, %v5813_v37  ;;  %v2282_v25 = vsel %vm2218_vm14, 1, %v5813_v37  ;;  %v4760_v32 = vadd.s32 %v1729_v60, %v4392_v17  ;;  %v4763_v15 = vadd.s32 %v1736_v11, %v4395_v35 }
 0x240   :  { %v4766_v59 = vadd.s32 %v1743_v50, %v4398_v56  ;;  %v4769_v46 = vadd.s32 %v1750_v49, %v4401_v0  ;;  %v2343_v57 = vsel %vm294_vm2, %v2279_v29, 0  ;;  %v2350_v43 = vsel %vm294_vm2, %v2280_v33, 0 }
 0x241   :  { %v2357_v9 = vsel %vm294_vm2, %v2281_v54, 0  ;;  %v2364_v12 = vsel %vm294_vm2, %v2282_v25, 0  ;;  %v4775_v17 = vadd.s32 %v1952_v44, %v1951_v27  ;;  %v4777_v21 = vadd.s32 %v1959_v1, %v1958_v58  ;;  %v3797_v1 = vld [vmem:[#allocation3 + $0x4] ss:$8 sps:$4 sm:$0xff]  }
 0x242   :  { %v4779_v35 = vadd.s32 %v1966_v16, %v1965_v61  ;;  %v4781_v56 = vadd.s32 %v1973_v6, %v1972_v55  ;;  %v2344_v4 = vrot.slane %v2343_v57, 4  ;;  %v2351_v0 = vrot.slane %v2350_v43, 4  ;;  %v3799_v54 = vld [vmem:[#allocation3 + $0x104] ss:$8 sps:$4 sm:$0xff]   ;;  %3578 = vmatprep.subr.bf16.mxu1 %v3797_v1 }
 0x243   :  { %v2358_v31 = vrot.slane %v2357_v9, 4  ;;  %v2365_v51 = vrot.slane %v2364_v12, 4  ;;  %vm2219_vm15 = vcmp.eq.s32.totalorder %v2158_v24, %v3998_v5  ;;  %vm2220_vm0 = vcmp.eq.s32.totalorder %v2158_v24, %v4034_v38  ;;  %3621 = vmatprep.subr.bf16.mxu0 %v3799_v54 }
 0x244   :  { %vm2221_vm1 = vcmp.eq.s32.totalorder %v2158_v24, %v4037_v39  ;;  %vm2222_vm3 = vcmp.eq.s32.totalorder %v2158_v24, %v4040_v40  ;;  %v2345_v41 = vadd.s32 %v2344_v4, %v2343_v57  ;;  %v2352_v3 = vadd.s32 %v2351_v0, %v2350_v43 }
 0x245   :  { %v2359_v20 = vadd.s32 %v2358_v31, %v2357_v9  ;;  %v2366_v18 = vadd.s32 %v2365_v51, %v2364_v12  ;;  %v2283_v13 = vsel %vm2219_vm15, 1, %v5813_v37  ;;  %v2284_v2 = vsel %vm2220_vm0, 1, %v5813_v37 }
 0x246   :  { %v2285_v22 = vsel %vm2221_vm1, 1, %v5813_v37  ;;  %v2286_v60 = vsel %vm2222_vm3, 1, %v5813_v37  ;;  %v2346_v11 = vrot.slane %v2345_v41, 2  ;;  %v2353_v50 = vrot.slane %v2352_v3, 2 }
 0x247   :  { %v2360_v49 = vrot.slane %v2359_v20, 2  ;;  %v2367_v27 = vrot.slane %v2366_v18, 2  ;;  %v2371_v58 = vsel %vm294_vm2, %v2283_v13, 0  ;;  %v2378_v61 = vsel %vm294_vm2, %v2284_v2, 0 }
 0x248   :  { %v2385_v55 = vsel %vm294_vm2, %v2285_v22, 0  ;;  %v2392_v44 = vsel %vm294_vm2, %v2286_v60, 0  ;;  %v2347_v16 = vadd.s32 %v2346_v11, %v2345_v41  ;;  %v2354_v6 = vadd.s32 %v2353_v50, %v2352_v3 }
 0x249   :  { %v2361_v29 = vadd.s32 %v2360_v49, %v2359_v20  ;;  %v2368_v33 = vadd.s32 %v2367_v27, %v2366_v18  ;;  %v2372_v25 = vrot.slane %v2371_v58, 4  ;;  %v2379_v57 = vrot.slane %v2378_v61, 4 }
 0x24a   :  { %v2386_v43 = vrot.slane %v2385_v55, 4  ;;  %v2393_v9 = vrot.slane %v2392_v44, 4  ;;  %v2348_v12 = vrot.slane %v2347_v16, 1  ;;  %v2355_v24 = vrot.slane %v2354_v6, 1 }
 0x24b   :  { %v2362_v4 = vrot.slane %v2361_v29, 1  ;;  %v2369_v0 = vrot.slane %v2368_v33, 1  ;;  %v2373_v31 = vadd.s32 %v2372_v25, %v2371_v58  ;;  %v2380_v51 = vadd.s32 %v2379_v57, %v2378_v61 }
 0x24c   :  { %v2387_v13 = vadd.s32 %v2386_v43, %v2385_v55  ;;  %v2394_v2 = vadd.s32 %v2393_v9, %v2392_v44  ;;  %v2349_v22 = vadd.s32 %v2348_v12, %v2347_v16  ;;  %v2356_v41 = vadd.s32 %v2355_v24, %v2354_v6 }
 0x24d   :  { %v2363_v3 = vadd.s32 %v2362_v4, %v2361_v29  ;;  %v2370_v20 = vadd.s32 %v2369_v0, %v2368_v33  ;;  %v2374_v18 = vrot.slane %v2373_v31, 2  ;;  %v2381_v60 = vrot.slane %v2380_v51, 2 }
 0x24e   :  { %v2388_v11 = vrot.slane %v2387_v13, 2  ;;  %v2395_v50 = vrot.slane %v2394_v2, 2  ;;  %v2791_v49 = vadd.s32 %v2349_v22, %v4440_v52  ;;  %v2792_v27 = vadd.s32 %v2356_v41, %v4443_v30 }
 0x24f   :  { %v2793_v1 = vadd.s32 %v2363_v3, %v4446_v34  ;;  %v2794_v54 = vadd.s32 %v2370_v20, %v4449_v10  ;;  %v2375_v58 = vadd.s32 %v2374_v18, %v2373_v31  ;;  %v2382_v61 = vadd.s32 %v2381_v60, %v2380_v51  ;;  %v2186_v31 = vpop.permute.xlu0 %2185  ;;  %v5871_v60 = vld [vmem:[#allocation21_spill] sm:$0xff] }
 0x250   :  { %v2389_v55 = vadd.s32 %v2388_v11, %v2387_v13  ;;  %v2396_v44 = vadd.s32 %v2395_v50, %v2394_v2  ;;  %v2867_v16 = vcvt.s32.f32 %v2791_v49  ;;  %v2868_v6 = vcvt.s32.f32 %v2792_v27  ;;  %v3801_v13 = vld [vmem:[#allocation3] ss:$8 sps:$4 sm:$0xff]   ;;  %v3803_v27 = vld [vmem:[#allocation3 + $0x14] ss:$8 sps:$4 sm:$0xff]  }
 0x251   :  { %v2869_v29 = vcvt.s32.f32 %v2793_v1  ;;  %v2870_v33 = vcvt.s32.f32 %v2794_v54  ;;  %v2376_v25 = vrot.slane %v2375_v58, 1  ;;  %v2383_v57 = vrot.slane %v2382_v61, 1  ;;  %v3802_v2 = vld [vmem:[#allocation3 + $0x100] ss:$8 sps:$4 sm:$0xff]   ;;  %3579 = vmatpush1.bf16.msra.mxu1 %v3801_v13  ;;  %v3805_v1 = vld [vmem:[#allocation3 + $0x114] ss:$8 sps:$4 sm:$0xff]  }
 0x252   :  { %v2390_v43 = vrot.slane %v2389_v55, 1  ;;  %v2397_v9 = vrot.slane %v2396_v44, 1  ;;  %v4801_v52 = vadd.s32 %v4775_v17, %v4420_v45  ;;  %v4805_v30 = vadd.s32 %v4777_v21, %v4423_v14  ;;  %3622 = vmatpush1.bf16.msra.mxu0 %v3802_v2  ;;  %3580 = vmatprep.subr.bf16.mxu1 %v3803_v27  ;;  %v5872_v11 = vld [vmem:[#allocation22_spill] sm:$0xff] }
 0x253   :  { %v4809_v34 = vadd.s32 %v4779_v35, %v4426_v62  ;;  %v4813_v10 = vadd.s32 %v4781_v56, %v4429_v47  ;;  %v2377_v12 = vadd.s32 %v2376_v25, %v2375_v58  ;;  %v2384_v24 = vadd.s32 %v2383_v57, %v2382_v61  ;;  %v5864_v35 = vld [vmem:[#allocation18_spill] sm:$0xff]  ;;  %3623 = vmatprep.subr.bf16.mxu0 %v3805_v1 }
 0x254   :  { %v2391_v4 = vadd.s32 %v2390_v43, %v2389_v55  ;;  %v2398_v0 = vadd.s32 %v2397_v9, %v2396_v44  ;;  %v4815_v51 = vpack.c.bf16 %v2867_v16, %v2867_v16  ;;  %v4817_v45 = vpack.c.bf16 %v2868_v6, %v2868_v6  ;;  %v2190_v44 = vpop.permute.xlu1 %2189 }
 0x255   :  { %v4819_v17 = vpack.c.bf16 %v2869_v29, %v2869_v29  ;;  %v4821_v14 = vpack.c.bf16 %v2870_v33, %v2870_v33  ;;  %v2795_v62 = vadd.s32 %v2377_v12, %v4468_v63  ;;  %v2796_v21 = vadd.s32 %v2384_v24, %v4471_v19 }
 0x256   :  { %5860 = vst [vmem:[#allocation38_spill] sm:$0xff] %v4815_v51  ;;  %5861 = vst [vmem:[#allocation39_spill] sm:$0xff] %v4817_v45  ;;  %v2797_v47 = vadd.s32 %v2391_v4, %v4474_v7  ;;  %v2798_v56 = vadd.s32 %v2398_v0, %v5864_v35  ;;  %vm2247_vm4 = vcmp.eq.s32.totalorder %v2186_v31, %v3998_v5  ;;  %v5899_v45 = vld [vmem:[#allocation10_spill] sm:$0xff] }
 0x257   :  { %5862 = vst [vmem:[#allocation40_spill] sm:$0xff] %v4819_v17  ;;  %5863 = vst [vmem:[#allocation41_spill] sm:$0xff] %v4821_v14  ;;  %vm2248_vm5 = vcmp.eq.s32.totalorder %v2186_v31, %v4034_v38  ;;  %vm2249_vm6 = vcmp.eq.s32.totalorder %v2186_v31, %v4037_v39  ;;  %vm2250_vm7 = vcmp.eq.s32.totalorder %v2186_v31, %v4040_v40  ;;  %v2871_v22 = vcvt.s32.f32 %v2795_v62 }
 0x258   :  { %v2872_v41 = vcvt.s32.f32 %v2796_v21  ;;  %v2873_v3 = vcvt.s32.f32 %v2797_v47  ;;  %v2874_v63 = vcvt.s32.f32 %v2798_v56  ;;  %v2311_v19 = vsel %vm2247_vm4, 1, %v5813_v37 }
 0x259   :  { %v2312_v7 = vsel %vm2248_vm5, 1, %v5813_v37  ;;  %v2313_v20 = vsel %vm2249_vm6, 1, %v5813_v37  ;;  %v2314_v18 = vsel %vm2250_vm7, 1, %v5813_v37  ;;  %v4838_v49 = vpack.c.bf16 %v2871_v22, %v2871_v22 }
 0x25a   :  { %v2567_v54 = vsel %vm294_vm2, %v2311_v19, 0  ;;  %v2574_v58 = vsel %vm294_vm2, %v2312_v7, 0  ;;  %v2581_v61 = vsel %vm294_vm2, %v2313_v20, 0  ;;  %v2588_v55 = vsel %vm294_vm2, %v2314_v18, 0 }
 0x25b   :  { %5865 = vst [vmem:[#allocation18_spill] sm:$0xff] %v4838_v49  ;;  %v4845_v6 = vpack.c.bf16 %v2872_v41, %v2872_v41  ;;  %v4847_v29 = vpack.c.bf16 %v2873_v3, %v2873_v3  ;;  %v4849_v33 = vpack.c.bf16 %v2874_v63, %v2874_v63  ;;  %v2568_v25 = vrot.slane %v2567_v54, 4 }
 0x25c   :  { %v2575_v57 = vrot.slane %v2574_v58, 4  ;;  %v2582_v43 = vrot.slane %v2581_v61, 4  ;;  %v2589_v9 = vrot.slane %v2588_v55, 4  ;;  %vm2251_vm8 = vcmp.eq.s32.totalorder %v2190_v44, %v3998_v5 }
 0x25d   :  { %5866 = vst [vmem:[#allocation42_spill] sm:$0xff] %v4845_v6  ;;  %5867 = vst [vmem:[#allocation43_spill] sm:$0xff] %v4847_v29  ;;  %vm2252_vm9 = vcmp.eq.s32.totalorder %v2190_v44, %v4034_v38  ;;  %vm2253_vm10 = vcmp.eq.s32.totalorder %v2190_v44, %v4037_v39  ;;  %vm2254_vm11 = vcmp.eq.s32.totalorder %v2190_v44, %v4040_v40  ;;  %v2315_v31 = vsel %vm2251_vm8, 1, %v5813_v37 }
 0x25e   :  { %5868 = vst [vmem:[#allocation44_spill] sm:$0xff] %v4849_v33  ;;  %v2569_v12 = vadd.s32 %v2568_v25, %v2567_v54  ;;  %v2576_v24 = vadd.s32 %v2575_v57, %v2574_v58  ;;  %v2583_v4 = vadd.s32 %v2582_v43, %v2581_v61  ;;  %v2590_v0 = vadd.s32 %v2589_v9, %v2588_v55 }
 0x25f   :  { %v2316_v62 = vsel %vm2252_vm9, 1, %v5813_v37  ;;  %v2317_v21 = vsel %vm2253_vm10, 1, %v5813_v37  ;;  %v2318_v47 = vsel %vm2254_vm11, 1, %v5813_v37  ;;  %v2595_v22 = vsel %vm294_vm2, %v2315_v31, 0 }
 0x260   :  { %v2570_v35 = vrot.slane %v2569_v12, 2  ;;  %v2577_v56 = vrot.slane %v2576_v24, 2  ;;  %v2584_v13 = vrot.slane %v2583_v4, 2  ;;  %v2591_v2 = vrot.slane %v2590_v0, 2 }
 0x261   :  { %v2602_v41 = vsel %vm294_vm2, %v2316_v62, 0  ;;  %v2609_v3 = vsel %vm294_vm2, %v2317_v21, 0  ;;  %v2616_v63 = vsel %vm294_vm2, %v2318_v47, 0  ;;  %v2596_v27 = vrot.slane %v2595_v22, 4 }
 0x262   :  { %v2571_v19 = vadd.s32 %v2570_v35, %v2569_v12  ;;  %v2578_v7 = vadd.s32 %v2577_v56, %v2576_v24  ;;  %v2585_v20 = vadd.s32 %v2584_v13, %v2583_v4  ;;  %v2592_v18 = vadd.s32 %v2591_v2, %v2590_v0  ;;  %v5869_v35 = vld [vmem:[#allocation19_spill] sm:$0xff]  ;;  %v5870_v13 = vld [vmem:[#allocation20_spill] sm:$0xff] }
 0x263   :  { %v2603_v1 = vrot.slane %v2602_v41, 4  ;;  %v2610_v54 = vrot.slane %v2609_v3, 4  ;;  %v2617_v58 = vrot.slane %v2616_v63, 4  ;;  %v2597_v57 = vadd.s32 %v2596_v27, %v2595_v22  ;;  %v3807_v22 = vld [vmem:[#allocation3 + $0x10] ss:$8 sps:$4 sm:$0xff]  }
 0x264   :  { %v2572_v61 = vrot.slane %v2571_v19, 1  ;;  %v2579_v55 = vrot.slane %v2578_v7, 1  ;;  %v2586_v44 = vrot.slane %v2585_v20, 1  ;;  %v2593_v25 = vrot.slane %v2592_v18, 1  ;;  %3581 = vmatpush1.bf16.msra.mxu1 %v3807_v22 }
 0x265   :  { %v2604_v43 = vadd.s32 %v2603_v1, %v2602_v41  ;;  %v2611_v9 = vadd.s32 %v2610_v54, %v2609_v3  ;;  %v2618_v31 = vadd.s32 %v2617_v58, %v2616_v63  ;;  %v2598_v12 = vrot.slane %v2597_v57, 2  ;;  %v3808_v41 = vld [vmem:[#allocation3 + $0x110] ss:$8 sps:$4 sm:$0xff]  }
 0x266   :  { %v2573_v62 = vadd.s32 %v2572_v61, %v2571_v19  ;;  %v2580_v21 = vadd.s32 %v2579_v55, %v2578_v7  ;;  %v2587_v50 = vadd.s32 %v2586_v44, %v2585_v20  ;;  %v2594_v47 = vadd.s32 %v2593_v25, %v2592_v18  ;;  %3624 = vmatpush1.bf16.msra.mxu0 %v3808_v41  ;;  %v3809_v44 = vld [vmem:[#allocation3 + $0x24] ss:$8 sps:$4 sm:$0xff]  }
 0x267   :  { %v2605_v24 = vrot.slane %v2604_v43, 2  ;;  %v2612_v4 = vrot.slane %v2611_v9, 2  ;;  %v2619_v0 = vrot.slane %v2618_v31, 2  ;;  %v2599_v3 = vadd.s32 %v2598_v12, %v2597_v57  ;;  %v3811_v57 = vld [vmem:[#allocation3 + $0x124] ss:$8 sps:$4 sm:$0xff]   ;;  %3582 = vmatprep.subr.bf16.mxu1 %v3809_v44 }
 0x268   :  { %v2823_v56 = vadd.s32 %v2573_v62, %v5869_v35  ;;  %v2824_v2 = vadd.s32 %v2580_v21, %v5870_v13  ;;  %v2825_v16 = vadd.s32 %v2587_v50, %v5871_v60  ;;  %v2826_v17 = vadd.s32 %v2594_v47, %v5872_v11  ;;  %3625 = vmatprep.subr.bf16.mxu0 %v3811_v57 }
 0x269   :  { %v2606_v63 = vadd.s32 %v2605_v24, %v2604_v43  ;;  %v2613_v19 = vadd.s32 %v2612_v4, %v2611_v9  ;;  %v2620_v7 = vadd.s32 %v2619_v0, %v2618_v31  ;;  %v2600_v54 = vrot.slane %v2599_v3, 1  ;;  %v102_v31 = vpop.permute.xlu0 %101  ;;  %v5877_v24 = vld [vmem:[#allocation23_spill] sm:$0xff]  ;;  %v5878_v0 = vld [vmem:[#allocation24_spill] sm:$0xff] }
 0x26a   :  { %v2899_v20 = vcvt.s32.f32 %v2823_v56  ;;  %v2900_v18 = vcvt.s32.f32 %v2824_v2  ;;  %v2901_v27 = vcvt.s32.f32 %v2825_v16  ;;  %v2902_v1 = vcvt.s32.f32 %v2826_v17  ;;  %v5879_v56 = vld [vmem:[#allocation25_spill] sm:$0xff] }
 0x26b   :  { %v2607_v58 = vrot.slane %v2606_v63, 1  ;;  %v2614_v61 = vrot.slane %v2613_v19, 1  ;;  %v2621_v55 = vrot.slane %v2620_v7, 1  ;;  %v2601_v43 = vadd.s32 %v2600_v54, %v2599_v3  ;;  %v5880_v2 = vld [vmem:[#allocation9_spill] sm:$0xff] }
 0x26c   :  { %v4871_v62 = vpack.c.bf16 %v2899_v20, %v2899_v20  ;;  %v4873_v21 = vpack.c.bf16 %v2900_v18, %v2900_v18  ;;  %v4875_v47 = vpack.c.bf16 %v2901_v27, %v2901_v27  ;;  %v4877_v12 = vpack.c.bf16 %v2902_v1, %v2902_v1 }
 0x26d   :  { %v2608_v9 = vadd.s32 %v2607_v58, %v2606_v63  ;;  %v2615_v16 = vadd.s32 %v2614_v61, %v2613_v19  ;;  %v2622_v17 = vadd.s32 %v2621_v55, %v2620_v7  ;;  %v2827_v4 = vadd.s32 %v2601_v43, %v5877_v24 }
 0x26e   :  { %5873 = vst [vmem:[#allocation19_spill] sm:$0xff] %v4871_v62  ;;  %5874 = vst [vmem:[#allocation20_spill] sm:$0xff] %v4873_v21  ;;  %vm190_vm12 = vcmp.eq.s32.totalorder %v102_v31, %v3998_v5  ;;  %vm191_vm13 = vcmp.eq.s32.totalorder %v102_v31, %v4034_v38  ;;  %vm192_vm14 = vcmp.eq.s32.totalorder %v102_v31, %v4037_v39 }
 0x26f   :  { %5875 = vst [vmem:[#allocation21_spill] sm:$0xff] %v4875_v47  ;;  %5876 = vst [vmem:[#allocation22_spill] sm:$0xff] %v4877_v12  ;;  %v2828_v35 = vadd.s32 %v2608_v9, %v5878_v0  ;;  %v2829_v13 = vadd.s32 %v2615_v16, %v5879_v56  ;;  %v2830_v22 = vadd.s32 %v2622_v17, %v5880_v2  ;;  %v2903_v41 = vcvt.s32.f32 %v2827_v4  ;;  %v158_v9 = vpop.permute.xlu1 %157 }
 0x270   :  { %vm193_vm15 = vcmp.eq.s32.totalorder %v102_v31, %v4040_v40  ;;  %v254_v7 = vsel %vm190_vm12, 1, %v5813_v37  ;;  %v255_v20 = vsel %vm191_vm13, 1, %v5813_v37  ;;  %v256_v18 = vsel %vm192_vm14, 1, %v5813_v37 }
 0x271   :  { %v2904_v3 = vcvt.s32.f32 %v2828_v35  ;;  %v2905_v63 = vcvt.s32.f32 %v2829_v13  ;;  %v2906_v19 = vcvt.s32.f32 %v2830_v22  ;;  %v257_v27 = vsel %vm193_vm15, 1, %v5813_v37 }
 0x272   :  { %v463_v55 = vsel %vm294_vm2, %v254_v7, 0  ;;  %v470_v44 = vsel %vm294_vm2, %v255_v20, 0  ;;  %v477_v57 = vsel %vm294_vm2, %v256_v18, 0  ;;  %v484_v43 = vsel %vm294_vm2, %v257_v27, 0 }
 0x273   :  { %v4899_v16 = vpack.c.bf16 %v2903_v41, %v2903_v41  ;;  %v4901_v17 = vpack.c.bf16 %v2904_v3, %v2904_v3  ;;  %v4903_v31 = vpack.c.bf16 %v2905_v63, %v2905_v63  ;;  %v4905_v24 = vpack.c.bf16 %v2906_v19, %v2906_v19 }
 0x274   :  { %v464_v4 = vrot.slane %v463_v55, 4  ;;  %v471_v0 = vrot.slane %v470_v44, 4  ;;  %v478_v35 = vrot.slane %v477_v57, 4  ;;  %v485_v56 = vrot.slane %v484_v43, 4 }
 0x275   :  { %5881 = vst [vmem:[#allocation23_spill] sm:$0xff] %v4899_v16  ;;  %5882 = vst [vmem:[#allocation24_spill] sm:$0xff] %v4901_v17  ;;  %vm222_vm0 = vcmp.eq.s32.totalorder %v158_v9, %v3998_v5  ;;  %vm223_vm1 = vcmp.eq.s32.totalorder %v158_v9, %v4034_v38  ;;  %vm224_vm3 = vcmp.eq.s32.totalorder %v158_v9, %v4037_v39 }
 0x276   :  { %5883 = vst [vmem:[#allocation25_spill] sm:$0xff] %v4903_v31  ;;  %5884 = vst [vmem:[#allocation9_spill] sm:$0xff] %v4905_v24  ;;  %vm225_vm4 = vcmp.eq.s32.totalorder %v158_v9, %v4040_v40  ;;  %v465_v13 = vadd.s32 %v464_v4, %v463_v55  ;;  %v472_v2 = vadd.s32 %v471_v0, %v470_v44  ;;  %v286_v3 = vsel %vm222_vm0, 1, %v5813_v37 }
 0x277   :  { %v479_v22 = vadd.s32 %v478_v35, %v477_v57  ;;  %v486_v41 = vadd.s32 %v485_v56, %v484_v43  ;;  %v287_v63 = vsel %vm223_vm1, 1, %v5813_v37  ;;  %v288_v19 = vsel %vm224_vm3, 1, %v5813_v37  ;;  %v3813_v35 = vld [vmem:[#allocation3 + $0x20] ss:$8 sps:$4 sm:$0xff]  }
 0x278   :  { %v289_v7 = vsel %vm225_vm4, 1, %v5813_v37  ;;  %v466_v20 = vrot.slane %v465_v13, 2  ;;  %v473_v18 = vrot.slane %v472_v2, 2  ;;  %v687_v50 = vsel %vm294_vm2, %v286_v3, 0  ;;  %v3814_v56 = vld [vmem:[#allocation3 + $0x120] ss:$8 sps:$4 sm:$0xff]   ;;  %3583 = vmatpush1.bf16.msra.mxu1 %v3813_v35 }
 0x279   :  { %v480_v27 = vrot.slane %v479_v22, 2  ;;  %v487_v58 = vrot.slane %v486_v41, 2  ;;  %v694_v9 = vsel %vm294_vm2, %v287_v63, 0  ;;  %v701_v55 = vsel %vm294_vm2, %v288_v19, 0  ;;  %3626 = vmatpush1.bf16.msra.mxu0 %v3814_v56 }
 0x27a   :  { %v708_v44 = vsel %vm294_vm2, %v289_v7, 0  ;;  %v467_v57 = vadd.s32 %v466_v20, %v465_v13  ;;  %v474_v43 = vadd.s32 %v473_v18, %v472_v2  ;;  %v688_v1 = vrot.slane %v687_v50, 4  ;;  %v3817_v7 = vld [vmem:[#allocation3 + $0x134] ss:$8 sps:$4 sm:$0xff]  }
 0x27b   :  { %v481_v4 = vadd.s32 %v480_v27, %v479_v22  ;;  %v488_v0 = vadd.s32 %v487_v58, %v486_v41  ;;  %v695_v60 = vrot.slane %v694_v9, 4  ;;  %v702_v61 = vrot.slane %v701_v55, 4  ;;  %v770_v58 = vpop.permute.xlu0 %769  ;;  %v3815_v41 = vld [vmem:[#allocation3 + $0x34] ss:$8 sps:$4 sm:$0xff]   ;;  %3627 = vmatprep.subr.bf16.mxu0 %v3817_v7 }
 0x27c   :  { %v709_v25 = vrot.slane %v708_v44, 4  ;;  %v468_v11 = vrot.slane %v467_v57, 1  ;;  %v689_v19 = vadd.s32 %v688_v1, %v687_v50  ;;  %v475_v18 = vrot.slane %v474_v43, 1  ;;  %3584 = vmatprep.subr.bf16.mxu1 %v3815_v41 }
 0x27d   :  { %v696_v13 = vadd.s32 %v695_v60, %v694_v9  ;;  %v703_v2 = vadd.s32 %v702_v61, %v701_v55  ;;  %v482_v27 = vrot.slane %v481_v4, 1  ;;  %v489_v47 = vrot.slane %v488_v0, 1 }
 0x27e   :  { %v710_v22 = vadd.s32 %v709_v25, %v708_v44  ;;  %v4922_v20 = vadd.s32 %v468_v11, %v467_v57  ;;  %v690_v54 = vrot.slane %v689_v19, 2  ;;  %vm831_vm5 = vcmp.eq.s32.totalorder %v770_v58, %v3998_v5 }
 0x27f   :  { %v697_v29 = vrot.slane %v696_v13, 2  ;;  %v704_v3 = vrot.slane %v703_v2, 2  ;;  %vm832_vm6 = vcmp.eq.s32.totalorder %v770_v58, %v4034_v38  ;;  %vm833_vm7 = vcmp.eq.s32.totalorder %v770_v58, %v4037_v39 }
 0x280   :  { %v711_v16 = vrot.slane %v710_v22, 2  ;;  %vm834_vm8 = vcmp.eq.s32.totalorder %v770_v58, %v4040_v40  ;;  %v691_v60 = vadd.s32 %v690_v54, %v689_v19  ;;  %v895_v1 = vsel %vm831_vm5, 1, %v5813_v37  ;;  %v802_v19 = vpop.permute.xlu1 %801 }
 0x281   :  { %v698_v11 = vadd.s32 %v697_v29, %v696_v13  ;;  %v705_v50 = vadd.s32 %v704_v3, %v703_v2  ;;  %v896_v61 = vsel %vm832_vm6, 1, %v5813_v37  ;;  %v897_v9 = vsel %vm833_vm7, 1, %v5813_v37 }
 0x282   :  { %v712_v25 = vadd.s32 %v711_v16, %v710_v22  ;;  %v898_v55 = vsel %vm834_vm8, 1, %v5813_v37  ;;  %v4932_v44 = vadd.s32 %v475_v18, %v474_v43  ;;  %v4934_v57 = vadd.s32 %v482_v27, %v481_v4 }
 0x283   :  { %v4936_v35 = vadd.s32 %v489_v47, %v488_v0  ;;  %v692_v56 = vrot.slane %v691_v60, 1  ;;  %v1103_v54 = vsel %vm294_vm2, %v895_v1, 0  ;;  %v1110_v29 = vsel %vm294_vm2, %v896_v61, 0 }
 0x284   :  { %v1117_v16 = vsel %vm294_vm2, %v897_v9, 0  ;;  %v1124_v3 = vsel %vm294_vm2, %v898_v55, 0  ;;  %v699_v2 = vrot.slane %v698_v11, 1  ;;  %v706_v22 = vrot.slane %v705_v50, 1 }
 0x285   :  { %5885 = vst [vmem:[#allocation45_spill] sm:$0xff] %v4936_v35  ;;  %v4942_v13 = vadd.s32 %v692_v56, %v691_v60  ;;  %v713_v43 = vrot.slane %v712_v25, 1  ;;  %v1104_v58 = vrot.slane %v1103_v54, 4  ;;  %v1111_v4 = vrot.slane %v1110_v29, 4 }
 0x286   :  { %v1118_v41 = vrot.slane %v1117_v16, 4  ;;  %v1125_v47 = vrot.slane %v1124_v3, 4  ;;  %vm863_vm9 = vcmp.eq.s32.totalorder %v802_v19, %v3998_v5  ;;  %vm864_vm10 = vcmp.eq.s32.totalorder %v802_v19, %v4034_v38 }
 0x287   :  { %vm865_vm11 = vcmp.eq.s32.totalorder %v802_v19, %v4037_v39  ;;  %vm866_vm12 = vcmp.eq.s32.totalorder %v802_v19, %v4040_v40  ;;  %v1105_v0 = vadd.s32 %v1104_v58, %v1103_v54  ;;  %v1112_v7 = vadd.s32 %v1111_v4, %v1110_v29 }
 0x288   :  { %v1119_v18 = vadd.s32 %v1118_v41, %v1117_v16  ;;  %v1126_v27 = vadd.s32 %v1125_v47, %v1124_v3  ;;  %v927_v60 = vsel %vm863_vm9, 1, %v5813_v37  ;;  %v928_v1 = vsel %vm864_vm10, 1, %v5813_v37 }
 0x289   :  { %v929_v61 = vsel %vm865_vm11, 1, %v5813_v37  ;;  %v930_v9 = vsel %vm866_vm12, 1, %v5813_v37  ;;  %v1106_v55 = vrot.slane %v1105_v0, 2  ;;  %v1113_v56 = vrot.slane %v1112_v7, 2 }
 0x28a   :  { %v1120_v63 = vrot.slane %v1119_v18, 2  ;;  %v1127_v31 = vrot.slane %v1126_v27, 2  ;;  %v1327_v62 = vsel %vm294_vm2, %v927_v60, 0  ;;  %v1334_v19 = vsel %vm294_vm2, %v928_v1, 0 }
 0x28b   :  { %v1341_v54 = vsel %vm294_vm2, %v929_v61, 0  ;;  %v1348_v29 = vsel %vm294_vm2, %v930_v9, 0  ;;  %v1107_v16 = vadd.s32 %v1106_v55, %v1105_v0  ;;  %v1114_v3 = vadd.s32 %v1113_v56, %v1112_v7  ;;  %v1466_v61 = vpop.permute.xlu0 %1465 }
 0x28c   :  { %v1121_v58 = vadd.s32 %v1120_v63, %v1119_v18  ;;  %v1128_v4 = vadd.s32 %v1127_v31, %v1126_v27  ;;  %v1328_v41 = vrot.slane %v1327_v62, 4  ;;  %v1335_v47 = vrot.slane %v1334_v19, 4 }
 0x28d   :  { %v1342_v49 = vrot.slane %v1341_v54, 4  ;;  %v1349_v51 = vrot.slane %v1348_v29, 4  ;;  %v4956_v12 = vadd.s32 %v699_v2, %v698_v11  ;;  %v1108_v33 = vrot.slane %v1107_v16, 1 }
 0x28e   :  { %v1115_v14 = vrot.slane %v1114_v3, 1  ;;  %v1122_v8 = vrot.slane %v1121_v58, 1  ;;  %v1329_v60 = vadd.s32 %v1328_v41, %v1327_v62  ;;  %v1336_v42 = vadd.s32 %v1335_v47, %v1334_v19  ;;  %v3821_v19 = vld [vmem:[#allocation3 + $0x44] ss:$8 sps:$4 sm:$0xff]   ;;  %v1498_v47 = vpop.permute.xlu1 %1497 }
 0x28f   :  { %5886 = vst [vmem:[#allocation46_spill] sm:$0xff] %v4956_v12  ;;  %v1343_v1 = vadd.s32 %v1342_v49, %v1341_v54  ;;  %v1350_v35 = vadd.s32 %v1349_v51, %v1348_v29  ;;  %v4958_v17 = vadd.s32 %v706_v22, %v705_v50  ;;  %v4960_v0 = vadd.s32 %v713_v43, %v712_v25  ;;  %v3819_v49 = vld [vmem:[#allocation3 + $0x30] ss:$8 sps:$4 sm:$0xff]   ;;  %v3845_v12 = vld [vmem:[#allocation3 + $0x84] ss:$8 sps:$4 sm:$0xff]  }
 0x290   :  { %v1109_v63 = vadd.s32 %v1108_v33, %v1107_v16  ;;  %v1129_v31 = vrot.slane %v1128_v4, 1  ;;  %v1330_v7 = vrot.slane %v1329_v60, 2  ;;  %v1337_v18 = vrot.slane %v1336_v42, 2  ;;  %v3820_v51 = vld [vmem:[#allocation3 + $0x130] ss:$8 sps:$4 sm:$0xff]   ;;  %3585 = vmatpush1.bf16.msra.mxu1 %v3819_v49 }
 0x291   :  { %5887 = vst [vmem:[#allocation47_spill] sm:$0xff] %v4960_v0  ;;  %v1344_v27 = vrot.slane %v1343_v1, 2  ;;  %v1351_v9 = vrot.slane %v1350_v35, 2  ;;  %v4962_v11 = vadd.s32 %v1115_v14, %v1114_v3  ;;  %v1123_v2 = vadd.s32 %v1122_v8, %v1121_v58  ;;  %3628 = vmatpush1.bf16.msra.mxu0 %v3820_v51  ;;  %v3823_v16 = vld [vmem:[#allocation3 + $0x144] ss:$8 sps:$4 sm:$0xff]   ;;  %3586 = vmatprep.subr.bf16.mxu1 %v3821_v19 }
 0x292   :  { %vm1527_vm13 = vcmp.eq.s32.totalorder %v1466_v61, %v3998_v5  ;;  %vm1528_vm14 = vcmp.eq.s32.totalorder %v1466_v61, %v4034_v38  ;;  %v1331_v62 = vadd.s32 %v1330_v7, %v1329_v60  ;;  %v1338_v50 = vadd.s32 %v1337_v18, %v1336_v42  ;;  %3629 = vmatprep.subr.bf16.mxu0 %v3823_v16 }
 0x293   :  { %5888 = vst [vmem:[#allocation48_spill] sm:$0xff] %v4962_v11  ;;  %v1345_v22 = vadd.s32 %v1344_v27, %v1343_v1  ;;  %v4966_v25 = vadd.s32 %v1351_v9, %v1350_v35  ;;  %vm1529_vm15 = vcmp.eq.s32.totalorder %v1466_v61, %v4037_v39  ;;  %vm1530_vm0 = vcmp.eq.s32.totalorder %v1466_v61, %v4040_v40 }
 0x294   :  { %v1591_v33 = vsel %vm1527_vm13, 1, %v5813_v37  ;;  %v1592_v14 = vsel %vm1528_vm14, 1, %v5813_v37  ;;  %v4972_v8 = vadd.s32 %v1129_v31, %v1128_v4  ;;  %v1332_v43 = vrot.slane %v1331_v62, 1 }
 0x295   :  { %v1339_v55 = vrot.slane %v1338_v50, 1  ;;  %v1346_v56 = vrot.slane %v1345_v22, 1  ;;  %v1593_v42 = vsel %vm1529_vm15, 1, %v5813_v37  ;;  %v1594_v35 = vsel %vm1530_vm0, 1, %v5813_v37 }
 0x296   :  { %5889 = vst [vmem:[#allocation49_spill] sm:$0xff] %v4972_v8  ;;  %v1751_v54 = vsel %vm294_vm2, %v1591_v33, 0  ;;  %v1758_v29 = vsel %vm294_vm2, %v1592_v14, 0  ;;  %v4979_v3 = vadd.s32 %v1109_v63, %v4922_v20  ;;  %v4982_v58 = vadd.s32 %v1123_v2, %v4934_v57 }
 0x297   :  { %v1333_v4 = vadd.s32 %v1332_v43, %v1331_v62  ;;  %v1353_v41 = vrot.slane %v4966_v25, 1  ;;  %v1752_v60 = vrot.slane %v1751_v54, 4  ;;  %v1759_v1 = vrot.slane %v1758_v29, 4 }
 0x298   :  { %v1765_v61 = vsel %vm294_vm2, %v1593_v42, 0  ;;  %v1772_v31 = vsel %vm294_vm2, %v1594_v35, 0  ;;  %v4987_v7 = vadd.s32 %v1339_v55, %v1338_v50  ;;  %v1347_v18 = vadd.s32 %v1346_v56, %v1345_v22 }
 0x299   :  { %v1766_v20 = vrot.slane %v1765_v61, 4  ;;  %v1773_v63 = vrot.slane %v1772_v31, 4  ;;  %v1753_v27 = vadd.s32 %v1752_v60, %v1751_v54  ;;  %v1760_v57 = vadd.s32 %v1759_v1, %v1758_v29 }
 0x29a   :  { %5890 = vst [vmem:[#allocation50_spill] sm:$0xff] %v4987_v7  ;;  %vm1559_vm1 = vcmp.eq.s32.totalorder %v1498_v47, %v3998_v5  ;;  %vm1560_vm3 = vcmp.eq.s32.totalorder %v1498_v47, %v4034_v38  ;;  %vm1561_vm4 = vcmp.eq.s32.totalorder %v1498_v47, %v4037_v39  ;;  %vm1562_vm5 = vcmp.eq.s32.totalorder %v1498_v47, %v4040_v40 }
 0x29b   :  { %v1767_v9 = vadd.s32 %v1766_v20, %v1765_v61  ;;  %v1774_v2 = vadd.s32 %v1773_v63, %v1772_v31  ;;  %v1754_v49 = vrot.slane %v1753_v27, 2  ;;  %v1761_v51 = vrot.slane %v1760_v57, 2 }
 0x29c   :  { %v1623_v62 = vsel %vm1559_vm1, 1, %v5813_v37  ;;  %v1624_v50 = vsel %vm1560_vm3, 1, %v5813_v37  ;;  %v1625_v14 = vsel %vm1561_vm4, 1, %v5813_v37  ;;  %v1626_v43 = vsel %vm1562_vm5, 1, %v5813_v37 }
 0x29d   :  { %v1768_v22 = vrot.slane %v1767_v9, 2  ;;  %v1775_v33 = vrot.slane %v1774_v2, 2  ;;  %v1755_v55 = vadd.s32 %v1754_v49, %v1753_v27  ;;  %v1762_v56 = vadd.s32 %v1761_v51, %v1760_v57 }
 0x29e   :  { %v1975_v19 = vsel %vm294_vm2, %v1623_v62, 0  ;;  %v1982_v42 = vsel %vm294_vm2, %v1624_v50, 0  ;;  %v1989_v1 = vsel %vm294_vm2, %v1625_v14, 0  ;;  %v1996_v61 = vsel %vm294_vm2, %v1626_v43, 0 }
 0x29f   :  { %v1769_v35 = vadd.s32 %v1768_v22, %v1767_v9  ;;  %v1776_v54 = vadd.s32 %v1775_v33, %v1774_v2  ;;  %v1976_v29 = vrot.slane %v1975_v19, 4  ;;  %v1983_v16 = vrot.slane %v1982_v42, 4  ;;  %v2162_v22 = vpop.permute.xlu0 %2161 }
 0x2a0   :  { %v1756_v47 = vrot.slane %v1755_v55, 1  ;;  %v1763_v60 = vrot.slane %v1762_v56, 1  ;;  %v5002_v27 = vadd.s32 %v1353_v41, %v4966_v25  ;;  %v1990_v49 = vrot.slane %v1989_v1, 4 }
 0x2a1   :  { %v1770_v31 = vrot.slane %v1769_v35, 1  ;;  %v1777_v20 = vrot.slane %v1776_v54, 1  ;;  %v1977_v63 = vadd.s32 %v1976_v29, %v1975_v19  ;;  %v1984_v0 = vadd.s32 %v1983_v16, %v1982_v42  ;;  %v5892_v29 = vld [vmem:[#allocation26_spill] sm:$0xff] }
 0x2a2   :  { %5891 = vst [vmem:[#allocation51_spill] sm:$0xff] %v5002_v27  ;;  %v1757_v57 = vadd.s32 %v1756_v47, %v1755_v55  ;;  %v1997_v51 = vrot.slane %v1996_v61, 4  ;;  %v5005_v9 = vadd.s32 %v1333_v4, %v4942_v13  ;;  %v5008_v2 = vadd.s32 %v1347_v18, %v4958_v17  ;;  %v3825_v17 = vld [vmem:[#allocation3 + $0x40] ss:$8 sps:$4 sm:$0xff]  }
 0x2a3   :  { %v1978_v62 = vrot.slane %v1977_v63, 2  ;;  %v1985_v50 = vrot.slane %v1984_v0, 2  ;;  %v1764_v33 = vadd.s32 %v1763_v60, %v1762_v56  ;;  %v1771_v14 = vadd.s32 %v1770_v31, %v1769_v35  ;;  %v3826_v13 = vld [vmem:[#allocation3 + $0x140] ss:$8 sps:$4 sm:$0xff]   ;;  %3587 = vmatpush1.bf16.msra.mxu1 %v3825_v17  ;;  %v5893_v60 = vld [vmem:[#allocation27_spill] sm:$0xff] }
 0x2a4   :  { %v1991_v43 = vadd.s32 %v1990_v49, %v1989_v1  ;;  %v1998_v19 = vadd.s32 %v1997_v51, %v1996_v61  ;;  %v1778_v42 = vadd.s32 %v1777_v20, %v1776_v54  ;;  %v5011_v25 = vadd.s32 %v1757_v57, %v5892_v29  ;;  %3630 = vmatpush1.bf16.msra.mxu0 %v3826_v13  ;;  %v3829_v57 = vld [vmem:[#allocation3 + $0x154] ss:$8 sps:$4 sm:$0xff]   ;;  %v5898_v17 = vld [vmem:[#allocation30_spill] sm:$0xff] }
 0x2a5   :  { %v1979_v41 = vadd.s32 %v1978_v62, %v1977_v63  ;;  %v1986_v55 = vadd.s32 %v1985_v50, %v1984_v0  ;;  %vm2223_vm6 = vcmp.eq.s32.totalorder %v2162_v22, %v3998_v5  ;;  %vm2224_vm7 = vcmp.eq.s32.totalorder %v2162_v22, %v4034_v38  ;;  %v3827_v63 = vld [vmem:[#allocation3 + $0x54] ss:$8 sps:$4 sm:$0xff]   ;;  %3631 = vmatprep.subr.bf16.mxu0 %v3829_v57 }
 0x2a6   :  { %v1992_v16 = vrot.slane %v1991_v43, 2  ;;  %v1999_v47 = vrot.slane %v1998_v19, 2  ;;  %vm2225_vm8 = vcmp.eq.s32.totalorder %v2162_v22, %v4037_v39  ;;  %vm2226_vm9 = vcmp.eq.s32.totalorder %v2162_v22, %v4040_v40  ;;  %v5895_v22 = vld [vmem:[#allocation28_spill] sm:$0xff]  ;;  %3588 = vmatprep.subr.bf16.mxu1 %v3827_v63 }
 0x2a7   :  { %v1980_v4 = vrot.slane %v1979_v41, 1  ;;  %v1987_v18 = vrot.slane %v1986_v55, 1  ;;  %v2287_v54 = vsel %vm2223_vm6, 1, %v5813_v37  ;;  %v2288_v0 = vsel %vm2224_vm7, 1, %v5813_v37 }
 0x2a8   :  { %v1993_v56 = vadd.s32 %v1992_v16, %v1991_v43  ;;  %v2000_v35 = vadd.s32 %v1999_v47, %v1998_v19  ;;  %v5020_v1 = vadd.s32 %v1764_v33, %v5893_v60  ;;  %v2289_v31 = vsel %vm2225_vm8, 1, %v5813_v37  ;;  %v5896_v19 = vld [vmem:[#allocation29_spill] sm:$0xff]  ;;  %v2194_v16 = vpop.permute.xlu1 %2193 }
 0x2a9   :  { %v1981_v61 = vadd.s32 %v1980_v4, %v1979_v41  ;;  %v2290_v20 = vsel %vm2226_vm9, 1, %v5813_v37  ;;  %v2399_v62 = vsel %vm294_vm2, %v2287_v54, 0  ;;  %v2406_v50 = vsel %vm294_vm2, %v2288_v0, 0 }
 0x2aa   :  { %5894 = vst [vmem:[#allocation26_spill] sm:$0xff] %v5020_v1  ;;  %v1994_v49 = vrot.slane %v1993_v56, 1  ;;  %v2001_v51 = vrot.slane %v2000_v35, 1  ;;  %v5027_v43 = vadd.s32 %v1771_v14, %v5895_v22  ;;  %v5030_v29 = vadd.s32 %v1778_v42, %v5896_v19 }
 0x2ab   :  { %v2400_v33 = vrot.slane %v2399_v62, 4  ;;  %v2407_v41 = vrot.slane %v2406_v50, 4  ;;  %v1988_v47 = vadd.s32 %v1987_v18, %v1986_v55  ;;  %v5033_v13 = vadd.s32 %v1981_v61, %v5898_v17 }
 0x2ac   :  { %5897 = vst [vmem:[#allocation27_spill] sm:$0xff] %v5030_v29  ;;  %v2413_v4 = vsel %vm294_vm2, %v2289_v31, 0  ;;  %v2420_v54 = vsel %vm294_vm2, %v2290_v20, 0  ;;  %v1995_v27 = vadd.s32 %v1994_v49, %v1993_v56  ;;  %v5037_v42 = vadd.s32 %v2001_v51, %v2000_v35 }
 0x2ad   :  { %v2401_v0 = vadd.s32 %v2400_v33, %v2399_v62  ;;  %v2408_v60 = vadd.s32 %v2407_v41, %v2406_v50  ;;  %v2414_v14 = vrot.slane %v2413_v4, 4  ;;  %v2421_v22 = vrot.slane %v2420_v54, 4 }
 0x2ae   :  { %vm2255_vm10 = vcmp.eq.s32.totalorder %v2194_v16, %v3998_v5  ;;  %vm2256_vm11 = vcmp.eq.s32.totalorder %v2194_v16, %v4034_v38  ;;  %vm2257_vm12 = vcmp.eq.s32.totalorder %v2194_v16, %v4037_v39  ;;  %vm2258_vm13 = vcmp.eq.s32.totalorder %v2194_v16, %v4040_v40 }
 0x2af   :  { %v2402_v63 = vrot.slane %v2401_v0, 2  ;;  %v2409_v55 = vrot.slane %v2408_v60, 2  ;;  %v2415_v18 = vadd.s32 %v2414_v14, %v2413_v4  ;;  %v2422_v61 = vadd.s32 %v2421_v22, %v2420_v54 }
 0x2b0   :  { %v2319_v31 = vsel %vm2255_vm10, 1, %v5813_v37  ;;  %v2320_v20 = vsel %vm2256_vm11, 1, %v5813_v37  ;;  %v2321_v51 = vsel %vm2257_vm12, 1, %v5813_v37  ;;  %v2322_v62 = vsel %vm2258_vm13, 1, %v5813_v37 }
 0x2b1   :  { %v2403_v57 = vadd.s32 %v2402_v63, %v2401_v0  ;;  %v2410_v56 = vadd.s32 %v2409_v55, %v2408_v60  ;;  %v2416_v35 = vrot.slane %v2415_v18, 2  ;;  %v2423_v49 = vrot.slane %v2422_v61, 2 }
 0x2b2   :  { %v2623_v50 = vsel %vm294_vm2, %v2319_v31, 0  ;;  %v2630_v19 = vsel %vm294_vm2, %v2320_v20, 0  ;;  %v2637_v14 = vsel %vm294_vm2, %v2321_v51, 0  ;;  %v2644_v0 = vsel %vm294_vm2, %v2322_v62, 0 }
 0x2b3   :  { %v2404_v33 = vrot.slane %v2403_v57, 1  ;;  %v2411_v41 = vrot.slane %v2410_v56, 1  ;;  %v2417_v17 = vadd.s32 %v2416_v35, %v2415_v18  ;;  %v2424_v16 = vadd.s32 %v2423_v49, %v2422_v61  ;;  %v5900_v18 = vld [vmem:[#allocation11_spill] sm:$0xff] }
 0x2b4   :  { %v2624_v4 = vrot.slane %v2623_v50, 4  ;;  %v2631_v54 = vrot.slane %v2630_v19, 4  ;;  %v2638_v21 = vrot.slane %v2637_v14, 4  ;;  %v2645_v31 = vrot.slane %v2644_v0, 4 }
 0x2b5   :  { %v2405_v60 = vadd.s32 %v2404_v33, %v2403_v57  ;;  %v2412_v22 = vadd.s32 %v2411_v41, %v2410_v56  ;;  %v2418_v63 = vrot.slane %v2417_v17, 1  ;;  %v2425_v55 = vrot.slane %v2424_v16, 1  ;;  %v5902_v57 = vld [vmem:[#allocation13_spill] sm:$0xff] }
 0x2b6   :  { %v2625_v29 = vadd.s32 %v2624_v4, %v2623_v50  ;;  %v2632_v8 = vadd.s32 %v2631_v54, %v2630_v19  ;;  %v2639_v28 = vadd.s32 %v2638_v21, %v2637_v14  ;;  %v2646_v51 = vadd.s32 %v2645_v31, %v2644_v0 }
 0x2b7   :  { %v2419_v6 = vadd.s32 %v2418_v63, %v2417_v17  ;;  %v2426_v20 = vadd.s32 %v2425_v55, %v2424_v16  ;;  %v2799_v1 = vadd.s32 %v2405_v60, %v5899_v45  ;;  %v2800_v61 = vadd.s32 %v2412_v22, %v5900_v18  ;;  %v3831_v17 = vld [vmem:[#allocation3 + $0x50] ss:$8 sps:$4 sm:$0xff]   ;;  %v3835_v18 = vld [vmem:[#allocation3 + $0x164] ss:$8 sps:$4 sm:$0xff]  }
 0x2b8   :  { %v2626_v35 = vrot.slane %v2625_v29, 2  ;;  %v2633_v49 = vrot.slane %v2632_v8, 2  ;;  %v2640_v4 = vrot.slane %v2639_v28, 2  ;;  %v2647_v54 = vrot.slane %v2646_v51, 2  ;;  %v3832_v16 = vld [vmem:[#allocation3 + $0x150] ss:$8 sps:$4 sm:$0xff]   ;;  %3589 = vmatpush1.bf16.msra.mxu1 %v3831_v17 }
 0x2b9   :  { %v2801_v62 = vadd.s32 %v2419_v6, %v5901_v36  ;;  %v2802_v56 = vadd.s32 %v2426_v20, %v5902_v57  ;;  %v2875_v33 = vcvt.s32.f32 %v2799_v1  ;;  %v2876_v41 = vcvt.s32.f32 %v2800_v61  ;;  %v5903_v63 = vld [vmem:[#allocation31_spill] sm:$0xff]  ;;  %v5905_v60 = vld [vmem:[#allocation32_spill] sm:$0xff]  ;;  %v109_v1 = vpop.permute.xlu0 %108  ;;  %3632 = vmatpush1.bf16.msra.mxu0 %v3832_v16  ;;  %v5915_v16 = vld [vmem:[#allocation17_spill] sm:$0xff] }
 0x2ba   :  { %v2627_v50 = vadd.s32 %v2626_v35, %v2625_v29  ;;  %v2634_v19 = vadd.s32 %v2633_v49, %v2632_v8  ;;  %v5056_v45 = vadd.s32 %v1988_v47, %v5903_v63  ;;  %v5059_v22 = vadd.s32 %v1995_v27, %v5905_v60  ;;  %v5906_v8 = vld [vmem:[#allocation33_spill] sm:$0xff]  ;;  %3633 = vmatprep.subr.bf16.mxu0 %v3835_v18 }
 0x2bb   :  { %v2877_v21 = vcvt.s32.f32 %v2801_v62  ;;  %v2878_v14 = vcvt.s32.f32 %v2802_v56  ;;  %v2641_v6 = vadd.s32 %v2640_v4, %v2639_v28  ;;  %v2648_v55 = vadd.s32 %v2647_v54, %v2646_v51  ;;  %v3833_v27 = vld [vmem:[#allocation3 + $0x64] ss:$8 sps:$4 sm:$0xff]   ;;  %v5914_v54 = vld [vmem:[#allocation16_spill] sm:$0xff] }
 0x2bc   :  { %5904 = vst [vmem:[#allocation28_spill] sm:$0xff] %v5056_v45  ;;  %v2628_v0 = vrot.slane %v2627_v50, 1  ;;  %v2635_v36 = vrot.slane %v2634_v19, 1  ;;  %v5063_v29 = vadd.s32 %v5037_v42, %v5906_v8  ;;  %v5065_v31 = vpack.c.bf16 %v2875_v33, %v2875_v33  ;;  %3590 = vmatprep.subr.bf16.mxu1 %v3833_v27  ;;  %v5912_v56 = vld [vmem:[#allocation14_spill] sm:$0xff] }
 0x2bd   :  { %v5067_v47 = vpack.c.bf16 %v2876_v41, %v2876_v41  ;;  %v5069_v20 = vpack.c.bf16 %v2877_v21, %v2877_v21  ;;  %v2642_v49 = vrot.slane %v2641_v6, 1  ;;  %v2649_v28 = vrot.slane %v2648_v55, 1  ;;  %v5913_v41 = vld [vmem:[#allocation15_spill] sm:$0xff]  ;;  %v774_v51 = vpop.permute.xlu0 %773 }
 0x2be   :  { %5907 = vst [vmem:[#allocation29_spill] sm:$0xff] %v5063_v29  ;;  %5908 = vst [vmem:[#allocation30_spill] sm:$0xff] %v5065_v31  ;;  %v2629_v61 = vadd.s32 %v2628_v0, %v2627_v50  ;;  %v2636_v35 = vadd.s32 %v2635_v36, %v2634_v19  ;;  %v5072_v62 = vpack.c.bf16 %v2878_v14, %v2878_v14 }
 0x2bf   :  { %5909 = vst [vmem:[#allocation10_spill] sm:$0xff] %v5067_v47  ;;  %5910 = vst [vmem:[#allocation11_spill] sm:$0xff] %v5069_v20  ;;  %vm194_vm14 = vcmp.eq.s32.totalorder %v109_v1, %v3998_v5  ;;  %vm195_vm15 = vcmp.eq.s32.totalorder %v109_v1, %v4034_v38  ;;  %v2643_v42 = vadd.s32 %v2642_v49, %v2641_v6 }
 0x2c0   :  { %5911 = vst [vmem:[#allocation12_spill] sm:$0xff] %v5072_v62  ;;  %v2650_v57 = vadd.s32 %v2649_v28, %v2648_v55  ;;  %v2831_v33 = vadd.s32 %v2629_v61, %v5912_v56  ;;  %v2832_v4 = vadd.s32 %v2636_v35, %v5913_v41  ;;  %vm196_vm0 = vcmp.eq.s32.totalorder %v109_v1, %v4037_v39  ;;  %v165_v28 = vpop.permute.xlu1 %164 }
 0x2c1   :  { %vm197_vm1 = vcmp.eq.s32.totalorder %v109_v1, %v4040_v40  ;;  %v258_v50 = vsel %vm194_vm14, 1, %v5813_v37  ;;  %v259_v19 = vsel %vm195_vm15, 1, %v5813_v37  ;;  %v2833_v17 = vadd.s32 %v2643_v42, %v5914_v54  ;;  %v3839_v1 = vld [vmem:[#allocation3 + $0x74] ss:$8 sps:$4 sm:$0xff]  }
 0x2c2   :  { %v2834_v63 = vadd.s32 %v2650_v57, %v5915_v16  ;;  %v2907_v60 = vcvt.s32.f32 %v2831_v33  ;;  %v2908_v21 = vcvt.s32.f32 %v2832_v4  ;;  %v260_v14 = vsel %vm196_vm0, 1, %v5813_v37 }
 0x2c3   :  { %v261_v0 = vsel %vm197_vm1, 1, %v5813_v37  ;;  %v491_v36 = vsel %vm294_vm2, %v258_v50, 0  ;;  %v498_v6 = vsel %vm294_vm2, %v259_v19, 0  ;;  %v2909_v8 = vcvt.s32.f32 %v2833_v17 }
 0x2c4   :  { %v2910_v27 = vcvt.s32.f32 %v2834_v63  ;;  %v492_v18 = vrot.slane %v491_v36, 4  ;;  %v499_v61 = vrot.slane %v498_v6, 4  ;;  %v505_v35 = vsel %vm294_vm2, %v260_v14, 0 }
 0x2c5   :  { %v512_v49 = vsel %vm294_vm2, %v261_v0, 0  ;;  %v5094_v56 = vpack.c.bf16 %v2907_v60, %v2907_v60  ;;  %v5096_v33 = vpack.c.bf16 %v2908_v21, %v2908_v21  ;;  %v506_v50 = vrot.slane %v505_v35, 4 }
 0x2c6   :  { %v493_v41 = vadd.s32 %v492_v18, %v491_v36  ;;  %v500_v4 = vadd.s32 %v499_v61, %v498_v6  ;;  %v513_v19 = vrot.slane %v512_v49, 4  ;;  %v5098_v54 = vpack.c.bf16 %v2909_v8, %v2909_v8  ;;  %v3837_v18 = vld [vmem:[#allocation3 + $0x60] ss:$8 sps:$4 sm:$0xff]  }
 0x2c7   :  { %5916 = vst [vmem:[#allocation13_spill] sm:$0xff] %v5094_v56  ;;  %5917 = vst [vmem:[#allocation31_spill] sm:$0xff] %v5096_v33  ;;  %v5100_v17 = vpack.c.bf16 %v2910_v27, %v2910_v27  ;;  %vm226_vm3 = vcmp.eq.s32.totalorder %v165_v28, %v3998_v5  ;;  %vm227_vm4 = vcmp.eq.s32.totalorder %v165_v28, %v4034_v38  ;;  %v3838_v61 = vld [vmem:[#allocation3 + $0x160] ss:$8 sps:$4 sm:$0xff]   ;;  %3591 = vmatpush1.bf16.msra.mxu1 %v3837_v18  ;;  %v3841_v56 = vld [vmem:[#allocation3 + $0x174] ss:$8 sps:$4 sm:$0xff]  }
 0x2c8   :  { %5918 = vst [vmem:[#allocation32_spill] sm:$0xff] %v5098_v54  ;;  %v494_v16 = vrot.slane %v493_v41, 2  ;;  %v501_v63 = vrot.slane %v500_v4, 2  ;;  %v507_v14 = vadd.s32 %v506_v50, %v505_v35  ;;  %v514_v0 = vadd.s32 %v513_v19, %v512_v49  ;;  %3634 = vmatpush1.bf16.msra.mxu0 %v3838_v61  ;;  %3592 = vmatprep.subr.bf16.mxu1 %v3839_v1 }
 0x2c9   :  { %vm228_vm5 = vcmp.eq.s32.totalorder %v165_v28, %v4037_v39  ;;  %vm229_vm6 = vcmp.eq.s32.totalorder %v165_v28, %v4040_v40  ;;  %v290_v60 = vsel %vm226_vm3, 1, %v5813_v37  ;;  %v291_v21 = vsel %vm227_vm4, 1, %v5813_v37  ;;  %3635 = vmatprep.subr.bf16.mxu0 %v3841_v56 }
 0x2ca   :  { %v495_v36 = vadd.s32 %v494_v16, %v493_v41  ;;  %v502_v6 = vadd.s32 %v501_v63, %v500_v4  ;;  %v508_v8 = vrot.slane %v507_v14, 2  ;;  %v515_v27 = vrot.slane %v514_v0, 2 }
 0x2cb   :  { %v292_v42 = vsel %vm228_vm5, 1, %v5813_v37  ;;  %v293_v55 = vsel %vm229_vm6, 1, %v5813_v37  ;;  %v715_v35 = vsel %vm294_vm2, %v290_v60, 0  ;;  %v722_v49 = vsel %vm294_vm2, %v291_v21, 0 }
 0x2cc   :  { %v496_v50 = vrot.slane %v495_v36, 1  ;;  %v509_v19 = vadd.s32 %v508_v8, %v507_v14  ;;  %v516_v57 = vadd.s32 %v515_v27, %v514_v0  ;;  %v716_v41 = vrot.slane %v715_v35, 4 }
 0x2cd   :  { %v723_v4 = vrot.slane %v722_v49, 4  ;;  %v729_v16 = vsel %vm294_vm2, %v292_v42, 0  ;;  %v736_v63 = vsel %vm294_vm2, %v293_v55, 0  ;;  %v503_v28 = vrot.slane %v502_v6, 1 }
 0x2ce   :  { %v5117_v21 = vadd.s32 %v496_v50, %v495_v36  ;;  %v717_v14 = vadd.s32 %v716_v41, %v715_v35  ;;  %v730_v8 = vrot.slane %v729_v16, 4  ;;  %v737_v27 = vrot.slane %v736_v63, 4 }
 0x2cf   :  { %v724_v0 = vadd.s32 %v723_v4, %v722_v49  ;;  %v510_v18 = vrot.slane %v509_v19, 1  ;;  %v517_v61 = vrot.slane %v516_v57, 1  ;;  %vm835_vm7 = vcmp.eq.s32.totalorder %v774_v51, %v3998_v5 }
 0x2d0   :  { %vm836_vm8 = vcmp.eq.s32.totalorder %v774_v51, %v4034_v38  ;;  %v718_v55 = vrot.slane %v717_v14, 2  ;;  %v731_v20 = vadd.s32 %v730_v8, %v729_v16  ;;  %v738_v60 = vadd.s32 %v737_v27, %v736_v63 }
 0x2d1   :  { %v725_v42 = vrot.slane %v724_v0, 2  ;;  %vm837_vm9 = vcmp.eq.s32.totalorder %v774_v51, %v4037_v39  ;;  %vm838_vm10 = vcmp.eq.s32.totalorder %v774_v51, %v4040_v40  ;;  %v899_v36 = vsel %vm835_vm7, 1, %v5813_v37 }
 0x2d2   :  { %v900_v35 = vsel %vm836_vm8, 1, %v5813_v37  ;;  %v719_v1 = vadd.s32 %v718_v55, %v717_v14  ;;  %v732_v50 = vrot.slane %v731_v20, 2  ;;  %v739_v41 = vrot.slane %v738_v60, 2  ;;  %v806_v55 = vpop.permute.xlu1 %805 }
 0x2d3   :  { %v726_v49 = vadd.s32 %v725_v42, %v724_v0  ;;  %v901_v4 = vsel %vm837_vm9, 1, %v5813_v37  ;;  %v902_v56 = vsel %vm838_vm10, 1, %v5813_v37  ;;  %v1131_v54 = vsel %vm294_vm2, %v899_v36, 0 }
 0x2d4   :  { %v1138_v16 = vsel %vm294_vm2, %v900_v35, 0  ;;  %v5129_v63 = vadd.s32 %v503_v28, %v502_v6  ;;  %v720_v8 = vrot.slane %v719_v1, 1  ;;  %v733_v51 = vadd.s32 %v732_v50, %v731_v20 }
 0x2d5   :  { %v740_v27 = vadd.s32 %v739_v41, %v738_v60  ;;  %v1132_v31 = vrot.slane %v1131_v54, 4  ;;  %v1139_v62 = vrot.slane %v1138_v16, 4  ;;  %v1145_v14 = vsel %vm294_vm2, %v901_v4, 0 }
 0x2d6   :  { %5919 = vst [vmem:[#allocation33_spill] sm:$0xff] %v5129_v63  ;;  %v1152_v0 = vsel %vm294_vm2, %v902_v56, 0  ;;  %v5133_v42 = vadd.s32 %v510_v18, %v509_v19  ;;  %v5135_v24 = vadd.s32 %v517_v61, %v516_v57  ;;  %v5137_v29 = vadd.s32 %v720_v8, %v719_v1  ;;  %v3843_v8 = vld [vmem:[#allocation3 + $0x70] ss:$8 sps:$4 sm:$0xff]  }
 0x2d7   :  { %v727_v36 = vrot.slane %v726_v49, 1  ;;  %v1133_v35 = vadd.s32 %v1132_v31, %v1131_v54  ;;  %v1140_v6 = vadd.s32 %v1139_v62, %v1138_v16  ;;  %v1146_v28 = vrot.slane %v1145_v14, 4  ;;  %3593 = vmatpush1.bf16.msra.mxu1 %v3843_v8 }
 0x2d8   :  { %5920 = vst [vmem:[#allocation14_spill] sm:$0xff] %v5135_v24  ;;  %v1153_v33 = vrot.slane %v1152_v0, 4  ;;  %v734_v20 = vrot.slane %v733_v51, 1  ;;  %v741_v60 = vrot.slane %v740_v27, 1  ;;  %vm867_vm11 = vcmp.eq.s32.totalorder %v806_v55, %v3998_v5  ;;  %v3844_v24 = vld [vmem:[#allocation3 + $0x170] ss:$8 sps:$4 sm:$0xff]   ;;  %3594 = vmatprep.subr.bf16.mxu1 %v3845_v12 }
 0x2d9   :  { %vm868_vm12 = vcmp.eq.s32.totalorder %v806_v55, %v4034_v38  ;;  %v1134_v50 = vrot.slane %v1133_v35, 2  ;;  %v1141_v41 = vrot.slane %v1140_v6, 2  ;;  %v1147_v4 = vadd.s32 %v1146_v28, %v1145_v14  ;;  %3636 = vmatpush1.bf16.msra.mxu0 %v3844_v24 }
 0x2da   :  { %v1154_v19 = vadd.s32 %v1153_v33, %v1152_v0  ;;  %vm869_vm13 = vcmp.eq.s32.totalorder %v806_v55, %v4037_v39  ;;  %vm870_vm14 = vcmp.eq.s32.totalorder %v806_v55, %v4040_v40  ;;  %v931_v57 = vsel %vm867_vm11, 1, %v5813_v37 }
 0x2db   :  { %v932_v31 = vsel %vm868_vm12, 1, %v5813_v37  ;;  %v1135_v62 = vadd.s32 %v1134_v50, %v1133_v35  ;;  %v1142_v54 = vadd.s32 %v1141_v41, %v1140_v6  ;;  %v1148_v18 = vrot.slane %v1147_v4, 2  ;;  %v1470_v50 = vpop.permute.xlu0 %1469 }
 0x2dc   :  { %v1155_v61 = vrot.slane %v1154_v19, 2  ;;  %v933_v1 = vsel %vm869_vm13, 1, %v5813_v37  ;;  %v934_v56 = vsel %vm870_vm14, 1, %v5813_v37  ;;  %v1355_v16 = vsel %vm294_vm2, %v931_v57, 0 }
 0x2dd   :  { %v1362_v33 = vsel %vm294_vm2, %v932_v31, 0  ;;  %v1136_v14 = vrot.slane %v1135_v62, 1  ;;  %v1143_v0 = vrot.slane %v1142_v54, 1  ;;  %v1149_v55 = vadd.s32 %v1148_v18, %v1147_v4  ;;  %v3847_v4 = vld [vmem:[#allocation3 + $0x184] ss:$8 sps:$4 sm:$0xff]  }
 0x2de   :  { %v1156_v28 = vadd.s32 %v1155_v61, %v1154_v19  ;;  %v1356_v47 = vrot.slane %v1355_v16, 4  ;;  %v1363_v45 = vrot.slane %v1362_v33, 4  ;;  %v1369_v35 = vsel %vm294_vm2, %v933_v1, 0  ;;  %3637 = vmatprep.subr.bf16.mxu0 %v3847_v4 }
 0x2df   :  { %v1376_v6 = vsel %vm294_vm2, %v934_v56, 0  ;;  %v5151_v41 = vadd.s32 %v727_v36, %v726_v49  ;;  %v5153_v7 = vadd.s32 %v734_v20, %v733_v51  ;;  %v5155_v57 = vadd.s32 %v741_v60, %v740_v27 }
 0x2e0   :  { %v1150_v31 = vrot.slane %v1149_v55, 1  ;;  %v1357_v19 = vadd.s32 %v1356_v47, %v1355_v16  ;;  %v1364_v18 = vadd.s32 %v1363_v45, %v1362_v33  ;;  %v1370_v61 = vrot.slane %v1369_v35, 4 }
 0x2e1   :  { %5921 = vst [vmem:[#allocation15_spill] sm:$0xff] %v5155_v57  ;;  %v1377_v63 = vrot.slane %v1376_v6, 4  ;;  %v1137_v11 = vadd.s32 %v1136_v14, %v1135_v62  ;;  %v5157_v1 = vadd.s32 %v1143_v0, %v1142_v54  ;;  %v1157_v56 = vrot.slane %v1156_v28, 1 }
 0x2e2   :  { %vm1531_vm15 = vcmp.eq.s32.totalorder %v1470_v50, %v3998_v5  ;;  %v1358_v49 = vrot.slane %v1357_v19, 2  ;;  %v1365_v51 = vrot.slane %v1364_v18, 2  ;;  %v1371_v36 = vadd.s32 %v1370_v61, %v1369_v35 }
 0x2e3   :  { %v1378_v27 = vadd.s32 %v1377_v63, %v1376_v6  ;;  %v1151_v20 = vadd.s32 %v1150_v31, %v1149_v55  ;;  %vm1532_vm0 = vcmp.eq.s32.totalorder %v1470_v50, %v4034_v38  ;;  %vm1533_vm1 = vcmp.eq.s32.totalorder %v1470_v50, %v4037_v39 }
 0x2e4   :  { %vm1534_vm3 = vcmp.eq.s32.totalorder %v1470_v50, %v4040_v40  ;;  %v1359_v24 = vadd.s32 %v1358_v49, %v1357_v19  ;;  %v1366_v45 = vadd.s32 %v1365_v51, %v1364_v18  ;;  %v1372_v47 = vrot.slane %v1371_v36, 2  ;;  %v1502_v50 = vpop.permute.xlu1 %1501 }
 0x2e5   :  { %v1379_v60 = vrot.slane %v1378_v27, 2  ;;  %v1595_v62 = vsel %vm1531_vm15, 1, %v5813_v37  ;;  %v1596_v12 = vsel %vm1532_vm0, 1, %v5813_v37  ;;  %v1597_v54 = vsel %vm1533_vm1, 1, %v5813_v37 }
 0x2e6   :  { %v1598_v63 = vsel %vm1534_vm3, 1, %v5813_v37  ;;  %v1360_v16 = vrot.slane %v1359_v24, 1  ;;  %v1367_v33 = vrot.slane %v1366_v45, 1  ;;  %v1373_v8 = vadd.s32 %v1372_v47, %v1371_v36 }
 0x2e7   :  { %v1380_v14 = vadd.s32 %v1379_v60, %v1378_v27  ;;  %v1779_v0 = vsel %vm294_vm2, %v1595_v62, 0  ;;  %v1786_v55 = vsel %vm294_vm2, %v1596_v12, 0  ;;  %v1793_v35 = vsel %vm294_vm2, %v1597_v54, 0 }
 0x2e8   :  { %v1800_v6 = vsel %vm294_vm2, %v1598_v63, 0  ;;  %v5171_v31 = vadd.s32 %v1157_v56, %v1156_v28  ;;  %v5174_v4 = vadd.s32 %v1137_v11, %v5117_v21  ;;  %v5177_v19 = vadd.s32 %v1151_v20, %v5133_v42 }
 0x2e9   :  { %v1374_v18 = vrot.slane %v1373_v8, 1  ;;  %v1780_v61 = vrot.slane %v1779_v0, 4  ;;  %v1787_v49 = vrot.slane %v1786_v55, 4  ;;  %v1794_v51 = vrot.slane %v1793_v35, 4 }
 0x2ea   :  { %5922 = vst [vmem:[#allocation16_spill] sm:$0xff] %v5171_v31  ;;  %5923 = vst [vmem:[#allocation17_spill] sm:$0xff] %v5174_v4  ;;  %v1801_v36 = vrot.slane %v1800_v6, 4  ;;  %v1361_v27 = vadd.s32 %v1360_v16, %v1359_v24  ;;  %v5179_v47 = vadd.s32 %v1367_v33, %v1366_v45  ;;  %v1381_v60 = vrot.slane %v1380_v14, 1  ;;  %v3849_v45 = vld [vmem:[#allocation3 + $0x80] ss:$8 sps:$4 sm:$0xff]  }
 0x2eb   :  { %5924 = vst [vmem:[#allocation52_spill] sm:$0xff] %v5177_v19  ;;  %vm1563_vm4 = vcmp.eq.s32.totalorder %v1502_v50, %v3998_v5  ;;  %v1781_v62 = vadd.s32 %v1780_v61, %v1779_v0  ;;  %v1788_v28 = vadd.s32 %v1787_v49, %v1786_v55  ;;  %v1795_v56 = vadd.s32 %v1794_v51, %v1793_v35  ;;  %v3851_v51 = vld [vmem:[#allocation3 + $0x94] ss:$8 sps:$4 sm:$0xff]  }
 0x2ec   :  { %v1802_v12 = vadd.s32 %v1801_v36, %v1800_v6  ;;  %v1375_v11 = vadd.s32 %v1374_v18, %v1373_v8  ;;  %vm1564_vm5 = vcmp.eq.s32.totalorder %v1502_v50, %v4034_v38  ;;  %vm1565_vm6 = vcmp.eq.s32.totalorder %v1502_v50, %v4037_v39  ;;  %v3850_v8 = vld [vmem:[#allocation3 + $0x180] ss:$8 sps:$4 sm:$0xff]   ;;  %3595 = vmatpush1.bf16.msra.mxu1 %v3849_v45 }
 0x2ed   :  { %vm1566_vm7 = vcmp.eq.s32.totalorder %v1502_v50, %v4040_v40  ;;  %v1782_v21 = vrot.slane %v1781_v62, 2  ;;  %v1789_v42 = vrot.slane %v1788_v28, 2  ;;  %v1796_v20 = vrot.slane %v1795_v56, 2  ;;  %3638 = vmatpush1.bf16.msra.mxu0 %v3850_v8  ;;  %3596 = vmatprep.subr.bf16.mxu1 %v3851_v51  ;;  %v3855_v51 = vld [vmem:[#allocation3 + $0x90] ss:$8 sps:$4 sm:$0xff]  }
 0x2ee   :  { %v1803_v24 = vrot.slane %v1802_v12, 2  ;;  %v1627_v54 = vsel %vm1563_vm4, 1, %v5813_v37  ;;  %v1628_v63 = vsel %vm1564_vm5, 1, %v5813_v37  ;;  %v1629_v16 = vsel %vm1565_vm6, 1, %v5813_v37 }
 0x2ef   :  { %v1630_v33 = vsel %vm1566_vm7, 1, %v5813_v37  ;;  %v1783_v0 = vadd.s32 %v1782_v21, %v1781_v62  ;;  %v1790_v55 = vadd.s32 %v1789_v42, %v1788_v28  ;;  %v1797_v35 = vadd.s32 %v1796_v20, %v1795_v56  ;;  %v3853_v62 = vld [vmem:[#allocation3 + $0x194] ss:$8 sps:$4 sm:$0xff]   ;;  %v2166_v42 = vpop.permute.xlu0 %2165 }
 0x2f0   :  { %v1804_v6 = vadd.s32 %v1803_v24, %v1802_v12  ;;  %v2003_v50 = vsel %vm294_vm2, %v1627_v54, 0  ;;  %v2010_v18 = vsel %vm294_vm2, %v1628_v63, 0  ;;  %v2017_v61 = vsel %vm294_vm2, %v1629_v16, 0  ;;  %3639 = vmatprep.subr.bf16.mxu0 %v3853_v62  ;;  %3597 = vmatpush1.bf16.msra.mxu1 %v3855_v51 }
 0x2f1   :  { %v2024_v49 = vsel %vm294_vm2, %v1630_v33, 0  ;;  %v5193_v36 = vadd.s32 %v1381_v60, %v1380_v14  ;;  %v1784_v19 = vrot.slane %v1783_v0, 1  ;;  %v1791_v4 = vrot.slane %v1790_v55, 1 }
 0x2f2   :  { %v1798_v57 = vrot.slane %v1797_v35, 1  ;;  %v2004_v28 = vrot.slane %v2003_v50, 4  ;;  %v2011_v56 = vrot.slane %v2010_v18, 4  ;;  %v2018_v12 = vrot.slane %v2017_v61, 4 }
 0x2f3   :  { %5925 = vst [vmem:[#allocation53_spill] sm:$0xff] %v5193_v36  ;;  %v2025_v21 = vrot.slane %v2024_v49, 4  ;;  %v5196_v20 = vadd.s32 %v1361_v27, %v5137_v29  ;;  %v5199_v24 = vadd.s32 %v1375_v11, %v5153_v7  ;;  %v1785_v45 = vadd.s32 %v1784_v19, %v1783_v0  ;;  %v3856_v29 = vld [vmem:[#allocation3 + $0x190] ss:$8 sps:$4 sm:$0xff]  }
 0x2f4   :  { %v1805_v54 = vrot.slane %v1804_v6, 1  ;;  %v2005_v14 = vadd.s32 %v2004_v28, %v2003_v50  ;;  %v2012_v60 = vadd.s32 %v2011_v56, %v2010_v18  ;;  %v2019_v63 = vadd.s32 %v2018_v12, %v2017_v61  ;;  %3640 = vmatpush1.bf16.msra.mxu0 %v3856_v29  ;;  %v3857_v50 = vld [vmem:[#allocation3 + $0xa4] ss:$8 sps:$4 sm:$0xff]   ;;  %v3861_v56 = vld [vmem:[#allocation3 + $0xa0] ss:$8 sps:$4 sm:$0xff]   ;;  %v2198_v29 = vpop.permute.xlu1 %2197 }
 0x2f5   :  { %5926 = vst [vmem:[#allocation54_spill] sm:$0xff] %v5196_v20  ;;  %5927 = vst [vmem:[#allocation55_spill] sm:$0xff] %v5199_v24  ;;  %v2026_v16 = vadd.s32 %v2025_v21, %v2024_v49  ;;  %v5201_v33 = vadd.s32 %v1791_v4, %v1790_v55  ;;  %v1799_v8 = vadd.s32 %v1798_v57, %v1797_v35  ;;  %v3859_v18 = vld [vmem:[#allocation3 + $0x1a4] ss:$8 sps:$4 sm:$0xff]   ;;  %3598 = vmatprep.subr.bf16.mxu1 %v3857_v50  ;;  %v3868_v24 = vld [vmem:[#allocation3 + $0x1b0] ss:$8 sps:$4 sm:$0xff]  }
 0x2f6   :  { %vm2227_vm8 = vcmp.eq.s32.totalorder %v2166_v42, %v3998_v5  ;;  %vm2228_vm9 = vcmp.eq.s32.totalorder %v2166_v42, %v4034_v38  ;;  %v2006_v27 = vrot.slane %v2005_v14, 2  ;;  %v2013_v20 = vrot.slane %v2012_v60, 2  ;;  %3641 = vmatprep.subr.bf16.mxu0 %v3859_v18  ;;  %3599 = vmatpush1.bf16.msra.mxu1 %v3861_v56 }
 0x2f7   :  { %v2020_v7 = vrot.slane %v2019_v63, 2  ;;  %v2027_v11 = vrot.slane %v2026_v16, 2  ;;  %vm2229_vm10 = vcmp.eq.s32.totalorder %v2166_v42, %v4037_v39  ;;  %vm2230_vm11 = vcmp.eq.s32.totalorder %v2166_v42, %v4040_v40 }
 0x2f8   :  { %v2291_v19 = vsel %vm2227_vm8, 1, %v5813_v37  ;;  %v2292_v4 = vsel %vm2228_vm9, 1, %v5813_v37  ;;  %v2007_v57 = vadd.s32 %v2006_v27, %v2005_v14  ;;  %v2014_v0 = vadd.s32 %v2013_v20, %v2012_v60  ;;  %v3862_v20 = vld [vmem:[#allocation3 + $0x1a0] ss:$8 sps:$4 sm:$0xff]  }
 0x2f9   :  { %v2021_v55 = vadd.s32 %v2020_v7, %v2019_v63  ;;  %v5209_v35 = vadd.s32 %v2027_v11, %v2026_v16  ;;  %v2293_v61 = vsel %vm2229_vm10, 1, %v5813_v37  ;;  %v2294_v49 = vsel %vm2230_vm11, 1, %v5813_v37  ;;  %3642 = vmatpush1.bf16.msra.mxu0 %v3862_v20  ;;  %v3863_v11 = vld [vmem:[#allocation3 + $0xb4] ss:$8 sps:$4 sm:$0xff]  }
 0x2fa   :  { %v2427_v62 = vsel %vm294_vm2, %v2291_v19, 0  ;;  %v2434_v28 = vsel %vm294_vm2, %v2292_v4, 0  ;;  %v5215_v12 = vadd.s32 %v1805_v54, %v1804_v6  ;;  %v2008_v21 = vrot.slane %v2007_v57, 1  ;;  %v3865_v19 = vld [vmem:[#allocation3 + $0x1b4] ss:$8 sps:$4 sm:$0xff]   ;;  %3600 = vmatprep.subr.bf16.mxu1 %v3863_v11 }
 0x2fb   :  { %v2015_v42 = vrot.slane %v2014_v0, 1  ;;  %v2022_v14 = vrot.slane %v2021_v55, 1  ;;  %v2428_v60 = vrot.slane %v2427_v62, 4  ;;  %v2435_v63 = vrot.slane %v2434_v28, 4  ;;  %3643 = vmatprep.subr.bf16.mxu0 %v3865_v19 }
 0x2fc   :  { %5928 = vst [vmem:[#allocation56_spill] sm:$0xff] %v5215_v12  ;;  %v2441_v16 = vsel %vm294_vm2, %v2293_v61, 0  ;;  %v2448_v51 = vsel %vm294_vm2, %v2294_v49, 0  ;;  %v5220_v27 = vadd.s32 %v1785_v45, %v4712_v26  ;;  %v5223_v6 = vadd.s32 %v1799_v8, %v4718_v23  ;;  %v3867_v49 = vld [vmem:[#allocation3 + $0xb0] ss:$8 sps:$4 sm:$0xff]  }
 0x2fd   :  { %v5225_v54 = vadd.s32 %v2008_v21, %v2007_v57  ;;  %v2429_v4 = vadd.s32 %v2428_v60, %v2427_v62  ;;  %v2436_v50 = vadd.s32 %v2435_v63, %v2434_v28  ;;  %v2442_v18 = vrot.slane %v2441_v16, 4  ;;  %3601 = vmatpush1.bf16.msra.mxu1 %v3867_v49  ;;  %3644 = vmatpush1.bf16.msra.mxu0 %v3868_v24  ;;  %v3869_v62 = vld [vmem:[#allocation3 + $0xc4] ss:$8 sps:$4 sm:$0xff]   ;;  %v3873_v60 = vld [vmem:[#allocation3 + $0xc0] ss:$8 sps:$4 sm:$0xff]  }
 0x2fe   :  { %v2449_v61 = vrot.slane %v2448_v51, 4  ;;  %v5228_v56 = vadd.s32 %v2015_v42, %v2014_v0  ;;  %v5230_v26 = vadd.s32 %v2022_v14, %v2021_v55  ;;  %vm2259_vm12 = vcmp.eq.s32.totalorder %v2198_v29, %v3998_v5  ;;  %v3871_v28 = vld [vmem:[#allocation3 + $0x1c4] ss:$8 sps:$4 sm:$0xff]   ;;  %v3874_v63 = vld [vmem:[#allocation3 + $0x1c0] ss:$8 sps:$4 sm:$0xff]   ;;  %3602 = vmatprep.subr.bf16.mxu1 %v3869_v62 }
 0x2ff   :  { %vm2260_vm13 = vcmp.eq.s32.totalorder %v2198_v29, %v4034_v38  ;;  %v2430_v23 = vrot.slane %v2429_v4, 2  ;;  %v2437_v45 = vrot.slane %v2436_v50, 2  ;;  %v2443_v8 = vadd.s32 %v2442_v18, %v2441_v16  ;;  %3645 = vmatprep.subr.bf16.mxu0 %v3871_v28  ;;  %v3879_v62 = vld [vmem:[#allocation3 + $0xd0] ss:$8 sps:$4 sm:$0xff]  }
 0x300   :  { %5929 = vst [vmem:[#allocation57_spill] sm:$0xff] %v5228_v56  ;;  %v2450_v57 = vadd.s32 %v2449_v61, %v2448_v51  ;;  %vm2261_vm14 = vcmp.eq.s32.totalorder %v2198_v29, %v4037_v39  ;;  %vm2262_vm15 = vcmp.eq.s32.totalorder %v2198_v29, %v4040_v40  ;;  %v2323_v0 = vsel %vm2259_vm12, 1, %v5813_v37 }
 0x301   :  { %v2324_v55 = vsel %vm2260_vm13, 1, %v5813_v37  ;;  %v2431_v21 = vadd.s32 %v2430_v23, %v2429_v4  ;;  %v2438_v42 = vadd.s32 %v2437_v45, %v2436_v50  ;;  %v2444_v14 = vrot.slane %v2443_v8, 2  ;;  %3603 = vmatpush1.bf16.msra.mxu1 %v3873_v60  ;;  %3646 = vmatpush1.bf16.msra.mxu0 %v3874_v63  ;;  %v3875_v45 = vld [vmem:[#allocation3 + $0xd4] ss:$8 sps:$4 sm:$0xff]  }
 0x302   :  { %v2451_v20 = vrot.slane %v2450_v57, 2  ;;  %v2325_v16 = vsel %vm2261_vm14, 1, %v5813_v37  ;;  %v2326_v51 = vsel %vm2262_vm15, 1, %v5813_v37  ;;  %v2651_v11 = vsel %vm294_vm2, %v2323_v0, 0  ;;  %3604 = vmatprep.subr.bf16.mxu1 %v3875_v45 }
 0x303   :  { %v2658_v29 = vsel %vm294_vm2, %v2324_v55, 0  ;;  %v2432_v19 = vrot.slane %v2431_v21, 1  ;;  %v2439_v24 = vrot.slane %v2438_v42, 1  ;;  %v2445_v18 = vadd.s32 %v2444_v14, %v2443_v8  ;;  %v3877_v55 = vld [vmem:[#allocation3 + $0x1d4] ss:$8 sps:$4 sm:$0xff]  }
 0x304   :  { %v2452_v61 = vadd.s32 %v2451_v20, %v2450_v57  ;;  %v2652_v4 = vrot.slane %v2651_v11, 4  ;;  %v2659_v50 = vrot.slane %v2658_v29, 4  ;;  %v2665_v49 = vsel %vm294_vm2, %v2325_v16, 0  ;;  %v3880_v57 = vld [vmem:[#allocation3 + $0x1d0] ss:$8 sps:$4 sm:$0xff]   ;;  %3647 = vmatprep.subr.bf16.mxu0 %v3877_v55 }
 0x305   :  { %v2672_v23 = vsel %vm294_vm2, %v2326_v51, 0  ;;  %v2433_v7 = vadd.s32 %v2432_v19, %v2431_v21  ;;  %v2440_v12 = vadd.s32 %v2439_v24, %v2438_v42  ;;  %v2446_v0 = vrot.slane %v2445_v18, 1  ;;  %v3881_v14 = vld [vmem:[#allocation3 + $0xe4] ss:$8 sps:$4 sm:$0xff]   ;;  %v1474_v24 = vpop.permute.xlu0 %1473  ;;  %3605 = vmatpush1.bf16.msra.mxu1 %v3879_v62  ;;  %3648 = vmatpush1.bf16.msra.mxu0 %v3880_v57  ;;  %v3891_v62 = vld [vmem:[#allocation3 + $0xf0] ss:$8 sps:$4 sm:$0xff]  }
 0x306   :  { %v2453_v36 = vrot.slane %v2452_v61, 1  ;;  %v2653_v28 = vadd.s32 %v2652_v4, %v2651_v11  ;;  %v2660_v31 = vadd.s32 %v2659_v50, %v2658_v29  ;;  %v2666_v56 = vrot.slane %v2665_v49, 4  ;;  %v3883_v42 = vld [vmem:[#allocation3 + $0x1e4] ss:$8 sps:$4 sm:$0xff]   ;;  %v3885_v4 = vld [vmem:[#allocation3 + $0xe0] ss:$8 sps:$4 sm:$0xff]   ;;  %3606 = vmatprep.subr.bf16.mxu1 %v3881_v14 }
 0x307   :  { %v2673_v8 = vrot.slane %v2672_v23, 4  ;;  %v5930_v20 = vrot.slane %v5209_v35, 1  ;;  %v2447_v63 = vadd.s32 %v2446_v0, %v2445_v18  ;;  %v2803_v21 = vadd.s32 %v2433_v7, %v4760_v32  ;;  %v3886_v50 = vld [vmem:[#allocation3 + $0x1e0] ss:$8 sps:$4 sm:$0xff]   ;;  %3649 = vmatprep.subr.bf16.mxu0 %v3883_v42  ;;  %v3887_v7 = vld [vmem:[#allocation3 + $0xf4] ss:$8 sps:$4 sm:$0xff]  }
 0x308   :  { %v2454_v16 = vadd.s32 %v2453_v36, %v2452_v61  ;;  %v2654_v51 = vrot.slane %v2653_v28, 2  ;;  %v2661_v19 = vrot.slane %v2660_v31, 2  ;;  %v2667_v11 = vadd.s32 %v2666_v56, %v2665_v49  ;;  %v3889_v56 = vld [vmem:[#allocation3 + $0x1f4] ss:$8 sps:$4 sm:$0xff]  }
 0x309   :  { %v5247_v60 = vadd.s32 %v5930_v20, %v5209_v35  ;;  %v2674_v29 = vadd.s32 %v2673_v8, %v2672_v23  ;;  %v5253_v35 = vadd.s32 %v5225_v54, %v4740_v48  ;;  %v5256_v36 = vadd.s32 %v2440_v12, %v4763_v15  ;;  %3607 = vmatpush1.bf16.msra.mxu1 %v3885_v4 }
 0x30a   :  { %v2805_v32 = vadd.s32 %v2447_v63, %v4766_v59  ;;  %v2655_v18 = vadd.s32 %v2654_v51, %v2653_v28  ;;  %v2662_v61 = vadd.s32 %v2661_v19, %v2660_v31  ;;  %v2668_v49 = vrot.slane %v2667_v11, 2  ;;  %3650 = vmatpush1.bf16.msra.mxu0 %v3886_v50  ;;  %3608 = vmatprep.subr.bf16.mxu1 %v3887_v7  ;;  %v1506_v7 = vpop.permute.xlu1 %1505 }
 0x30b   :  { %v2675_v23 = vrot.slane %v2674_v29, 2  ;;  %v5261_v0 = vadd.s32 %v5230_v26, %v4746_v53  ;;  %v5264_v48 = vadd.s32 %v2454_v16, %v4769_v46  ;;  %v2879_v54 = vcvt.s32.f32 %v2803_v21  ;;  %3651 = vmatprep.subr.bf16.mxu0 %v3889_v56  ;;  %v3892_v53 = vld [vmem:[#allocation3 + $0x1f0] ss:$8 sps:$4 sm:$0xff]  }
 0x30c   :  { %vm1535_vm0 = vcmp.eq.s32.totalorder %v1474_v24, %v3998_v5  ;;  %v2656_v15 = vrot.slane %v2655_v18, 1  ;;  %v2663_v59 = vrot.slane %v2662_v61, 1  ;;  %v2669_v12 = vadd.s32 %v2668_v49, %v2667_v11 }
 0x30d   :  { %v2676_v55 = vadd.s32 %v2675_v23, %v2674_v29  ;;  %v2881_v28 = vcvt.s32.f32 %v2805_v32  ;;  %vm1536_vm1 = vcmp.eq.s32.totalorder %v1474_v24, %v4034_v38  ;;  %vm1537_vm3 = vcmp.eq.s32.totalorder %v1474_v24, %v4037_v39  ;;  %3609 = vmatpush1.bf16.msra.mxu1 %v3891_v62 }
 0x30e   :  { %v2657_v46 = vadd.s32 %v2656_v15, %v2655_v18  ;;  %v2664_v26 = vadd.s32 %v2663_v59, %v2662_v61  ;;  %v2670_v8 = vrot.slane %v2669_v12, 1  ;;  %v5270_v14 = vpack.c.bf16 %v2879_v54, %v2879_v54  ;;  %3652 = vmatpush1.bf16.msra.mxu0 %v3892_v53 }
 0x30f   :  { %v2677_v57 = vrot.slane %v2676_v55, 1  ;;  %vm1538_vm4 = vcmp.eq.s32.totalorder %v1474_v24, %v4040_v40  ;;  %v1599_v20 = vsel %vm1535_vm0, 1, %v5813_v37  ;;  %v1600_v63 = vsel %vm1536_vm1, 1, %v5813_v37 }
 0x310   :  { %5931 = vst [vmem:[#allocation58_spill] sm:$0xff] %v5270_v14  ;;  %v2671_v16 = vadd.s32 %v2670_v8, %v2669_v12  ;;  %v2835_v42 = vadd.s32 %v2657_v46, %v4801_v52  ;;  %v5279_v51 = vadd.s32 %v2664_v26, %v4805_v30  ;;  %v1601_v19 = vsel %vm1537_vm3, 1, %v5813_v37 }
 0x311   :  { %v2678_v21 = vadd.s32 %v2677_v57, %v2676_v55  ;;  %v1602_v11 = vsel %vm1538_vm4, 1, %v5813_v37  ;;  %v1807_v29 = vsel %vm294_vm2, %v1599_v20, 0  ;;  %v1814_v4 = vsel %vm294_vm2, %v1600_v63, 0 }
 0x312   :  { %v5288_v32 = vpack.c.bf16 %v2881_v28, %v2881_v28  ;;  %v2837_v52 = vadd.s32 %v2671_v16, %v4809_v34  ;;  %v1808_v56 = vrot.slane %v1807_v29, 4  ;;  %v1815_v24 = vrot.slane %v1814_v4, 4 }
 0x313   :  { %v5292_v30 = vadd.s32 %v2678_v21, %v4813_v10  ;;  %v1821_v18 = vsel %vm294_vm2, %v1601_v19, 0  ;;  %v1828_v61 = vsel %vm294_vm2, %v1602_v11, 0  ;;  %v2911_v23 = vcvt.s32.f32 %v2835_v42  ;;  %v2202_v10 = vpop.permute.xlu1 %2201 }
 0x314   :  { %5932 = vst [vmem:[#allocation59_spill] sm:$0xff] %v5288_v32  ;;  %v1822_v15 = vrot.slane %v1821_v18, 4  ;;  %v1809_v59 = vadd.s32 %v1808_v56, %v1807_v29  ;;  %v1816_v12 = vadd.s32 %v1815_v24, %v1814_v4  ;;  %v1829_v55 = vrot.slane %v1828_v61, 4 }
 0x315   :  { %vm1567_vm5 = vcmp.eq.s32.totalorder %v1506_v7, %v3998_v5  ;;  %v2913_v34 = vcvt.s32.f32 %v2837_v52  ;;  %vm1568_vm6 = vcmp.eq.s32.totalorder %v1506_v7, %v4034_v38  ;;  %vm1569_vm7 = vcmp.eq.s32.totalorder %v1506_v7, %v4037_v39 }
 0x316   :  { %v1823_v62 = vadd.s32 %v1822_v15, %v1821_v18  ;;  %v1810_v28 = vrot.slane %v1809_v59, 2  ;;  %v1817_v53 = vrot.slane %v1816_v12, 2  ;;  %v1830_v46 = vadd.s32 %v1829_v55, %v1828_v61  ;;  %v2170_v15 = vpop.permute.xlu0 %2169 }
 0x317   :  { %v5302_v26 = vpack.c.bf16 %v2911_v23, %v2911_v23  ;;  %vm1570_vm8 = vcmp.eq.s32.totalorder %v1506_v7, %v4040_v40  ;;  %v1631_v57 = vsel %vm1567_vm5, 1, %v5813_v37  ;;  %v1632_v21 = vsel %vm1568_vm6, 1, %v5813_v37 }
 0x318   :  { %v1824_v8 = vrot.slane %v1823_v62, 2  ;;  %v1811_v20 = vadd.s32 %v1810_v28, %v1809_v59  ;;  %v1818_v63 = vadd.s32 %v1817_v53, %v1816_v12  ;;  %v1831_v16 = vrot.slane %v1830_v46, 2 }
 0x319   :  { %5933 = vst [vmem:[#allocation60_spill] sm:$0xff] %v5302_v26  ;;  %v1633_v19 = vsel %vm1569_vm7, 1, %v5813_v37  ;;  %v1634_v11 = vsel %vm1570_vm8, 1, %v5813_v37  ;;  %v2031_v29 = vsel %vm294_vm2, %v1631_v57, 0  ;;  %v2038_v7 = vsel %vm294_vm2, %v1632_v21, 0 }
 0x31a   :  { %v1825_v42 = vadd.s32 %v1824_v8, %v1823_v62  ;;  %v1812_v4 = vrot.slane %v1811_v20, 1  ;;  %v1819_v52 = vrot.slane %v1818_v63, 1  ;;  %v1832_v56 = vadd.s32 %v1831_v16, %v1830_v46 }
 0x31b   :  { %v2032_v24 = vrot.slane %v2031_v29, 4  ;;  %v2045_v61 = vsel %vm294_vm2, %v1633_v19, 0  ;;  %v2052_v23 = vsel %vm294_vm2, %v1634_v11, 0  ;;  %v5313_v59 = vpack.c.bf16 %v2913_v34, %v2913_v34 }
 0x31c   :  { %v1826_v18 = vrot.slane %v1825_v42, 1  ;;  %v1833_v55 = vrot.slane %v1832_v56, 1  ;;  %v1813_v28 = vadd.s32 %v1812_v4, %v1811_v20  ;;  %v2039_v53 = vrot.slane %v2038_v7, 4 }
 0x31d   :  { %5934 = vst [vmem:[#allocation61_spill] sm:$0xff] %v5313_v59  ;;  %v2033_v62 = vadd.s32 %v2032_v24, %v2031_v29  ;;  %v2046_v8 = vrot.slane %v2045_v61, 4  ;;  %v2053_v57 = vrot.slane %v2052_v23, 4  ;;  %v5316_v46 = vadd.s32 %v1819_v52, %v1818_v63 }
 0x31e   :  { %v1827_v16 = vadd.s32 %v1826_v18, %v1825_v42  ;;  %vm2231_vm9 = vcmp.eq.s32.totalorder %v2170_v15, %v3998_v5  ;;  %v5319_v21 = vadd.s32 %v1833_v55, %v1832_v56  ;;  %v2040_v19 = vadd.s32 %v2039_v53, %v2038_v7 }
 0x31f   :  { %v2034_v49 = vrot.slane %v2033_v62, 2  ;;  %v2047_v11 = vadd.s32 %v2046_v8, %v2045_v61  ;;  %v2054_v34 = vadd.s32 %v2053_v57, %v2052_v23  ;;  %vm2232_vm10 = vcmp.eq.s32.totalorder %v2170_v15, %v4034_v38 }
 0x320   :  { %vm2233_vm11 = vcmp.eq.s32.totalorder %v2170_v15, %v4037_v39  ;;  %vm2234_vm12 = vcmp.eq.s32.totalorder %v2170_v15, %v4040_v40  ;;  %v2041_v20 = vrot.slane %v2040_v19, 2  ;;  %v2295_v42 = vsel %vm2231_vm9, 1, %v5813_v37 }
 0x321   :  { %v2035_v45 = vadd.s32 %v2034_v49, %v2033_v62  ;;  %v2048_v29 = vrot.slane %v2047_v11, 2  ;;  %v2055_v63 = vrot.slane %v2054_v34, 2  ;;  %v2296_v52 = vsel %vm2232_vm10, 1, %v5813_v37 }
 0x322   :  { %v2297_v56 = vsel %vm2233_vm11, 1, %v5813_v37  ;;  %v2298_v24 = vsel %vm2234_vm12, 1, %v5813_v37  ;;  %v2042_v18 = vadd.s32 %v2041_v20, %v2040_v19  ;;  %v2455_v61 = vsel %vm294_vm2, %v2295_v42, 0 }
 0x323   :  { %v2036_v4 = vrot.slane %v2035_v45, 1  ;;  %v2049_v49 = vadd.s32 %v2048_v29, %v2047_v11  ;;  %v2056_v7 = vadd.s32 %v2055_v63, %v2054_v34  ;;  %v2456_v55 = vrot.slane %v2455_v61, 4 }
 0x324   :  { %v2462_v15 = vsel %vm294_vm2, %v2296_v52, 0  ;;  %v2469_v62 = vsel %vm294_vm2, %v2297_v56, 0  ;;  %v5332_v53 = vadd.s32 %v1813_v28, %v4979_v3  ;;  %v2043_v8 = vrot.slane %v2042_v18, 1 }
 0x325   :  { %v2037_v23 = vadd.s32 %v2036_v4, %v2035_v45  ;;  %v2050_v57 = vrot.slane %v2049_v49, 1  ;;  %v2463_v12 = vrot.slane %v2462_v15, 4  ;;  %v5335_v50 = vadd.s32 %v1827_v16, %v4982_v58 }
 0x326   :  { %5935 = vst [vmem:[#allocation62_spill] sm:$0xff] %v5332_v53  ;;  %v2457_v19 = vadd.s32 %v2456_v55, %v2455_v61  ;;  %v2470_v11 = vrot.slane %v2469_v62, 4  ;;  %v2476_v34 = vsel %vm294_vm2, %v2298_v24, 0  ;;  %v5338_v45 = vadd.s32 %v2043_v8, %v2042_v18 }
 0x327   :  { %5936 = vst [vmem:[#allocation63_spill] sm:$0xff] %v5335_v50  ;;  %v2057_v20 = vrot.slane %v2056_v7, 1  ;;  %v5341_v29 = vadd.s32 %v2037_v23, %v5005_v9  ;;  %v2464_v63 = vadd.s32 %v2463_v12, %v2462_v15  ;;  %v2477_v42 = vrot.slane %v2476_v34, 4 }
 0x328   :  { %v2458_v3 = vrot.slane %v2457_v19, 2  ;;  %v2471_v28 = vadd.s32 %v2470_v11, %v2469_v62  ;;  %vm2263_vm13 = vcmp.eq.s32.totalorder %v2202_v10, %v3998_v5  ;;  %v2051_v4 = vadd.s32 %v2050_v57, %v2049_v49 }
 0x329   :  { %5937 = vst [vmem:[#allocation64_spill] sm:$0xff] %v5341_v29  ;;  %v2465_v52 = vrot.slane %v2464_v63, 2  ;;  %vm2264_vm14 = vcmp.eq.s32.totalorder %v2202_v10, %v4034_v38  ;;  %vm2265_vm15 = vcmp.eq.s32.totalorder %v2202_v10, %v4037_v39  ;;  %v2478_v56 = vadd.s32 %v2477_v42, %v2476_v34 }
 0x32a   :  { %v2459_v58 = vadd.s32 %v2458_v3, %v2457_v19  ;;  %v2472_v16 = vrot.slane %v2471_v28, 2  ;;  %vm2266_vm0 = vcmp.eq.s32.totalorder %v2202_v10, %v4040_v40  ;;  %v2327_v9 = vsel %vm2263_vm13, 1, %v5813_v37 }
 0x32b   :  { %v2466_v24 = vadd.s32 %v2465_v52, %v2464_v63  ;;  %v2328_v12 = vsel %vm2264_vm14, 1, %v5813_v37  ;;  %v2329_v18 = vsel %vm2265_vm15, 1, %v5813_v37  ;;  %v2479_v49 = vrot.slane %v2478_v56, 2  ;;  %v1478_v52 = vpop.permute.xlu0 %1477 }
 0x32c   :  { %v2460_v61 = vrot.slane %v2459_v58, 1  ;;  %v2473_v23 = vadd.s32 %v2472_v16, %v2471_v28  ;;  %v2330_v55 = vsel %vm2266_vm0, 1, %v5813_v37  ;;  %v2679_v62 = vsel %vm294_vm2, %v2327_v9, 0 }
 0x32d   :  { %v2467_v15 = vrot.slane %v2466_v24, 1  ;;  %v2686_v8 = vsel %vm294_vm2, %v2328_v12, 0  ;;  %v2693_v57 = vsel %vm294_vm2, %v2329_v18, 0  ;;  %v2480_v11 = vadd.s32 %v2479_v49, %v2478_v56 }
 0x32e   :  { %v2461_v10 = vadd.s32 %v2460_v61, %v2459_v58  ;;  %v2474_v19 = vrot.slane %v2473_v23, 1  ;;  %v2680_v34 = vrot.slane %v2679_v62, 4  ;;  %v5354_v63 = vadd.s32 %v2057_v20, %v2056_v7 }
 0x32f   :  { %v2687_v3 = vrot.slane %v2686_v8, 4  ;;  %v2694_v42 = vrot.slane %v2693_v57, 4  ;;  %v2700_v28 = vsel %vm294_vm2, %v2330_v55, 0  ;;  %v5358_v16 = vadd.s32 %v2051_v4, %v5008_v2 }
 0x330   :  { %v2475_v54 = vadd.s32 %v2474_v19, %v2473_v23  ;;  %v2807_v9 = vadd.s32 %v2461_v10, %v5011_v25  ;;  %v2681_v12 = vadd.s32 %v2680_v34, %v2679_v62  ;;  %v5361_v31 = vadd.s32 %v2467_v15, %v2466_v24 }
 0x331   :  { %5938 = vst [vmem:[#allocation65_spill] sm:$0xff] %v5358_v16  ;;  %v2688_v58 = vadd.s32 %v2687_v3, %v2686_v8  ;;  %v2695_v18 = vadd.s32 %v2694_v42, %v2693_v57  ;;  %v2701_v56 = vrot.slane %v2700_v28, 4  ;;  %v2481_v61 = vrot.slane %v2480_v11, 1 }
 0x332   :  { %v2809_v7 = vadd.s32 %v2475_v54, %v5027_v43  ;;  %v2682_v20 = vrot.slane %v2681_v12, 2  ;;  %vm1539_vm1 = vcmp.eq.s32.totalorder %v1478_v52, %v3998_v5  ;;  %vm1540_vm3 = vcmp.eq.s32.totalorder %v1478_v52, %v4034_v38 }
 0x333   :  { %v2689_v49 = vrot.slane %v2688_v58, 2  ;;  %v2696_v55 = vrot.slane %v2695_v18, 2  ;;  %v2702_v59 = vadd.s32 %v2701_v56, %v2700_v28  ;;  %v2883_v2 = vcvt.s32.f32 %v2807_v9 }
 0x334   :  { %v2885_v4 = vcvt.s32.f32 %v2809_v7  ;;  %v2683_v25 = vadd.s32 %v2682_v20, %v2681_v12  ;;  %vm1541_vm4 = vcmp.eq.s32.totalorder %v1478_v52, %v4037_v39  ;;  %vm1542_vm5 = vcmp.eq.s32.totalorder %v1478_v52, %v4040_v40  ;;  %v1510_v7 = vpop.permute.xlu1 %1509 }
 0x335   :  { %v2690_v24 = vadd.s32 %v2689_v49, %v2688_v58  ;;  %v2697_v23 = vadd.s32 %v2696_v55, %v2695_v18  ;;  %v2703_v15 = vrot.slane %v2702_v59, 2  ;;  %v5368_v62 = vadd.s32 %v2481_v61, %v2480_v11 }
 0x336   :  { %v2684_v43 = vrot.slane %v2683_v25, 1  ;;  %v1603_v54 = vsel %vm1539_vm1, 1, %v5813_v37  ;;  %v1604_v8 = vsel %vm1540_vm3, 1, %v5813_v37  ;;  %v1605_v34 = vsel %vm1541_vm4, 1, %v5813_v37 }
 0x337   :  { %v2691_v57 = vrot.slane %v2690_v24, 1  ;;  %v2698_v10 = vrot.slane %v2697_v23, 1  ;;  %v2704_v19 = vadd.s32 %v2703_v15, %v2702_v59  ;;  %v1606_v42 = vsel %vm1542_vm5, 1, %v5813_v37 }
 0x338   :  { %v2685_v3 = vadd.s32 %v2684_v43, %v2683_v25  ;;  %v1835_v28 = vsel %vm294_vm2, %v1603_v54, 0  ;;  %v1842_v9 = vsel %vm294_vm2, %v1604_v8, 0  ;;  %v5376_v52 = vpack.c.bf16 %v2883_v2, %v2883_v2  ;;  %v2206_v32 = vpop.permute.xlu1 %2205 }
 0x339   :  { %v5378_v11 = vpack.c.bf16 %v2885_v4, %v2885_v4  ;;  %v2699_v12 = vadd.s32 %v2698_v10, %v2697_v23  ;;  %v1836_v58 = vrot.slane %v1835_v28, 4  ;;  %v1843_v56 = vrot.slane %v1842_v9, 4 }
 0x33a   :  { %5939 = vst [vmem:[#allocation66_spill] sm:$0xff] %v5376_v52  ;;  %v2839_v18 = vadd.s32 %v2685_v3, %v5033_v13  ;;  %v1849_v59 = vsel %vm294_vm2, %v1605_v34, 0  ;;  %v1856_v61 = vsel %vm294_vm2, %v1606_v42, 0  ;;  %v2705_v20 = vrot.slane %v2704_v19, 1 }
 0x33b   :  { %5940 = vst [vmem:[#allocation67_spill] sm:$0xff] %v5378_v11  ;;  %v2841_v49 = vadd.s32 %v2699_v12, %v5059_v22  ;;  %v1837_v55 = vadd.s32 %v1836_v58, %v1835_v28  ;;  %v1850_v25 = vrot.slane %v1849_v59, 4  ;;  %v5384_v15 = vadd.s32 %v2691_v57, %v2690_v24 }
 0x33c   :  { %v2915_v2 = vcvt.s32.f32 %v2839_v18  ;;  %v1844_v4 = vadd.s32 %v1843_v56, %v1842_v9  ;;  %v1857_v43 = vrot.slane %v1856_v61, 4  ;;  %vm1571_vm6 = vcmp.eq.s32.totalorder %v1510_v7, %v3998_v5  ;;  %v2174_v56 = vpop.permute.xlu0 %2173 }
 0x33d   :  { %v1838_v23 = vrot.slane %v1837_v55, 2  ;;  %v1851_v54 = vadd.s32 %v1850_v25, %v1849_v59  ;;  %vm1572_vm7 = vcmp.eq.s32.totalorder %v1510_v7, %v4034_v38  ;;  %v2917_v13 = vcvt.s32.f32 %v2841_v49 }
 0x33e   :  { %v1845_v8 = vrot.slane %v1844_v4, 2  ;;  %v1858_v10 = vadd.s32 %v1857_v43, %v1856_v61  ;;  %vm1573_vm8 = vcmp.eq.s32.totalorder %v1510_v7, %v4037_v39  ;;  %v5389_v34 = vadd.s32 %v2705_v20, %v2704_v19 }
 0x33f   :  { %v1839_v22 = vadd.s32 %v1838_v23, %v1837_v55  ;;  %v1852_v3 = vrot.slane %v1851_v54, 2  ;;  %vm1574_vm9 = vcmp.eq.s32.totalorder %v1510_v7, %v4040_v40  ;;  %v1635_v42 = vsel %vm1571_vm6, 1, %v5813_v37 }
 0x340   :  { %v5392_v24 = vadd.s32 %v1845_v8, %v1844_v4  ;;  %v1859_v57 = vrot.slane %v1858_v10, 2  ;;  %v1636_v28 = vsel %vm1572_vm7, 1, %v5813_v37  ;;  %v1637_v58 = vsel %vm1573_vm8, 1, %v5813_v37 }
 0x341   :  { %v1840_v9 = vrot.slane %v1839_v22, 1  ;;  %v1853_v12 = vadd.s32 %v1852_v3, %v1851_v54  ;;  %v1638_v18 = vsel %vm1574_vm9, 1, %v5813_v37  ;;  %v5398_v19 = vpack.c.bf16 %v2915_v2, %v2915_v2 }
 0x342   :  { %v5400_v59 = vpack.c.bf16 %v2917_v13, %v2917_v13  ;;  %v2059_v61 = vsel %vm294_vm2, %v1635_v42, 0  ;;  %v2066_v7 = vsel %vm294_vm2, %v1636_v28, 0  ;;  %v5405_v49 = vadd.s32 %v1859_v57, %v1858_v10 }
 0x343   :  { %5941 = vst [vmem:[#allocation68_spill] sm:$0xff] %v5398_v19  ;;  %v2060_v55 = vrot.slane %v2059_v61, 4  ;;  %v2067_v25 = vrot.slane %v2066_v7, 4  ;;  %v5407_v4 = vadd.s32 %v1840_v9, %v1839_v22  ;;  %v2073_v43 = vsel %vm294_vm2, %v1637_v58, 0 }
 0x344   :  { %5942 = vst [vmem:[#allocation69_spill] sm:$0xff] %v5400_v59  ;;  %v2080_v23 = vsel %vm294_vm2, %v1638_v18, 0  ;;  %vm2235_vm10 = vcmp.eq.s32.totalorder %v2174_v56, %v3998_v5  ;;  %v1854_v2 = vrot.slane %v1853_v12, 1  ;;  %v2074_v8 = vrot.slane %v2073_v43, 4 }
 0x345   :  { %v2061_v54 = vadd.s32 %v2060_v55, %v2059_v61  ;;  %v2068_v13 = vadd.s32 %v2067_v25, %v2066_v7  ;;  %v2081_v3 = vrot.slane %v2080_v23, 4  ;;  %vm2236_vm11 = vcmp.eq.s32.totalorder %v2174_v56, %v4034_v38 }
 0x346   :  { %vm2237_vm12 = vcmp.eq.s32.totalorder %v2174_v56, %v4037_v39  ;;  %vm2238_vm13 = vcmp.eq.s32.totalorder %v2174_v56, %v4040_v40  ;;  %v2075_v57 = vadd.s32 %v2074_v8, %v2073_v43  ;;  %v2299_v42 = vsel %vm2235_vm10, 1, %v5813_v37 }
 0x347   :  { %v2062_v10 = vrot.slane %v2061_v54, 2  ;;  %v2069_v22 = vrot.slane %v2068_v13, 2  ;;  %v2082_v28 = vadd.s32 %v2081_v3, %v2080_v23  ;;  %v2300_v9 = vsel %vm2236_vm11, 1, %v5813_v37 }
 0x348   :  { %v2301_v58 = vsel %vm2237_vm12, 1, %v5813_v37  ;;  %v2302_v18 = vsel %vm2238_vm13, 1, %v5813_v37  ;;  %v2076_v55 = vrot.slane %v2075_v57, 2  ;;  %v2483_v25 = vsel %vm294_vm2, %v2299_v42, 0 }
 0x349   :  { %v2063_v61 = vadd.s32 %v2062_v10, %v2061_v54  ;;  %v5419_v7 = vadd.s32 %v2069_v22, %v2068_v13  ;;  %v2083_v20 = vrot.slane %v2082_v28, 2  ;;  %v2484_v56 = vrot.slane %v2483_v25, 4 }
 0x34a   :  { %v2490_v59 = vsel %vm294_vm2, %v2300_v9, 0  ;;  %v2497_v43 = vsel %vm294_vm2, %v2301_v58, 0  ;;  %v2077_v3 = vadd.s32 %v2076_v55, %v2075_v57  ;;  %v5425_v16 = vadd.s32 %v1854_v2, %v1853_v12 }
 0x34b   :  { %v2064_v8 = vrot.slane %v2063_v61, 1  ;;  %v2491_v11 = vrot.slane %v2490_v59, 4  ;;  %v2485_v54 = vadd.s32 %v2484_v56, %v2483_v25  ;;  %v2498_v13 = vrot.slane %v2497_v43, 4 }
 0x34c   :  { %5943 = vst [vmem:[#allocation70_spill] sm:$0xff] %v5425_v16  ;;  %v2504_v10 = vsel %vm294_vm2, %v2302_v18, 0  ;;  %v5429_v42 = vadd.s32 %v2083_v20, %v2082_v28  ;;  %vm2267_vm14 = vcmp.eq.s32.totalorder %v2206_v32, %v3998_v5  ;;  %v2078_v57 = vrot.slane %v2077_v3, 1 }
 0x34d   :  { %v2492_v26 = vadd.s32 %v2491_v11, %v2490_v59  ;;  %v2505_v9 = vrot.slane %v2504_v10, 4  ;;  %v5431_v14 = vadd.s32 %v2064_v8, %v2063_v61  ;;  %v2486_v58 = vrot.slane %v2485_v54, 2 }
 0x34e   :  { %v2499_v23 = vadd.s32 %v2498_v13, %v2497_v43  ;;  %vm2268_vm15 = vcmp.eq.s32.totalorder %v2206_v32, %v4034_v38  ;;  %vm2269_vm0 = vcmp.eq.s32.totalorder %v2206_v32, %v4037_v39  ;;  %vm2270_vm1 = vcmp.eq.s32.totalorder %v2206_v32, %v4040_v40 }
 0x34f   :  { %v2493_v55 = vrot.slane %v2492_v26, 2  ;;  %v2506_v12 = vadd.s32 %v2505_v9, %v2504_v10  ;;  %v2487_v2 = vadd.s32 %v2486_v58, %v2485_v54  ;;  %v2331_v59 = vsel %vm2267_vm14, 1, %v5813_v37 }
 0x350   :  { %v2500_v25 = vrot.slane %v2499_v23, 2  ;;  %v2332_v28 = vsel %vm2268_vm15, 1, %v5813_v37  ;;  %v2333_v56 = vsel %vm2269_vm0, 1, %v5813_v37  ;;  %v2334_v43 = vsel %vm2270_vm1, 1, %v5813_v37 }
 0x351   :  { %v2494_v20 = vadd.s32 %v2493_v55, %v2492_v26  ;;  %v2507_v11 = vrot.slane %v2506_v12, 2  ;;  %v2488_v18 = vrot.slane %v2487_v2, 1  ;;  %v2707_v54 = vsel %vm294_vm2, %v2331_v59, 0  ;;  %v2178_v55 = vpop.permute.xlu0 %2177 }
 0x352   :  { %v2501_v61 = vadd.s32 %v2500_v25, %v2499_v23  ;;  %v2714_v10 = vsel %vm294_vm2, %v2332_v28, 0  ;;  %v2708_v26 = vrot.slane %v2707_v54, 4  ;;  %v5443_v22 = vadd.s32 %v2078_v57, %v2077_v3 }
 0x353   :  { %v2495_v8 = vrot.slane %v2494_v20, 1  ;;  %v2508_v13 = vadd.s32 %v2507_v11, %v2506_v12  ;;  %v2489_v9 = vadd.s32 %v2488_v18, %v2487_v2  ;;  %v2715_v58 = vrot.slane %v2714_v10, 4 }
 0x354   :  { %v2502_v32 = vrot.slane %v2501_v61, 1  ;;  %5944 = vst [vmem:[#allocation71_spill] sm:$0xff] %v5443_v22  ;;  %v2721_v23 = vsel %vm294_vm2, %v2333_v56, 0  ;;  %v2728_v25 = vsel %vm294_vm2, %v2334_v43, 0  ;;  %v2709_v11 = vadd.s32 %v2708_v26, %v2707_v54  ;;  %v2210_v22 = vpop.permute.xlu1 %2209 }
 0x355   :  { %v5448_v16 = vadd.s32 %v2495_v8, %v2494_v20  ;;  %v2509_v12 = vrot.slane %v2508_v13, 1  ;;  %v2716_v59 = vadd.s32 %v2715_v58, %v2714_v10  ;;  %v2722_v28 = vrot.slane %v2721_v23, 4 }
 0x356   :  { %v2503_v19 = vadd.s32 %v2502_v32, %v2501_v61  ;;  %v2729_v2 = vrot.slane %v2728_v25, 4  ;;  %vm2239_vm3 = vcmp.eq.s32.totalorder %v2178_v55, %v3998_v5  ;;  %v5452_v18 = vadd.s32 %v2489_v9, %v5220_v27 }
 0x357   :  { %v2710_v3 = vrot.slane %v2709_v11, 2  ;;  %v2717_v57 = vrot.slane %v2716_v59, 2  ;;  %vm2240_vm4 = vcmp.eq.s32.totalorder %v2178_v55, %v4034_v38  ;;  %v2723_v56 = vadd.s32 %v2722_v28, %v2721_v23 }
 0x358   :  { %5945 = vst [vmem:[#allocation72_spill] sm:$0xff] %v5452_v18  ;;  %v2730_v50 = vadd.s32 %v2729_v2, %v2728_v25  ;;  %vm2241_vm5 = vcmp.eq.s32.totalorder %v2178_v55, %v4037_v39  ;;  %vm2242_vm6 = vcmp.eq.s32.totalorder %v2178_v55, %v4040_v40  ;;  %v2303_v61 = vsel %vm2239_vm3, 1, %v5813_v37 }
 0x359   :  { %v2711_v20 = vadd.s32 %v2710_v3, %v2709_v11  ;;  %v2718_v43 = vadd.s32 %v2717_v57, %v2716_v59  ;;  %v2304_v8 = vsel %vm2240_vm4, 1, %v5813_v37  ;;  %v2724_v54 = vrot.slane %v2723_v56, 2 }
 0x35a   :  { %v2731_v10 = vrot.slane %v2730_v50, 2  ;;  %v2305_v27 = vsel %vm2241_vm5, 1, %v5813_v37  ;;  %v2306_v9 = vsel %vm2242_vm6, 1, %v5813_v37  ;;  %v2511_v58 = vsel %vm294_vm2, %v2303_v61, 0 }
 0x35b   :  { %v2712_v32 = vrot.slane %v2711_v20, 1  ;;  %v2719_v26 = vrot.slane %v2718_v43, 1  ;;  %v2518_v23 = vsel %vm294_vm2, %v2304_v8, 0  ;;  %v2725_v25 = vadd.s32 %v2724_v54, %v2723_v56 }
 0x35c   :  { %v2732_v55 = vadd.s32 %v2731_v10, %v2730_v50  ;;  %v2512_v11 = vrot.slane %v2511_v58, 4  ;;  %v2519_v59 = vrot.slane %v2518_v23, 4  ;;  %v5463_v28 = vadd.s32 %v2509_v12, %v2508_v13 }
 0x35d   :  { %v5466_v2 = vadd.s32 %v2503_v19, %v5223_v6  ;;  %v2525_v3 = vsel %vm294_vm2, %v2305_v27, 0  ;;  %v2532_v57 = vsel %vm294_vm2, %v2306_v9, 0  ;;  %v2713_v52 = vadd.s32 %v2712_v32, %v2711_v20 }
 0x35e   :  { %v2726_v18 = vrot.slane %v2725_v25, 1  ;;  %v2513_v29 = vadd.s32 %v2512_v11, %v2511_v58  ;;  %v2520_v61 = vadd.s32 %v2519_v59, %v2518_v23  ;;  %v5470_v53 = vadd.s32 %v2719_v26, %v2718_v43  ;;  %v2182_v11 = vpop.permute.xlu0 %2181 }
 0x35f   :  { %5946 = vst [vmem:[#allocation73_spill] sm:$0xff] %v5466_v2  ;;  %v2733_v56 = vrot.slane %v2732_v55, 1  ;;  %v2526_v50 = vrot.slane %v2525_v3, 4  ;;  %v2533_v8 = vrot.slane %v2532_v57, 4  ;;  %vm2271_vm7 = vcmp.eq.s32.totalorder %v2210_v22, %v3998_v5 }
 0x360   :  { %v2727_v54 = vadd.s32 %v2726_v18, %v2725_v25  ;;  %v2514_v13 = vrot.slane %v2513_v29, 2  ;;  %v2521_v12 = vrot.slane %v2520_v61, 2  ;;  %vm2272_vm8 = vcmp.eq.s32.totalorder %v2210_v22, %v4034_v38 }
 0x361   :  { %v2527_v6 = vadd.s32 %v2526_v50, %v2525_v3  ;;  %v2534_v19 = vadd.s32 %v2533_v8, %v2532_v57  ;;  %vm2273_vm9 = vcmp.eq.s32.totalorder %v2210_v22, %v4037_v39  ;;  %v5476_v20 = vadd.s32 %v2713_v52, %v5253_v35 }
 0x362   :  { %v2515_v10 = vadd.s32 %v2514_v13, %v2513_v29  ;;  %v5478_v43 = vadd.s32 %v2521_v12, %v2520_v61  ;;  %vm2274_vm10 = vcmp.eq.s32.totalorder %v2210_v22, %v4040_v40  ;;  %v2335_v9 = vsel %vm2271_vm7, 1, %v5813_v37 }
 0x363   :  { %5947 = vst [vmem:[#allocation74_spill] sm:$0xff] %v5476_v20  ;;  %v2528_v27 = vrot.slane %v2527_v6, 2  ;;  %v2535_v18 = vrot.slane %v2534_v19, 2  ;;  %v2336_v32 = vsel %vm2272_vm8, 1, %v5813_v37  ;;  %v5483_v26 = vadd.s32 %v2733_v56, %v2732_v55 }
 0x364   :  { %v2516_v58 = vrot.slane %v2515_v10, 1  ;;  %v2337_v23 = vsel %vm2273_vm9, 1, %v5813_v37  ;;  %v2338_v25 = vsel %vm2274_vm10, 1, %v5813_v37  ;;  %v5488_v35 = vadd.s32 %v2727_v54, %v5261_v0 }
 0x365   :  { %v2529_v29 = vadd.s32 %v2528_v27, %v2527_v6  ;;  %v2735_v52 = vsel %vm294_vm2, %v2335_v9, 0  ;;  %v2742_v22 = vsel %vm294_vm2, %v2336_v32, 0  ;;  %v2749_v55 = vsel %vm294_vm2, %v2337_v23, 0 }
 0x366   :  { %5948 = vst [vmem:[#allocation75_spill] sm:$0xff] %v5488_v35  ;;  %v2736_v3 = vrot.slane %v2735_v52, 4  ;;  %v2743_v57 = vrot.slane %v2742_v22, 4  ;;  %v5494_v61 = vadd.s32 %v2516_v58, %v2515_v10  ;;  %v5496_v56 = vadd.s32 %v2535_v18, %v2534_v19  ;;  %v2214_v35 = vpop.permute.xlu1 %2213 }
 0x367   :  { %v2750_v50 = vrot.slane %v2749_v55, 4  ;;  %v2756_v0 = vsel %vm294_vm2, %v2338_v25, 0  ;;  %vm2243_vm11 = vcmp.eq.s32.totalorder %v2182_v11, %v3998_v5  ;;  %v2530_v12 = vrot.slane %v2529_v29, 1 }
 0x368   :  { %v2737_v8 = vadd.s32 %v2736_v3, %v2735_v52  ;;  %v2744_v54 = vadd.s32 %v2743_v57, %v2742_v22  ;;  %v2757_v13 = vrot.slane %v2756_v0, 4  ;;  %vm2244_vm12 = vcmp.eq.s32.totalorder %v2182_v11, %v4034_v38 }
 0x369   :  { %v2751_v6 = vadd.s32 %v2750_v50, %v2749_v55  ;;  %vm2245_vm13 = vcmp.eq.s32.totalorder %v2182_v11, %v4037_v39  ;;  %vm2246_vm14 = vcmp.eq.s32.totalorder %v2182_v11, %v4040_v40  ;;  %v2307_v18 = vsel %vm2243_vm11, 1, %v5813_v37 }
 0x36a   :  { %v2738_v27 = vrot.slane %v2737_v8, 2  ;;  %v2745_v9 = vrot.slane %v2744_v54, 2  ;;  %v2758_v10 = vadd.s32 %v2757_v13, %v2756_v0  ;;  %v2308_v32 = vsel %vm2244_vm12, 1, %v5813_v37 }
 0x36b   :  { %v2752_v19 = vrot.slane %v2751_v6, 2  ;;  %v2309_v58 = vsel %vm2245_vm13, 1, %v5813_v37  ;;  %v2310_v22 = vsel %vm2246_vm14, 1, %v5813_v37  ;;  %v2539_v57 = vsel %vm294_vm2, %v2307_v18, 0 }
 0x36c   :  { %v2739_v23 = vadd.s32 %v2738_v27, %v2737_v8  ;;  %v5506_v25 = vadd.s32 %v2745_v9, %v2744_v54  ;;  %v2759_v52 = vrot.slane %v2758_v10, 2  ;;  %v2546_v55 = vsel %vm294_vm2, %v2308_v32, 0 }
 0x36d   :  { %v2753_v3 = vadd.s32 %v2752_v19, %v2751_v6  ;;  %v2553_v11 = vsel %vm294_vm2, %v2309_v58, 0  ;;  %v5512_v50 = vadd.s32 %v2530_v12, %v2529_v29  ;;  %v2540_v59 = vrot.slane %v2539_v57, 4 }
 0x36e   :  { %v2740_v13 = vrot.slane %v2739_v23, 1  ;;  %v5515_v8 = vadd.s32 %v2759_v52, %v2758_v10  ;;  %v2547_v54 = vrot.slane %v2546_v55, 4  ;;  %v2554_v27 = vrot.slane %v2553_v11, 4 }
 0x36f   :  { %5949 = vst [vmem:[#allocation76_spill] sm:$0xff] %v5512_v50  ;;  %v2560_v9 = vsel %vm294_vm2, %v2310_v22, 0  ;;  %v2754_v19 = vrot.slane %v2753_v3, 1  ;;  %v2541_v18 = vadd.s32 %v2540_v59, %v2539_v57  ;;  %vm2275_vm15 = vcmp.eq.s32.totalorder %v2214_v35, %v3998_v5  ;;  %v5952_v50 = vld [vmem:[#allocation48_spill] sm:$0xff] }
 0x370   :  { %v2561_v32 = vrot.slane %v2560_v9, 4  ;;  %v5519_v2 = vadd.s32 %v2740_v13, %v2739_v23  ;;  %v2548_v29 = vadd.s32 %v2547_v54, %v2546_v55  ;;  %v2555_v12 = vadd.s32 %v2554_v27, %v2553_v11 }
 0x371   :  { %v2542_v58 = vrot.slane %v2541_v18, 2  ;;  %vm2276_vm0 = vcmp.eq.s32.totalorder %v2214_v35, %v4034_v38  ;;  %vm2277_vm1 = vcmp.eq.s32.totalorder %v2214_v35, %v4037_v39  ;;  %vm2278_vm3 = vcmp.eq.s32.totalorder %v2214_v35, %v4040_v40 }
 0x372   :  { %5950 = vst [vmem:[#allocation77_spill] sm:$0xff] %v5519_v2  ;;  %v2562_v0 = vadd.s32 %v2561_v32, %v2560_v9  ;;  %v2556_v52 = vrot.slane %v2555_v12, 2  ;;  %v2339_v59 = vsel %vm2275_vm15, 1, %v5813_v37  ;;  %v2549_v23 = vrot.slane %v2548_v29, 2  ;;  %v5953_v2 = vld [vmem:[#allocation33_spill] sm:$0xff] }
 0x373   :  { %v2543_v22 = vadd.s32 %v2542_v58, %v2541_v18  ;;  %v2340_v57 = vsel %vm2276_vm0, 1, %v5813_v37  ;;  %v2341_v55 = vsel %vm2277_vm1, 1, %v5813_v37  ;;  %v2342_v13 = vsel %vm2278_vm3, 1, %v5813_v37 }
 0x374   :  { %v2557_v5 = vadd.s32 %v2556_v52, %v2555_v12  ;;  %v2563_v11 = vrot.slane %v2562_v0, 2  ;;  %v2763_v38 = vsel %vm294_vm2, %v2339_v59, 0  ;;  %v5531_v39 = vadd.s32 %v2754_v19, %v2753_v3 }
 0x375   :  { %v2544_v54 = vrot.slane %v2543_v22, 1  ;;  %v2764_v27 = vrot.slane %v2763_v38, 4  ;;  %v2770_v40 = vsel %vm294_vm2, %v2340_v57, 0  ;;  %v2777_v18 = vsel %vm294_vm2, %v2341_v55, 0 }
 0x376   :  { %5951 = vst [vmem:[#allocation78_spill] sm:$0xff] %v5531_v39  ;;  %v2558_v35 = vrot.slane %v2557_v5, 1  ;;  %v2771_v9 = vrot.slane %v2770_v40, 4  ;;  %v2784_v32 = vsel %vm294_vm2, %v2342_v13, 0  ;;  %v2550_v58 = vadd.s32 %v2549_v23, %v2548_v29  ;;  %v5954_v23 = vld [vmem:[#allocation46_spill] sm:$0xff] }
 0x377   :  { %v2765_v10 = vadd.s32 %v2764_v27, %v2763_v38  ;;  %v2778_v12 = vrot.slane %v2777_v18, 4  ;;  %v2785_v52 = vrot.slane %v2784_v32, 4  ;;  %v5536_v6 = vadd.s32 %v2544_v54, %v2543_v22  ;;  %v5955_v13 = vld [vmem:[#allocation50_spill] sm:$0xff] }
 0x378   :  { %v5538_v37 = vadd.s32 %v2558_v35, %v2557_v5  ;;  %v5540_v3 = vadd.s32 %v2563_v11, %v2562_v0  ;;  %v2772_v19 = vadd.s32 %v2771_v9, %v2770_v40  ;;  %v1408_v20 = vadd.s32 %v5952_v50, %v4932_v44  ;;  %v5958_v50 = vld [vmem:[#allocation34_spill] sm:$0xff] }
 0x379   :  { %v2766_v59 = vrot.slane %v2765_v10, 2  ;;  %v2779_v39 = vadd.s32 %v2778_v12, %v2777_v18  ;;  %v2786_v57 = vadd.s32 %v2785_v52, %v2784_v32  ;;  %v1412_v29 = vadd.s32 %v5157_v1, %v5953_v2  ;;  %v5959_v32 = vld [vmem:[#allocation36_spill] sm:$0xff]  ;;  %v5960_v12 = vld [vmem:[#allocation57_spill] sm:$0xff] }
 0x37a   :  { %v2773_v55 = vrot.slane %v2772_v19, 2  ;;  %v1440_v38 = vadd.s32 %v5955_v13, %v5954_v23  ;;  %v5956_v22 = vrot.slane %v5392_v24, 1  ;;  %v5957_v27 = vrot.slane %v5419_v7, 1 }
 0x37b   :  { %v2767_v0 = vadd.s32 %v2766_v59, %v2765_v10  ;;  %v2780_v11 = vrot.slane %v2779_v39, 2  ;;  %v2787_v54 = vrot.slane %v2786_v57, 2  ;;  %v1444_v44 = vadd.s32 %v5179_v47, %v5151_v41 }
 0x37c   :  { %v1848_v5 = vadd.s32 %v5956_v22, %v5392_v24  ;;  %v2072_v40 = vadd.s32 %v5957_v27, %v5419_v7  ;;  %v2774_v35 = vadd.s32 %v2773_v55, %v2772_v19  ;;  %v2108_v1 = vadd.s32 %v5201_v33, %v5958_v50  ;;  %v5963_v55 = vld [vmem:[#allocation26_spill] sm:$0xff] }
 0x37d   :  { %v2112_v2 = vadd.s32 %v5316_v46, %v1408_v20  ;;  %v2768_v9 = vrot.slane %v2767_v0, 1  ;;  %v5559_v18 = vadd.s32 %v2780_v11, %v2779_v39  ;;  %v5561_v24 = vadd.s32 %v2787_v54, %v2786_v57 }
 0x37e   :  { %v2116_v10 = vadd.s32 %v1848_v5, %v1412_v29  ;;  %v2140_v52 = vadd.s32 %v5960_v12, %v5959_v32  ;;  %v2144_v7 = vadd.s32 %v5338_v45, %v1440_v38  ;;  %v5961_v19 = vrot.slane %v5478_v43, 1 }
 0x37f   :  { %v2551_v47 = vrot.slane %v2550_v58, 1  ;;  %v5569_v59 = vadd.s32 %v2768_v9, %v2767_v0  ;;  %v2148_v33 = vadd.s32 %v2072_v40, %v1444_v44  ;;  %v5962_v46 = vrot.slane %v5506_v25, 1 }
 0x380   :  { %v2524_v41 = vadd.s32 %v5961_v19, %v5478_v43  ;;  %v2775_v39 = vrot.slane %v2774_v35, 1  ;;  %v2808_v29 = vadd.s32 %v5361_v31, %v5963_v55  ;;  %v2812_v23 = vadd.s32 %v5448_v16, %v2108_v1  ;;  %v5964_v43 = vld [vmem:[#allocation28_spill] sm:$0xff] }
 0x381   :  { %v2748_v20 = vadd.s32 %v5962_v46, %v5506_v25  ;;  %v2552_v57 = vadd.s32 %v2551_v47, %v2550_v58  ;;  %v2782_v13 = vrot.slane %v5559_v18, 1  ;;  %v2840_v22 = vadd.s32 %v5384_v15, %v5964_v43 }
 0x382   :  { %v2816_v45 = vadd.s32 %v2524_v41, %v2112_v2  ;;  %v2776_v38 = vadd.s32 %v2775_v39, %v2774_v35  ;;  %v2844_v5 = vadd.s32 %v5470_v53, %v2140_v52  ;;  %v2884_v54 = vcvt.s32.f32 %v2808_v29 }
 0x383   :  { %v2820_v0 = vadd.s32 %v2552_v57, %v2116_v10  ;;  %v2848_v11 = vadd.s32 %v2748_v20, %v2144_v7  ;;  %v2888_v25 = vcvt.s32.f32 %v2812_v23  ;;  %v2916_v40 = vcvt.s32.f32 %v2840_v22  ;;  %v5971_v22 = vld [vmem:[#allocation20_spill] sm:$0xff] }
 0x384   :  { %v2852_v27 = vadd.s32 %v2776_v38, %v2148_v33  ;;  %v2892_v58 = vcvt.s32.f32 %v2816_v45  ;;  %v2920_v44 = vcvt.s32.f32 %v2844_v5  ;;  %v5965_v16 = vcvt.s32.f32 %v5256_v36  ;;  %v5969_v45 = vld [vmem:[#allocation42_spill] sm:$0xff] }
 0x385   :  { %v2896_v31 = vcvt.s32.f32 %v2820_v0  ;;  %v2924_v50 = vcvt.s32.f32 %v2848_v11  ;;  %v2948_v35 = vpack.c.bf16 %v2884_v54, %v2884_v54  ;;  %v2952_v9 = vpack.c.bf16 %v2888_v25, %v2888_v25  ;;  %v5973_v0 = vld [vmem:[#allocation24_spill] sm:$0xff]  ;;  %v5975_v25 = vld [vmem:[#allocation10_spill] sm:$0xff] }
 0x386   :  { %v2944_v1 = vpack.c.bf16 %v5965_v16, %v5965_v16  ;;  %v2928_v2 = vcvt.s32.f32 %v2852_v27  ;;  %v2956_v15 = vpack.c.bf16 %v2892_v58, %v2892_v58  ;;  %v5966_v53 = vcvt.s32.f32 %v5279_v51  ;;  %v5967_v51 = vld [vmem:[#allocation39_spill] sm:$0xff]  ;;  %v5980_v16 = vld [vmem:[#allocation49_spill] sm:$0xff] }
 0x387   :  { %v2960_v32 = vpack.c.bf16 %v2896_v31, %v2896_v31  ;;  %v2980_v12 = vpack.c.bf16 %v2916_v40, %v2916_v40  ;;  %v2984_v52 = vpack.c.bf16 %v2920_v44, %v2920_v44  ;;  %v2988_v7 = vpack.c.bf16 %v2924_v50, %v2924_v50  ;;  %v5977_v40 = vld [vmem:[#allocation31_spill] sm:$0xff]  ;;  %v5979_v50 = vld [vmem:[#allocation45_spill] sm:$0xff] }
 0x388   :  { %v2976_v10 = vpack.c.bf16 %v5966_v53, %v5966_v53  ;;  %v2992_v19 = vpack.c.bf16 %v2928_v2, %v2928_v2  ;;  %v3136_v41 = vunpack.c.l.b16 %v2944_v1  ;;  %v3140_v47 = vunpack.c.l.b16 %v2948_v35  ;;  %v5981_v35 = vld [vmem:[#allocation14_spill] sm:$0xff]  ;;  %v5982_v2 = vld [vmem:[#allocation16_spill] sm:$0xff] }
 0x389   :  { %v3144_v33 = vunpack.c.l.b16 %v2952_v9  ;;  %v3148_v46 = vunpack.c.l.b16 %v2956_v15  ;;  %v3152_v36 = vunpack.c.l.b16 %v2960_v32  ;;  %v3172_v39 = vunpack.c.l.b16 %v2980_v12  ;;  %v5984_v32 = vld [vmem:[#allocation51_spill] sm:$0xff] }
 0x38a   :  { %v3168_v20 = vunpack.c.l.b16 %v2976_v10  ;;  %v3176_v57 = vunpack.c.l.b16 %v2984_v52  ;;  %v3180_v55 = vunpack.c.l.b16 %v2988_v7  ;;  %v3184_v29 = vunpack.c.l.b16 %v2992_v19  ;;  %v5983_v10 = vld [vmem:[#allocation47_spill] sm:$0xff]  ;;  %v5986_v7 = vld [vmem:[#allocation53_spill] sm:$0xff] }
 0x38b   :  { %vm3187_vm2 = vcmask 1041409   ;;  %vm3189_vm4 = vcmask 1042434   ;;  %vm3191_vm5 = vcmask 1043459   ;;  %vm3193_vm6 = vcmask 1044484   ;;  %v5985_v52 = vld [vmem:[#allocation15_spill] sm:$0xff] }
 0x38c   :  { %vm3195_vm7 = vcmask 1045509   ;;  %vm3197_vm8 = vcmask 1046534   ;;  %vm3199_vm9 = vcmask 1047559   ;;  %v5968_v23 = vunpack.c.l.b16 %v5967_v51 }
 0x38d   :  { %v5970_v38 = vunpack.c.l.b16 %v5969_v45  ;;  %v5972_v5 = vunpack.c.l.b16 %v5971_v22  ;;  %v5974_v11 = vunpack.c.l.b16 %v5973_v0  ;;  %v5976_v27 = vunpack.c.l.b16 %v5975_v25  ;;  %v5990_v0 = vld [vmem:[#allocation56_spill] sm:$0xff] }
 0x38e   :  { %v5978_v44 = vunpack.c.l.b16 %v5977_v40  ;;  %v1410_v1 = vadd.s32 %v5980_v16, %v5979_v50  ;;  %v1414_v9 = vadd.s32 %v5982_v2, %v5981_v35  ;;  %v1442_v12 = vadd.s32 %v5984_v32, %v5983_v10  ;;  %v5994_v50 = vld [vmem:[#allocation27_spill] sm:$0xff] }
 0x38f   :  { %v3201_v43 = vsel %vm3187_vm2, %v5970_v38, %v5968_v23  ;;  %v3229_v54 = vsel %vm3187_vm2, %v5974_v11, %v5972_v5  ;;  %v1446_v19 = vadd.s32 %v5986_v7, %v5985_v52  ;;  %v5987_v45 = vrot.slane %v5405_v49, 1  ;;  %v5989_v5 = vld [vmem:[#allocation35_spill] sm:$0xff] }
 0x390   :  { %v3202_v58 = vsel %vm3189_vm4, %v5976_v27, %v3201_v43  ;;  %v3230_v31 = vsel %vm3189_vm4, %v5978_v44, %v3229_v54  ;;  %v5988_v43 = vrot.slane %v5429_v42, 1  ;;  %v2110_v11 = vadd.s32 %v5990_v0, %v5989_v5  ;;  %v5991_v27 = vld [vmem:[#allocation37_spill] sm:$0xff] }
 0x391   :  { %v3203_v15 = vsel %vm3191_vm5, %v3136_v41, %v3202_v58  ;;  %v3231_v53 = vsel %vm3191_vm5, %v3168_v20, %v3230_v31  ;;  %v1862_v38 = vadd.s32 %v5987_v45, %v5405_v49  ;;  %v2114_v54 = vadd.s32 %v5319_v21, %v1410_v1 }
 0x392   :  { %v3204_v51 = vsel %vm3193_vm6, %v3140_v47, %v3203_v15  ;;  %v3232_v23 = vsel %vm3193_vm6, %v3172_v39, %v3231_v53  ;;  %v2086_v41 = vadd.s32 %v5988_v43, %v5429_v42  ;;  %v2142_v49 = vadd.s32 %v5247_v60, %v5991_v27  ;;  %v5998_v27 = vld [vmem:[#allocation41_spill] sm:$0xff] }
 0x393   :  { %v3205_v20 = vsel %vm3195_vm7, %v3144_v33, %v3204_v51  ;;  %v3233_v22 = vsel %vm3195_vm7, %v3176_v57, %v3232_v23  ;;  %v2118_v25 = vadd.s32 %v1862_v38, %v1414_v9  ;;  %v2146_v33 = vadd.s32 %v5354_v63, %v1442_v12  ;;  %v5995_v63 = vld [vmem:[#allocation29_spill] sm:$0xff] }
 0x394   :  { %v3206_v47 = vsel %vm3197_vm8, %v3148_v46, %v3205_v20  ;;  %v3234_v39 = vsel %vm3197_vm8, %v3180_v55, %v3233_v22  ;;  %v2150_v57 = vadd.s32 %v2086_v41, %v1446_v19  ;;  %v5992_v44 = vrot.slane %v5496_v56, 1 }
 0x395   :  { %v3207_v58 = vsel %vm3199_vm9, %v3152_v36, %v3206_v47  ;;  %v3235_v42 = vsel %vm3199_vm9, %v3184_v29, %v3234_v39  ;;  %v2565_v46 = vrot.slane %v5540_v3, 1  ;;  %v5993_v55 = vrot.slane %v5515_v8, 1 }
 0x396   :  { %v3251_v40 = vpack.c.b16 %v3235_v42, %v3207_v58  ;;  %v2538_v21 = vadd.s32 %v5992_v44, %v5496_v56  ;;  %v2789_v60 = vrot.slane %v5561_v24, 1  ;;  %v2810_v36 = vadd.s32 %v5368_v62, %v5994_v50 }
 0x397   :  { %v2762_v31 = vadd.s32 %v5993_v55, %v5515_v8  ;;  %v2814_v29 = vadd.s32 %v5463_v28, %v2110_v11  ;;  %v2842_v16 = vadd.s32 %v5389_v34, %v5995_v63  ;;  %v2566_v1 = vadd.s32 %v2565_v46, %v5540_v3  ;;  %v6006_v55 = vld [vmem:[#allocation12_spill] sm:$0xff] }
 0x398   :  { %3610 = vmatprep.mubr.bf16.mxu1 %v3251_v40  ;;  %v2818_v56 = vadd.s32 %v2538_v21, %v2114_v54  ;;  %v2846_v35 = vadd.s32 %v5483_v26, %v2142_v49  ;;  %v2790_v9 = vadd.s32 %v2789_v60, %v5561_v24  ;;  %v2886_v8 = vcvt.s32.f32 %v2810_v36  ;;  %v6004_v40 = vld [vmem:[#allocation9_spill] sm:$0xff] }
 0x399   :  { %v2850_v2 = vadd.s32 %v2762_v31, %v2146_v33  ;;  %v2890_v15 = vcvt.s32.f32 %v2814_v29  ;;  %v2918_v53 = vcvt.s32.f32 %v2842_v16  ;;  %v2822_v10 = vadd.s32 %v2566_v1, %v2118_v25  ;;  %v6002_v33 = vld [vmem:[#allocation22_spill] sm:$0xff]  ;;  %v6009_v29 = vld [vmem:[#allocation17_spill] sm:$0xff] }
 0x39a   :  { %v2894_v32 = vcvt.s32.f32 %v2818_v56  ;;  %v2922_v62 = vcvt.s32.f32 %v2846_v35  ;;  %v2854_v28 = vadd.s32 %v2790_v9, %v2150_v57  ;;  %v5996_v52 = vcvt.s32.f32 %v5264_v48  ;;  %v6010_v56 = vld [vmem:[#allocation54_spill] sm:$0xff] }
 0x39b   :  { %v2926_v12 = vcvt.s32.f32 %v2850_v2  ;;  %v2950_v7 = vpack.c.bf16 %v2886_v8, %v2886_v8  ;;  %v2954_v3 = vpack.c.bf16 %v2890_v15, %v2890_v15  ;;  %v2898_v19 = vcvt.s32.f32 %v2822_v10  ;;  %v6011_v2 = vld [vmem:[#allocation62_spill] sm:$0xff]  ;;  %v6013_v10 = vld [vmem:[#allocation77_spill] sm:$0xff] }
 0x39c   :  { %v2946_v34 = vpack.c.bf16 %v5996_v52, %v5996_v52  ;;  %v2958_v51 = vpack.c.bf16 %v2894_v32, %v2894_v32  ;;  %v5997_v26 = vcvt.s32.f32 %v5292_v30  ;;  %v2982_v23 = vpack.c.bf16 %v2918_v53, %v2918_v53  ;;  %v6000_v30 = vld [vmem:[#allocation44_spill] sm:$0xff] }
 0x39d   :  { %v2930_v45 = vcvt.s32.f32 %v2854_v28  ;;  %v2986_v38 = vpack.c.bf16 %v2922_v62, %v2922_v62  ;;  %v2990_v43 = vpack.c.bf16 %v2926_v12, %v2926_v12  ;;  %v2962_v20 = vpack.c.bf16 %v2898_v19, %v2898_v19  ;;  %v6012_v53 = vld [vmem:[#allocation64_spill] sm:$0xff]  ;;  %v6015_v19 = vld [vmem:[#allocation74_spill] sm:$0xff] }
 0x39e   :  { %v2978_v24 = vpack.c.bf16 %v5997_v26, %v5997_v26  ;;  %v3138_v41 = vunpack.c.l.b16 %v2946_v34  ;;  %v3142_v22 = vunpack.c.l.b16 %v2950_v7  ;;  %v3146_v5 = vunpack.c.l.b16 %v2954_v3  ;;  %v6014_v28 = vld [vmem:[#allocation72_spill] sm:$0xff] }
 0x39f   :  { %v3150_v0 = vunpack.c.l.b16 %v2958_v51  ;;  %v2994_v48 = vpack.c.bf16 %v2930_v45, %v2930_v45  ;;  %v3174_v54 = vunpack.c.l.b16 %v2982_v23  ;;  %v3178_v47 = vunpack.c.l.b16 %v2986_v38 }
 0x3a0   :  { %v3170_v11 = vunpack.c.l.b16 %v2978_v24  ;;  %v3154_v39 = vunpack.c.l.b16 %v2962_v20  ;;  %v3182_v25 = vunpack.c.l.b16 %v2990_v43  ;;  %v5999_v49 = vunpack.c.l.b16 %v5998_v27  ;;  %v6018_v27 = vld [vmem:[#allocation38_spill] sm:$0xff] }
 0x3a1   :  { %v6001_v58 = vunpack.c.l.b16 %v6000_v30  ;;  %v6003_v57 = vunpack.c.l.b16 %v6002_v33  ;;  %v6005_v44 = vunpack.c.l.b16 %v6004_v40  ;;  %v3186_v46 = vunpack.c.l.b16 %v2994_v48  ;;  %v6020_v30 = vld [vmem:[#allocation18_spill] sm:$0xff]  ;;  %v6024_v40 = vld [vmem:[#allocation19_spill] sm:$0xff] }
 0x3a2   :  { %v6007_v31 = vunpack.c.l.b16 %v6006_v55  ;;  %v6008_v50 = vunpack.c.l.b16 %v5100_v17  ;;  %v2115_v63 = vadd.s32 %v5407_v4, %v6009_v29  ;;  %v2147_v35 = vadd.s32 %v5431_v14, %v6010_v56  ;;  %v6030_v29 = vld [vmem:[#allocation13_spill] sm:$0xff]  ;;  %v6033_v56 = vld [vmem:[#allocation71_spill] sm:$0xff] }
 0x3a3   :  { %v3215_v42 = vsel %vm3187_vm2, %v6001_v58, %v5999_v49  ;;  %v3243_v21 = vsel %vm3187_vm2, %v6005_v44, %v6003_v57  ;;  %v2815_v9 = vadd.s32 %v5494_v61, %v6011_v2  ;;  %v2847_v32 = vadd.s32 %v6013_v10, %v6012_v53  ;;  %v6034_v2 = vld [vmem:[#allocation63_spill] sm:$0xff]  ;;  %v6038_v10 = vld [vmem:[#allocation60_spill] sm:$0xff] }
 0x3a4   :  { %v3216_v60 = vsel %vm3189_vm4, %v6007_v31, %v3215_v42  ;;  %v3244_v36 = vsel %vm3189_vm4, %v6008_v50, %v3243_v21  ;;  %v2819_v17 = vadd.s32 %v5536_v6, %v2115_v63  ;;  %v2851_v12 = vadd.s32 %v5569_v59, %v2147_v35  ;;  %v6026_v21 = vld [vmem:[#allocation23_spill] sm:$0xff]  ;;  %v6028_v31 = vld [vmem:[#allocation52_spill] sm:$0xff] }
 0x3a5   :  { %v3217_v16 = vsel %vm3191_vm5, %v3138_v41, %v3216_v60  ;;  %v3245_v1 = vsel %vm3191_vm5, %v3170_v11, %v3244_v36  ;;  %v2887_v14 = vcvt.s32.f32 %v6014_v28  ;;  %v2891_v34 = vcvt.s32.f32 %v2815_v9  ;;  %v6029_v60 = vld [vmem:[#allocation70_spill] sm:$0xff]  ;;  %v6035_v9 = vld [vmem:[#allocation76_spill] sm:$0xff] }
 0x3a6   :  { %v3218_v8 = vsel %vm3193_vm6, %v3142_v22, %v3217_v16  ;;  %v3246_v15 = vsel %vm3193_vm6, %v3174_v54, %v3245_v1  ;;  %v2895_v7 = vcvt.s32.f32 %v2819_v17  ;;  %v2919_v51 = vcvt.s32.f32 %v6015_v19  ;;  %v6032_v1 = vld [vmem:[#allocation55_spill] sm:$0xff]  ;;  %v6041_v28 = vld [vmem:[#allocation78_spill] sm:$0xff] }
 0x3a7   :  { %v3219_v4 = vsel %vm3195_vm7, %v3146_v5, %v3218_v8  ;;  %v3247_v62 = vsel %vm3195_vm7, %v3178_v47, %v3246_v15  ;;  %v2923_v26 = vcvt.s32.f32 %v2847_v32  ;;  %v2927_v23 = vcvt.s32.f32 %v2851_v12  ;;  %v6016_v5 = vld [vmem:[#allocation66_spill] sm:$0xff]  ;;  %v6017_v47 = vld [vmem:[#allocation68_spill] sm:$0xff]  ;;  %v6040_v12 = vld [vmem:[#allocation65_spill] sm:$0xff] }
 0x3a8   :  { %v3220_v52 = vsel %vm3197_vm8, %v3150_v0, %v3219_v4  ;;  %v3248_v61 = vsel %vm3197_vm8, %v3182_v25, %v3247_v62  ;;  %v2951_v45 = vpack.c.bf16 %v2887_v14, %v2887_v14  ;;  %v2955_v38 = vpack.c.bf16 %v2891_v34, %v2891_v34  ;;  %v6036_v15 = vld [vmem:[#allocation58_spill] sm:$0xff] }
 0x3a9   :  { %v3221_v3 = vsel %vm3199_vm9, %v3154_v39, %v3220_v52  ;;  %v3249_v6 = vsel %vm3199_vm9, %v3186_v46, %v3248_v61  ;;  %v2783_v59 = vadd.s32 %v2782_v13, %v5559_v18  ;;  %v2959_v43 = vpack.c.bf16 %v2895_v7, %v2895_v7  ;;  %v6022_v13 = vld [vmem:[#allocation30_spill] sm:$0xff]  ;;  %v6042_v7 = vld [vmem:[#allocation73_spill] sm:$0xff] }
 0x3aa   :  { %v3253_v24 = vpack.c.b16 %v3249_v6, %v3221_v3  ;;  %v2983_v41 = vpack.c.bf16 %v2919_v51, %v2919_v51  ;;  %v2987_v20 = vpack.c.bf16 %v2923_v26, %v2923_v26  ;;  %v2991_v22 = vpack.c.bf16 %v2927_v23, %v2927_v23  ;;  %v6043_v23 = vld [vmem:[#allocation75_spill] sm:$0xff] }
 0x3ab   :  { %v3139_v0 = vunpack.c.l.b16 %v6016_v5  ;;  %v3143_v48 = vunpack.c.l.b16 %v2951_v45  ;;  %v3147_v11 = vunpack.c.l.b16 %v2955_v38  ;;  %v3151_v54 = vunpack.c.l.b16 %v2959_v43 }
 0x3ac   :  { %3653 = vmatprep.mubr.bf16.mxu0 %v3253_v24  ;;  %v3171_v39 = vunpack.c.l.b16 %v6017_v47  ;;  %v3175_v25 = vunpack.c.l.b16 %v2983_v41  ;;  %v6019_v49 = vunpack.c.l.b16 %v6018_v27  ;;  %v6021_v58 = vunpack.c.l.b16 %v6020_v30  ;;  %v6044_v47 = vld [vmem:[#allocation59_spill] sm:$0xff] }
 0x3ad   :  { %v3179_v18 = vunpack.c.l.b16 %v2987_v20  ;;  %v6023_v33 = vunpack.c.l.b16 %v6022_v13  ;;  %v6025_v44 = vunpack.c.l.b16 %v6024_v40  ;;  %v6027_v46 = vunpack.c.l.b16 %v6026_v21  ;;  %v6046_v30 = vld [vmem:[#allocation67_spill] sm:$0xff] }
 0x3ae   :  { %v3188_v42 = vsel %vm3187_vm2, %v6021_v58, %v6019_v49  ;;  %v2117_v50 = vadd.s32 %v6029_v60, %v6028_v31  ;;  %v3183_v36 = vunpack.c.l.b16 %v2991_v22  ;;  %v6031_v63 = vunpack.c.l.b16 %v6030_v29  ;;  %v6050_v40 = vld [vmem:[#allocation43_spill] sm:$0xff]  ;;  %v6054_v31 = vld [vmem:[#allocation25_spill] sm:$0xff] }
 0x3af   :  { %v3190_v57 = vsel %vm3189_vm4, %v6023_v33, %v3188_v42  ;;  %v3222_v55 = vsel %vm3187_vm2, %v6027_v46, %v6025_v44  ;;  %v2149_v35 = vadd.s32 %v6033_v56, %v6032_v1  ;;  %v2817_v8 = vadd.s32 %v6035_v9, %v6034_v2  ;;  %v6047_v42 = vld [vmem:[#allocation69_spill] sm:$0xff]  ;;  %v6048_v33 = vld [vmem:[#allocation40_spill] sm:$0xff] }
 0x3b0   :  { %v3223_v16 = vsel %vm3189_vm4, %v6031_v63, %v3222_v55  ;;  %v6037_v17 = vunpack.c.l.b16 %v6036_v15  ;;  %v6039_v32 = vunpack.c.l.b16 %v6038_v10  ;;  %v2821_v62 = vadd.s32 %v5538_v37, %v2117_v50  ;;  %v6052_v46 = vld [vmem:[#allocation21_spill] sm:$0xff]  ;;  %v6056_v63 = vld [vmem:[#allocation11_spill] sm:$0xff]  ;;  %v6058_v56 = vld [vmem:[#allocation32_spill] sm:$0xff] }
 0x3b1   :  { %v2849_v14 = vadd.s32 %v6041_v28, %v6040_v12  ;;  %v2853_v34 = vadd.s32 %v2783_v59, %v2149_v35  ;;  %v2889_v3 = vcvt.s32.f32 %v6042_v7  ;;  %v2893_v51 = vcvt.s32.f32 %v2817_v8 }
 0x3b2   :  { %v3192_v53 = vsel %vm3191_vm5, %v6037_v17, %v3190_v57  ;;  %v3224_v4 = vsel %vm3191_vm5, %v6039_v32, %v3223_v16  ;;  %v2897_v26 = vcvt.s32.f32 %v2821_v62  ;;  %v2921_v45 = vcvt.s32.f32 %v6043_v23 }
 0x3b3   :  { %v3194_v52 = vsel %vm3193_vm6, %v3139_v0, %v3192_v53  ;;  %v3225_v61 = vsel %vm3193_vm6, %v3171_v39, %v3224_v4  ;;  %v2925_v38 = vcvt.s32.f32 %v2849_v14  ;;  %v2929_v59 = vcvt.s32.f32 %v2853_v34  ;;  %v3691_v34 = vpop.permute.xlu1 %3690 }
 0x3b4   :  { %v3196_v6 = vsel %vm3195_vm7, %v3143_v48, %v3194_v52  ;;  %v3226_v19 = vsel %vm3195_vm7, %v3175_v25, %v3225_v61  ;;  %v2953_v20 = vpack.c.bf16 %v2889_v3, %v2889_v3  ;;  %v2957_v5 = vpack.c.bf16 %v2893_v51, %v2893_v51  ;;  %v6045_v25 = vld [vmem:[#allocation61_spill] sm:$0xff]  ;;  %v3686_v61 = vpop.permute.xlu0 %3685 }
 0x3b5   :  { %v3198_v24 = vsel %vm3197_vm8, %v3147_v11, %v3196_v6  ;;  %v3227_v37 = vsel %vm3197_vm8, %v3179_v18, %v3226_v19  ;;  %v2985_v0 = vpack.c.bf16 %v2921_v45, %v2921_v45  ;;  %v2989_v48 = vpack.c.bf16 %v2925_v38, %v2925_v38 }
 0x3b6   :  { %v3200_v43 = vsel %vm3199_vm9, %v3151_v54, %v3198_v24  ;;  %v3228_v41 = vsel %vm3199_vm9, %v3183_v36, %v3227_v37  ;;  %v3137_v39 = vunpack.c.l.b16 %v6044_v47  ;;  %v3169_v27 = vunpack.c.l.b16 %v6045_v25 }
 0x3b7   :  { %v3250_v22 = vpack.c.b16 %v3228_v41, %v3200_v43  ;;  %v2961_v11 = vpack.c.bf16 %v2897_v26, %v2897_v26  ;;  %v2993_v49 = vpack.c.bf16 %v2929_v59, %v2929_v59  ;;  %v3141_v58 = vunpack.c.l.b16 %v6046_v30 }
 0x3b8   :  { %v3173_v18 = vunpack.c.l.b16 %v6047_v42  ;;  %v3145_v54 = vunpack.c.l.b16 %v2953_v20  ;;  %v3177_v13 = vunpack.c.l.b16 %v2985_v0  ;;  %v6049_v57 = vunpack.c.l.b16 %v6048_v33 }
 0x3b9   :  { %3611 = vmatmul.mubr.bf16.vlgmr.msra.gmra.mrb[0].mxu1 %v3250_v22  ;;  %v6051_v44 = vunpack.c.l.b16 %v6050_v40  ;;  %v6053_v55 = vunpack.c.l.b16 %v6052_v46  ;;  %v6055_v60 = vunpack.c.l.b16 %v6054_v31  ;;  %v3149_v36 = vunpack.c.l.b16 %v2957_v5 }
 0x3ba   :  { %v3181_v29 = vunpack.c.l.b16 %v2989_v48  ;;  %v6057_v16 = vunpack.c.l.b16 %v6056_v63  ;;  %v6059_v35 = vunpack.c.l.b16 %v6058_v56  ;;  %v3153_v9 = vunpack.c.l.b16 %v2961_v11 }
 0x3bb   :  { %v3208_v21 = vsel %vm3187_vm2, %v6051_v44, %v6049_v57  ;;  %v3236_v50 = vsel %vm3187_vm2, %v6055_v60, %v6053_v55  ;;  %v3185_v8 = vunpack.c.l.b16 %v2993_v49  ;;  %3893 = vrcp.f32 %v3686_v61 }
 0x3bc   :  { %v3209_v1 = vsel %vm3189_vm4, %v6057_v16, %v3208_v21  ;;  %v3237_v2 = vsel %vm3189_vm4, %v6059_v35, %v3236_v50  ;;  %3895 = vrcp.f32 %v3691_v34 }
 0x3bd   :  { %v3210_v15 = vsel %vm3191_vm5, %v3137_v39, %v3209_v1  ;;  %v3238_v17 = vsel %vm3191_vm5, %v3169_v27, %v3237_v2 }
 0x3be   :  { %v3211_v53 = vsel %vm3193_vm6, %v3141_v58, %v3210_v15  ;;  %v3239_v10 = vsel %vm3193_vm6, %v3173_v18, %v3238_v17 }
 0x3bf   :  { %v3212_v32 = vsel %vm3195_vm7, %v3145_v54, %v3211_v53  ;;  %v3240_v4 = vsel %vm3195_vm7, %v3177_v13, %v3239_v10 }
 0x3c0   :  { %v3213_v62 = vsel %vm3197_vm8, %v3149_v36, %v3212_v32  ;;  %v3241_v12 = vsel %vm3197_vm8, %v3181_v29, %v3240_v4 }
 0x3c1   :  { %v3214_v28 = vsel %vm3199_vm9, %v3153_v9, %v3213_v62  ;;  %v3242_v14 = vsel %vm3199_vm9, %v3185_v8, %v3241_v12 }
 0x3c2   :  { %v3252_v52 = vpack.c.b16 %v3242_v14, %v3214_v28 }
 0x3c4   :  { %3654 = vmatmul.mubr.bf16.vlgmr.msra.gmra.mrb[0].mxu0 %v3252_v52 }
 0x3c5   :  { %v3894_v26 = vpop.eup %3893 }
 0x3c6   :  { %v3896_v23 = vpop.eup %3895 }
 0x48c   :  { %v3612_v7 = vpop.f32.mrb[0].mxu1 }
 0x48d   :  { %v3614_v3 = vpop.f32.mrb[1].mxu1 }
 0x48e   :  { %v3616_v6 = vpop.f32.mrb[2].mxu1 }
 0x48f   :  { %v3618_v19 = vpop.f32.mrb[3].mxu1 }
 0x497   :  { %v3655_v51 = vpop.f32.mrb[0].mxu0 }
 0x498   :  { %v3656_v24 = vadd.f32 %v3655_v51, %v3612_v7  ;;  %v3657_v37 = vpop.f32.mrb[1].mxu0 }
 0x499   :  { %v3658_v45 = vadd.f32 %v3657_v37, %v3614_v3  ;;  %v3659_v38 = vpop.f32.mrb[2].mxu0 }
 0x49a   :  { %v3694_v43 = vmul.f32 %v3894_v26, %v3656_v24  ;;  %v3660_v41 = vadd.f32 %v3659_v38, %v3616_v6  ;;  %v3661_v59 = vpop.f32.mrb[3].mxu0 }
 0x49b   :  { %v3695_v20 = vmul.f32 %v3894_v26, %v3658_v45  ;;  %v3662_v22 = vadd.f32 %v3661_v59, %v3618_v19 }
 0x49c   :  { %3699 = vst [vmem:[#allocation6] sm:$0xff] %v3694_v43  ;;  %v3697_v5 = vmul.f32 %v3896_v23, %v3660_v41 }
 0x49d   :  { %3700 = vst [vmem:[#allocation6 + $0x8] sm:$0xff] %v3695_v20  ;;  %v3698_v0 = vmul.f32 %v3896_v23, %v3662_v22 }
 0x49e   :  { %3701 = vst [vmem:[#allocation6 + $0x10] sm:$0xff] %v3697_v5 }
 0x49f   :  { %3702 = vst [vmem:[#allocation6 + $0x18] sm:$0xff] %v3698_v0 }
 0x4a0   :  { %3930 = shalt.err (!%p3927_p12)
}
 0x4a1   :  { %s3931_s9 = scalar_lea.hbm %s5784_s3, 512 }
 0x4a2   :  { %p3932_p13 = scmp.ne.s32.totalorder %s5784_s3, %s3931_s9  ;;  %p3935_p0 = scmp.lt.u32.totalorder %s3931_s9, %s5784_s3 }
 0x4a4   :  { %p3937_p1 = pnand %p3935_p0, %p3932_p13 }
 0x4a6   :  { %3940 = shalt.err (!%p3937_p1)
}
 0x4a7   :  { %s3950_s14 = smov 256   ;;  %s3951_s15 = smov 16  }
 0x4a8   :  { %3714 = dma.vmem_to_hbm [thread:$0]  %s3709_s5, 512, %s5784_s3, [#allocation5], %s3950_s14, %s3950_s14, %s3951_s15  }
 0x4a9   :  { %3943 = dma.done.wait [#allocation5], 512  }
 0x4aa   :  { %3944 = vsyncadd [#allocation5], 4294966784 }
 0x4ab   :  { %3718 = vsyncpa [#allocation4], 1 }
 0x4ac   :  { %3719 = vsyncpa [#allocation5], 1 }

</bundles_post_ra>
